<compile_context>
chip_gen: v5e
topology: v5e:2x2
jax: 0.10.0
libtpu: 0.0.40
codegen_flags: <defaults>
</compile_context>

<pallas_src>
import functools

import numpy as np
import jax
import jax.numpy as jnp
from jax import lax
from jax.experimental import pallas as pl
from jax.experimental.pallas import tpu as pltpu

BN_EPS = 1e-5


# ------------------------------ helper tables ------------------------------ #

def _make_tap_masks(H, W):
    """(9, H*W) f32 validity masks for the 3x3 'same' padding border."""
    ii, jj = np.meshgrid(np.arange(H), np.arange(W), indexing="ij")
    masks = []
    for ky in range(3):
        for kx in range(3):
            dy, dx = ky - 1, kx - 1
            valid = ((ii + dy >= 0) & (ii + dy < H) &
                     (jj + dx >= 0) & (jj + dx < W))
            masks.append(valid.reshape(-1).astype(np.float32))
    return jnp.asarray(np.stack(masks))


def _choose_images_per_tile(N, HW, max_lanes=2048):
    """Largest divisor of N whose lane slab fits the cap (grid=(1,) always ok)."""
    best = N
    for ipt in range(N, 0, -1):
        if N % ipt:
            continue
        lanes = ipt * HW
        if (lanes % 128 == 0 or ipt == N) and (lanes <= max_lanes or ipt == 1):
            best = ipt
            break
    return best


# ------------------------------- fused kernel ------------------------------- #

def _fused_kernel(x_ref, masks_ref, bias2_ref, w2_ref, w3_ref, w4_ref, wf_ref,
                  shifts_ref, o_ref, col_ref, maskb_ref, cat_ref,
                  *, W, lanes, cin_p, cout, cout_p, mrows):
    # Tap order / flat pixel offsets of a 3x3 'same' conv.
    taps = [(ky - 1) * W + (kx - 1) for ky in range(3) for kx in range(3)]
    off_centre = [t for t, d in enumerate(taps) if d != 0]          # 8 taps

    # Broadcast each off-centre tap mask to full sublane height ONCE per step.
    for j, t in enumerate(off_centre):
        maskb_ref[j * mrows:(j + 1) * mrows, :] = jnp.broadcast_to(
            masks_ref[t:t + 1, :], (mrows, lanes))

    def im2col(h, cm):
        # h: (cm, lanes) -> tap-major (9*cm, lanes) written into col_ref[0:9*cm].
        j = 0
        for t, d in enumerate(taps):
            if d == 0:
                col_ref[t * cm:(t + 1) * cm, :] = h
            else:
                # shifted[:, p] = h[:, p + d] (circular); wrapped / cross-image
                # lanes are zeroed by the border mask (true padded value is 0).
                shifted = pltpu.roll(h, (-d) % lanes, 1)
                col_ref[t * cm:(t + 1) * cm, :] = (
                    shifted * maskb_ref[j * mrows:j * mrows + cm, :])
                j += 1

    x = x_ref[...]                                    # (cin_p, lanes)

    # ---- Stage 2: all three branches' (1x1 -> 3x3 -> BN -> ReLU) fused into
    # one matmul on a single shared im2col of x (1x1 composed into the weights).
    im2col(x, cin_p)
    y2 = jnp.dot(w2_ref[...], col_ref[0:9 * cin_p, :],
                 preferred_element_type=jnp.float32) + bias2_ref[...]
    a2 = jnp.maximum(y2, 0.0)                         # rows: [b5(24), b7(24), b3(24)]
    cat_ref[48:72, :] = a2[48:72, :]                  # b3 done -> cat slot [b7,b5,b3]

    # ---- Stage 3: block-diagonal {branch5x5_3, branch7x7_3} + BN + ReLU.
    im2col(a2[0:48, :], 48)
    y3 = jnp.dot(w3_ref[...], col_ref[0:432, :],
                 preferred_element_type=jnp.float32) + shifts_ref[0:48, :]
    a3 = jnp.maximum(y3, 0.0)                         # rows: [b5_final(24), b7(24)]
    cat_ref[24:48, :] = a3[0:24, :]                   # b5 done

    # ---- Stage 4: branch7x7_4 + BN + ReLU.
    im2col(a3[24:48, :], 24)
    y4 = jnp.dot(w4_ref[...], col_ref[0:216, :],
                 preferred_element_type=jnp.float32) + shifts_ref[48:72, :]
    cat_ref[0:24, :] = jnp.maximum(y4, 0.0)           # b7 done

    # ---- Final 1x1 over the concatenated (b7, b5, b3) channels.
    out = jnp.dot(wf_ref[...], cat_ref[...],
                  preferred_element_type=jnp.float32) + shifts_ref[72:72 + cout_p, :]
    o_ref[...] = out[0:cout, :].astype(o_ref.dtype)


# ------------------------- parameter packing / wrapper ----------------------- #

def _pack_params(p, masks_hw, cin, cin_p, ipt, cout, cout_p):
    """Repack params: BN folded (inference), 1x1 composed into stage-2 3x3."""

    def bn_fold(bn_p):
        g, beta, mean, var = bn_p
        scale = g / jnp.sqrt(var + BN_EPS)
        return scale, beta - scale * mean

    def taps_of(w_hwio):                       # (3,3,cm,cout) -> 9 x (cout, cm)
        return [w_hwio[ky, kx].T for ky in range(3) for kx in range(3)]

    # Stage 2: output-row order [b5, b7, b3] so stage-3's input is rows 0:48.
    branches = [
        (p["b5_1_w"], p["b5_1_b"], p["b5_2_w"], p["b5_2_b"], p["b5_bn1"]),
        (p["b7_1_w"], p["b7_1_b"], p["b7_2_w"], p["b7_2_b"], p["b7_bn1"]),
        (p["b3_1_w"], p["b3_1_b"], p["b3_2_w"], p["b3_2_b"], p["b3_bn"]),
    ]
    w2_rows, bias2_rows = [], []
    for w1, b1, w2, b2, bn_p in branches:
        scale, shift = bn_fold(bn_p)                  # (24,), (24,)
        W1g = w1.T                                    # (16, cin)
        tw = taps_of(w2)                              # 9 x (24, 16)
        cols, qs = [], []
        for t in range(9):
            c = tw[t] @ W1g                           # composed (24, cin)
            c = jnp.pad(c, ((0, 0), (0, cin_p - cin)))
            cols.append(c * scale[:, None])
            qs.append(tw[t] @ b1)                     # 1x1-bias contribution per tap
        w2_rows.append(jnp.concatenate(cols, axis=1))            # (24, 9*cin_p)
        q = jnp.stack(qs, axis=0)                     # (9, 24)
        # Per-pixel additive term (border-aware 1x1 bias + conv bias + BN shift).
        bias2_rows.append(scale[:, None] * (q.T @ masks_hw)
                          + (scale * b2 + shift)[:, None])        # (24, HW)
    w2 = jnp.concatenate(w2_rows, axis=0)             # (72, 9*cin_p)
    bias2 = jnp.tile(jnp.concatenate(bias2_rows, axis=0), (1, ipt))   # (72, lanes)

    def scaled_taps(w_hwio, b_conv, bn_p):
        scale, shift = bn_fold(bn_p)
        tw = [t * scale[:, None] for t in taps_of(w_hwio)]
        return tw, (scale * b_conv + shift).reshape(-1, 1)

    # Stage 3: block-diagonal fusion of branch5x5_3 / branch7x7_3.
    t53, s53 = scaled_taps(p["b5_3_w"], p["b5_3_b"], p["b5_bn2"])
    t73, s73 = scaled_taps(p["b7_3_w"], p["b7_3_b"], p["b7_bn2"])
    z = jnp.zeros((24, 24), jnp.float32)
    w3 = jnp.concatenate(
        [jnp.concatenate([jnp.concatenate([t53[t], z], axis=1),
                          jnp.concatenate([z, t73[t]], axis=1)], axis=0)
         for t in range(9)], axis=1)                  # (48, 432)
    s3 = jnp.concatenate([s53, s73], axis=0)          # (48, 1)

    # Stage 4: branch7x7_4.
    t74, s74 = scaled_taps(p["b7_4_w"], p["b7_4_b"], p["b7_bn3"])
    w4 = jnp.concatenate(t74, axis=1)                 # (24, 216)

    # Final 1x1 (input channel order matches torch.cat((b7, b5, b3), dim=1)).
    wf = jnp.pad(p["final_w"].T, ((0, cout_p - cout), (0, 0)))    # (cout_p, 72)
    bf = jnp.pad(p["final_b"], (0, cout_p - cout)).reshape(-1, 1)

    shifts = jnp.concatenate([s3, s74, bf], axis=0)   # (72 + cout_p, 1)
    return [bias2, w2, w3, w4, wf, shifts]


@jax.jit
def multi_block_forward(params, x_nchw):
    N, cin, H, W = x_nchw.shape
    HW = H * W
    cout = params["final_b"].shape[0]
    cin_p = ((max(cin, 8) + 7) // 8) * 8
    cout_p = ((max(cout, 8) + 7) // 8) * 8
    mrows = max(48, cin_p)

    ipt = _choose_images_per_tile(N, HW)              # images folded per lane slab
    tiles = N // ipt
    lanes = ipt * HW

    # NCHW -> (C, N*H*W): channels on sublanes, image-contiguous pixels on lanes.
    x = jnp.transpose(x_nchw.reshape(N, cin, HW), (1, 0, 2)).reshape(cin, N * HW)
    if cin_p != cin:
        x = jnp.pad(x, ((0, cin_p - cin), (0, 0)))

    masks_hw = _make_tap_masks(H, W)                  # (9, HW)
    masks = jnp.tile(masks_hw, (1, ipt))              # (9, lanes)
    packed = _pack_params(params, masks_hw, cin, cin_p, ipt, cout, cout_p)

    operands = [x, masks] + packed
    in_specs = [pl.BlockSpec((cin_p, lanes), lambda n: (0, n))]
    in_specs += [pl.BlockSpec(a.shape, lambda n: (0, 0)) for a in operands[1:]]

    out = pl.pallas_call(
        functools.partial(_fused_kernel, W=W, lanes=lanes, cin_p=cin_p,
                          cout=cout, cout_p=cout_p, mrows=mrows),
        out_shape=jax.ShapeDtypeStruct((cout, N * HW), jnp.float32),
        grid=(tiles,),
        in_specs=in_specs,
        out_specs=pl.BlockSpec((cout, lanes), lambda n: (0, n)),
        scratch_shapes=[pltpu.VMEM((9 * mrows, lanes), jnp.float32),   # im2col
                        pltpu.VMEM((8 * mrows, lanes), jnp.float32),   # bcast masks
                        pltpu.VMEM((72, lanes), jnp.float32)],         # concat buf
        compiler_params=pltpu.CompilerParams(
            dimension_semantics=("parallel",)),
    )(*operands)

    # (C, N*H*W) -> NCHW
    return jnp.transpose(out.reshape(cout, N, HW), (1, 0, 2)).reshape(N, cout, H, W)


# --------------------------- parameters (canonical) -------------------------- #

def init_params(key, in_channels, out_channels):
    keys = iter(jax.random.split(key, 64))

    def conv(kh, kw, cin, cout):
        w = 0.1 * jax.random.normal(next(keys), (kh, kw, cin, cout), jnp.float32)
        b = 0.1 * jax.random.normal(next(keys), (cout,), jnp.float32)
        return w, b

    def bn(c):
        gamma = 1.0 + 0.1 * jax.random.normal(next(keys), (c,), jnp.float32)
        beta = 0.1 * jax.random.normal(next(keys), (c,), jnp.float32)
        mean = 0.1 * jax.random.normal(next(keys), (c,), jnp.float32)
        var = 1.0 + 0.1 * jnp.abs(jax.random.normal(next(keys), (c,), jnp.float32))
        return (gamma, beta, mean, var)

    p = {}
    w, b = conv(1, 1, in_channels, 16); p['b3_1_w'], p['b3_1_b'] = w.reshape(in_channels, 16), b
    p['b3_2_w'], p['b3_2_b'] = conv(3, 3, 16, 24); p['b3_bn'] = bn(24)
    w, b = conv(1, 1, in_channels, 16); p['b5_1_w'], p['b5_1_b'] = w.reshape(in_channels, 16), b
    p['b5_2_w'], p['b5_2_b'] = conv(3, 3, 16, 24); p['b5_bn1'] = bn(24)
    p['b5_3_w'], p['b5_3_b'] = conv(3, 3, 24, 24); p['b5_bn2'] = bn(24)
    w, b = conv(1, 1, in_channels, 16); p['b7_1_w'], p['b7_1_b'] = w.reshape(in_channels, 16), b
    p['b7_2_w'], p['b7_2_b'] = conv(3, 3, 16, 24); p['b7_bn1'] = bn(24)
    p['b7_3_w'], p['b7_3_b'] = conv(3, 3, 24, 24); p['b7_bn2'] = bn(24)
    p['b7_4_w'], p['b7_4_b'] = conv(3, 3, 24, 24); p['b7_bn3'] = bn(24)
    w, b = conv(1, 1, 72, out_channels)
    p['final_w'], p['final_b'] = w.reshape(72, out_channels), b
    return p


# ------------------------- plain-JAX reference check ------------------------- #

def _ref_conv1x1(x, w, b):
    w4 = w.reshape(1, 1, *w.shape)
    y = lax.conv_general_dilated(x, w4, (1, 1), 'VALID',
                                 dimension_numbers=('NHWC', 'HWIO', 'NHWC'))
    return y + b


def _ref_conv3x3_bn_relu(x, w, b, bn_params):
    y = lax.conv_general_dilated(x, w, (1, 1), 'SAME',
                                 dimension_numbers=('NHWC', 'HWIO', 'NHWC')) + b
    g, be, m, v = bn_params
    y = g * (y - m) / jnp.sqrt(v + BN_EPS) + be
    return jnp.maximum(y, 0.0)


def multi_block_reference(params, x_nchw):
    p = params
    x = jnp.transpose(x_nchw, (0, 2, 3, 1))
    b3 = _ref_conv3x3_bn_relu(_ref_conv1x1(x, p['b3_1_w'], p['b3_1_b']),
                              p['b3_2_w'], p['b3_2_b'], p['b3_bn'])
    b5 = _ref_conv1x1(x, p['b5_1_w'], p['b5_1_b'])
    b5 = _ref_conv3x3_bn_relu(b5, p['b5_2_w'], p['b5_2_b'], p['b5_bn1'])
    b5 = _ref_conv3x3_bn_relu(b5, p['b5_3_w'], p['b5_3_b'], p['b5_bn2'])
    b7 = _ref_conv1x1(x, p['b7_1_w'], p['b7_1_b'])
    b7 = _ref_conv3x3_bn_relu(b7, p['b7_2_w'], p['b7_2_b'], p['b7_bn1'])
    b7 = _ref_conv3x3_bn_relu(b7, p['b7_3_w'], p['b7_3_b'], p['b7_bn2'])
    b7 = _ref_conv3x3_bn_relu(b7, p['b7_4_w'], p['b7_4_b'], p['b7_bn3'])
    cat = jnp.concatenate([b7, b5, b3], axis=-1)
    out = _ref_conv1x1(cat, p['final_w'], p['final_b'])
    return jnp.transpose(out, (0, 3, 1, 2))


# ----------------------------------- main ----------------------------------- #

if __name__ == "__main__":
    key = jax.random.PRNGKey(0)
    kx, kp = jax.random.split(key)

    N, in_channels, H, W = 2, 4, 16, 16
    out_channels = 8

    x = jax.random.normal(kx, (N, in_channels, H, W), jnp.float32)  # NCHW like torch
    params = init_params(kp, in_channels, out_channels)

    out = jax.block_until_ready(multi_block_forward(params, x))
    assert out.shape == (N, out_channels, H, W), out.shape

    ref = jax.block_until_ready(multi_block_reference(params, x))
    max_err = float(jnp.max(jnp.abs(out - ref)))
    if not bool(jnp.allclose(out, ref, atol=1e-3, rtol=1e-3)):
        raise AssertionError(f"Pallas output mismatch vs reference, max|err|={max_err}")

    print("KERNEL_OK")
</pallas_src>

<mosaic_0001>
module attributes {stable_mosaic.version = 11 : i64} {
  func.func @_fused_kernel(%arg0: i32, %arg1: memref<8x512xf32, #tpu.memory_space<vmem>>, %arg2: memref<9x512xf32, #tpu.memory_space<vmem>>, %arg3: memref<72x512xf32, #tpu.memory_space<vmem>>, %arg4: memref<72x72xf32, #tpu.memory_space<vmem>>, %arg5: memref<48x432xf32, #tpu.memory_space<vmem>>, %arg6: memref<24x216xf32, #tpu.memory_space<vmem>>, %arg7: memref<8x72xf32, #tpu.memory_space<vmem>>, %arg8: memref<80x1xf32, #tpu.memory_space<vmem>>, %arg9: memref<8x512xf32, #tpu.memory_space<vmem>>, %arg10: memref<432x512xf32, #tpu.memory_space<vmem>>, %arg11: memref<384x512xf32, #tpu.memory_space<vmem>>, %arg12: memref<72x512xf32, #tpu.memory_space<vmem>>) attributes {dimension_semantics = [#tpu.dimension_semantics<parallel>], iteration_bounds = array<i64: 1>, scalar_prefetch = 0 : i64, scratch_operands = 3 : i64, tpu.core_type = #tpu.core_type<tc>, window_params = [{transform_indices = @transform_0, window_bounds = array<i64: 8, 512>}, {pipeline_mode = #tpu.pipeline_mode<synchronous>, transform_indices = @transform_1, window_bounds = array<i64: 9, 512>}, {pipeline_mode = #tpu.pipeline_mode<synchronous>, transform_indices = @transform_2, window_bounds = array<i64: 72, 512>}, {pipeline_mode = #tpu.pipeline_mode<synchronous>, transform_indices = @transform_3, window_bounds = array<i64: 72, 72>}, {pipeline_mode = #tpu.pipeline_mode<synchronous>, transform_indices = @transform_4, window_bounds = array<i64: 48, 432>}, {pipeline_mode = #tpu.pipeline_mode<synchronous>, transform_indices = @transform_5, window_bounds = array<i64: 24, 216>}, {pipeline_mode = #tpu.pipeline_mode<synchronous>, transform_indices = @transform_6, window_bounds = array<i64: 8, 72>}, {pipeline_mode = #tpu.pipeline_mode<synchronous>, transform_indices = @transform_7, window_bounds = array<i64: 80, 1>}, {transform_indices = @transform_8, window_bounds = array<i64: 8, 512>}]} {
    %c0 = arith.constant 0 : index
    %c0_0 = arith.constant 0 : index
    %0 = vector.load %arg2[%c0, %c0_0] : memref<9x512xf32, #tpu.memory_space<vmem>>, vector<1x512xf32>
    %1 = vector.shape_cast %0 : vector<1x512xf32> to vector<1x512xf32>
    %2 = vector.broadcast %1 : vector<1x512xf32> to vector<48x512xf32>
    %c0_1 = arith.constant 0 : index
    %c0_2 = arith.constant 0 : index
    %3 = vector.load %arg11[%c0_1, %c0_2] : memref<384x512xf32, #tpu.memory_space<vmem>>, vector<48x512xf32>
    tpu.vector_store %arg11[%c0_1, %c0_2], %2 {strides = array<i32>} : memref<384x512xf32, #tpu.memory_space<vmem>>, vector<48x512xf32>,
    %c1 = arith.constant 1 : index
    %c0_3 = arith.constant 0 : index
    %4 = vector.load %arg2[%c1, %c0_3] : memref<9x512xf32, #tpu.memory_space<vmem>>, vector<1x512xf32>
    %5 = vector.shape_cast %4 : vector<1x512xf32> to vector<1x512xf32>
    %6 = vector.broadcast %5 : vector<1x512xf32> to vector<48x512xf32>
    %c48 = arith.constant 48 : index
    %c0_4 = arith.constant 0 : index
    %7 = vector.load %arg11[%c48, %c0_4] : memref<384x512xf32, #tpu.memory_space<vmem>>, vector<48x512xf32>
    tpu.vector_store %arg11[%c48, %c0_4], %6 {strides = array<i32>} : memref<384x512xf32, #tpu.memory_space<vmem>>, vector<48x512xf32>,
    %c2 = arith.constant 2 : index
    %c0_5 = arith.constant 0 : index
    %8 = vector.load %arg2[%c2, %c0_5] : memref<9x512xf32, #tpu.memory_space<vmem>>, vector<1x512xf32>
    %9 = vector.shape_cast %8 : vector<1x512xf32> to vector<1x512xf32>
    %10 = vector.broadcast %9 : vector<1x512xf32> to vector<48x512xf32>
    %c96 = arith.constant 96 : index
    %c0_6 = arith.constant 0 : index
    %11 = vector.load %arg11[%c96, %c0_6] : memref<384x512xf32, #tpu.memory_space<vmem>>, vector<48x512xf32>
    tpu.vector_store %arg11[%c96, %c0_6], %10 {strides = array<i32>} : memref<384x512xf32, #tpu.memory_space<vmem>>, vector<48x512xf32>,
    %c3 = arith.constant 3 : index
    %c0_7 = arith.constant 0 : index
    %12 = vector.load %arg2[%c3, %c0_7] : memref<9x512xf32, #tpu.memory_space<vmem>>, vector<1x512xf32>
    %13 = vector.shape_cast %12 : vector<1x512xf32> to vector<1x512xf32>
    %14 = vector.broadcast %13 : vector<1x512xf32> to vector<48x512xf32>
    %c144 = arith.constant 144 : index
    %c0_8 = arith.constant 0 : index
    %15 = vector.load %arg11[%c144, %c0_8] : memref<384x512xf32, #tpu.memory_space<vmem>>, vector<48x512xf32>
    tpu.vector_store %arg11[%c144, %c0_8], %14 {strides = array<i32>} : memref<384x512xf32, #tpu.memory_space<vmem>>, vector<48x512xf32>,
    %c5 = arith.constant 5 : index
    %c0_9 = arith.constant 0 : index
    %16 = vector.load %arg2[%c5, %c0_9] : memref<9x512xf32, #tpu.memory_space<vmem>>, vector<1x512xf32>
    %17 = vector.shape_cast %16 : vector<1x512xf32> to vector<1x512xf32>
    %18 = vector.broadcast %17 : vector<1x512xf32> to vector<48x512xf32>
    %c192 = arith.constant 192 : index
    %c0_10 = arith.constant 0 : index
    %19 = vector.load %arg11[%c192, %c0_10] : memref<384x512xf32, #tpu.memory_space<vmem>>, vector<48x512xf32>
    tpu.vector_store %arg11[%c192, %c0_10], %18 {strides = array<i32>} : memref<384x512xf32, #tpu.memory_space<vmem>>, vector<48x512xf32>,
    %c6 = arith.constant 6 : index
    %c0_11 = arith.constant 0 : index
    %20 = vector.load %arg2[%c6, %c0_11] : memref<9x512xf32, #tpu.memory_space<vmem>>, vector<1x512xf32>
    %21 = vector.shape_cast %20 : vector<1x512xf32> to vector<1x512xf32>
    %22 = vector.broadcast %21 : vector<1x512xf32> to vector<48x512xf32>
    %c240 = arith.constant 240 : index
    %c0_12 = arith.constant 0 : index
    %23 = vector.load %arg11[%c240, %c0_12] : memref<384x512xf32, #tpu.memory_space<vmem>>, vector<48x512xf32>
    tpu.vector_store %arg11[%c240, %c0_12], %22 {strides = array<i32>} : memref<384x512xf32, #tpu.memory_space<vmem>>, vector<48x512xf32>,
    %c7 = arith.constant 7 : index
    %c0_13 = arith.constant 0 : index
    %24 = vector.load %arg2[%c7, %c0_13] : memref<9x512xf32, #tpu.memory_space<vmem>>, vector<1x512xf32>
    %25 = vector.shape_cast %24 : vector<1x512xf32> to vector<1x512xf32>
    %26 = vector.broadcast %25 : vector<1x512xf32> to vector<48x512xf32>
    %c288 = arith.constant 288 : index
    %c0_14 = arith.constant 0 : index
    %27 = vector.load %arg11[%c288, %c0_14] : memref<384x512xf32, #tpu.memory_space<vmem>>, vector<48x512xf32>
    tpu.vector_store %arg11[%c288, %c0_14], %26 {strides = array<i32>} : memref<384x512xf32, #tpu.memory_space<vmem>>, vector<48x512xf32>,
    %c8 = arith.constant 8 : index
    %c0_15 = arith.constant 0 : index
    %28 = vector.load %arg2[%c8, %c0_15] : memref<9x512xf32, #tpu.memory_space<vmem>>, vector<1x512xf32>
    %29 = vector.shape_cast %28 : vector<1x512xf32> to vector<1x512xf32>
    %30 = vector.broadcast %29 : vector<1x512xf32> to vector<48x512xf32>
    %c336 = arith.constant 336 : index
    %c0_16 = arith.constant 0 : index
    %31 = vector.load %arg11[%c336, %c0_16] : memref<384x512xf32, #tpu.memory_space<vmem>>, vector<48x512xf32>
    tpu.vector_store %arg11[%c336, %c0_16], %30 {strides = array<i32>} : memref<384x512xf32, #tpu.memory_space<vmem>>, vector<48x512xf32>,
    %c0_17 = arith.constant 0 : index
    %c0_18 = arith.constant 0 : index
    %32 = vector.load %arg1[%c0_17, %c0_18] : memref<8x512xf32, #tpu.memory_space<vmem>>, vector<8x512xf32>
    %c17_i32 = arith.constant 17 : i32
    %33 = tpu.dynamic_rotate %32 by %c17_i32 dim 1 : vector<8x512xf32>, i32 -> vector<8x512xf32>
    %c0_19 = arith.constant 0 : index
    %c0_20 = arith.constant 0 : index
    %34 = vector.load %arg11[%c0_19, %c0_20] : memref<384x512xf32, #tpu.memory_space<vmem>>, vector<8x512xf32>
    %35 = arith.mulf %33, %34 : vector<8x512xf32>
    %c0_21 = arith.constant 0 : index
    %c0_22 = arith.constant 0 : index
    %36 = vector.load %arg10[%c0_21, %c0_22] : memref<432x512xf32, #tpu.memory_space<vmem>>, vector<8x512xf32>
    tpu.vector_store %arg10[%c0_21, %c0_22], %35 {strides = array<i32>} : memref<432x512xf32, #tpu.memory_space<vmem>>, vector<8x512xf32>,
    %c16_i32 = arith.constant 16 : i32
    %37 = tpu.dynamic_rotate %32 by %c16_i32 dim 1 : vector<8x512xf32>, i32 -> vector<8x512xf32>
    %c48_23 = arith.constant 48 : index
    %c0_24 = arith.constant 0 : index
    %38 = vector.load %arg11[%c48_23, %c0_24] : memref<384x512xf32, #tpu.memory_space<vmem>>, vector<8x512xf32>
    %39 = arith.mulf %37, %38 : vector<8x512xf32>
    %c8_25 = arith.constant 8 : index
    %c0_26 = arith.constant 0 : index
    %40 = vector.load %arg10[%c8_25, %c0_26] : memref<432x512xf32, #tpu.memory_space<vmem>>, vector<8x512xf32>
    tpu.vector_store %arg10[%c8_25, %c0_26], %39 {strides = array<i32>} : memref<432x512xf32, #tpu.memory_space<vmem>>, vector<8x512xf32>,
    %c15_i32 = arith.constant 15 : i32
    %41 = tpu.dynamic_rotate %32 by %c15_i32 dim 1 : vector<8x512xf32>, i32 -> vector<8x512xf32>
    %c96_27 = arith.constant 96 : index
    %c0_28 = arith.constant 0 : index
    %42 = vector.load %arg11[%c96_27, %c0_28] : memref<384x512xf32, #tpu.memory_space<vmem>>, vector<8x512xf32>
    %43 = arith.mulf %41, %42 : vector<8x512xf32>
    %c16 = arith.constant 16 : index
    %c0_29 = arith.constant 0 : index
    %44 = vector.load %arg10[%c16, %c0_29] : memref<432x512xf32, #tpu.memory_space<vmem>>, vector<8x512xf32>
    tpu.vector_store %arg10[%c16, %c0_29], %43 {strides = array<i32>} : memref<432x512xf32, #tpu.memory_space<vmem>>, vector<8x512xf32>,
    %c1_i32 = arith.constant 1 : i32
    %45 = tpu.dynamic_rotate %32 by %c1_i32 dim 1 : vector<8x512xf32>, i32 -> vector<8x512xf32>
    %c144_30 = arith.constant 144 : index
    %c0_31 = arith.constant 0 : index
    %46 = vector.load %arg11[%c144_30, %c0_31] : memref<384x512xf32, #tpu.memory_space<vmem>>, vector<8x512xf32>
    %47 = arith.mulf %45, %46 : vector<8x512xf32>
    %c24 = arith.constant 24 : index
    %c0_32 = arith.constant 0 : index
    %48 = vector.load %arg10[%c24, %c0_32] : memref<432x512xf32, #tpu.memory_space<vmem>>, vector<8x512xf32>
    tpu.vector_store %arg10[%c24, %c0_32], %47 {strides = array<i32>} : memref<432x512xf32, #tpu.memory_space<vmem>>, vector<8x512xf32>,
    %c32 = arith.constant 32 : index
    %c0_33 = arith.constant 0 : index
    %49 = vector.load %arg10[%c32, %c0_33] : memref<432x512xf32, #tpu.memory_space<vmem>>, vector<8x512xf32>
    tpu.vector_store %arg10[%c32, %c0_33], %32 {strides = array<i32>} : memref<432x512xf32, #tpu.memory_space<vmem>>, vector<8x512xf32>,
    %c511_i32 = arith.constant 511 : i32
    %50 = tpu.dynamic_rotate %32 by %c511_i32 dim 1 : vector<8x512xf32>, i32 -> vector<8x512xf32>
    %c192_34 = arith.constant 192 : index
    %c0_35 = arith.constant 0 : index
    %51 = vector.load %arg11[%c192_34, %c0_35] : memref<384x512xf32, #tpu.memory_space<vmem>>, vector<8x512xf32>
    %52 = arith.mulf %50, %51 : vector<8x512xf32>
    %c40 = arith.constant 40 : index
    %c0_36 = arith.constant 0 : index
    %53 = vector.load %arg10[%c40, %c0_36] : memref<432x512xf32, #tpu.memory_space<vmem>>, vector<8x512xf32>
    tpu.vector_store %arg10[%c40, %c0_36], %52 {strides = array<i32>} : memref<432x512xf32, #tpu.memory_space<vmem>>, vector<8x512xf32>,
    %c497_i32 = arith.constant 497 : i32
    %54 = tpu.dynamic_rotate %32 by %c497_i32 dim 1 : vector<8x512xf32>, i32 -> vector<8x512xf32>
    %c240_37 = arith.constant 240 : index
    %c0_38 = arith.constant 0 : index
    %55 = vector.load %arg11[%c240_37, %c0_38] : memref<384x512xf32, #tpu.memory_space<vmem>>, vector<8x512xf32>
    %56 = arith.mulf %54, %55 : vector<8x512xf32>
    %c48_39 = arith.constant 48 : index
    %c0_40 = arith.constant 0 : index
    %57 = vector.load %arg10[%c48_39, %c0_40] : memref<432x512xf32, #tpu.memory_space<vmem>>, vector<8x512xf32>
    tpu.vector_store %arg10[%c48_39, %c0_40], %56 {strides = array<i32>} : memref<432x512xf32, #tpu.memory_space<vmem>>, vector<8x512xf32>,
    %c496_i32 = arith.constant 496 : i32
    %58 = tpu.dynamic_rotate %32 by %c496_i32 dim 1 : vector<8x512xf32>, i32 -> vector<8x512xf32>
    %c288_41 = arith.constant 288 : index
    %c0_42 = arith.constant 0 : index
    %59 = vector.load %arg11[%c288_41, %c0_42] : memref<384x512xf32, #tpu.memory_space<vmem>>, vector<8x512xf32>
    %60 = arith.mulf %58, %59 : vector<8x512xf32>
    %c56 = arith.constant 56 : index
    %c0_43 = arith.constant 0 : index
    %61 = vector.load %arg10[%c56, %c0_43] : memref<432x512xf32, #tpu.memory_space<vmem>>, vector<8x512xf32>
    tpu.vector_store %arg10[%c56, %c0_43], %60 {strides = array<i32>} : memref<432x512xf32, #tpu.memory_space<vmem>>, vector<8x512xf32>,
    %c495_i32 = arith.constant 495 : i32
    %62 = tpu.dynamic_rotate %32 by %c495_i32 dim 1 : vector<8x512xf32>, i32 -> vector<8x512xf32>
    %c336_44 = arith.constant 336 : index
    %c0_45 = arith.constant 0 : index
    %63 = vector.load %arg11[%c336_44, %c0_45] : memref<384x512xf32, #tpu.memory_space<vmem>>, vector<8x512xf32>
    %64 = arith.mulf %62, %63 : vector<8x512xf32>
    %c64 = arith.constant 64 : index
    %c0_46 = arith.constant 0 : index
    %65 = vector.load %arg10[%c64, %c0_46] : memref<432x512xf32, #tpu.memory_space<vmem>>, vector<8x512xf32>
    tpu.vector_store %arg10[%c64, %c0_46], %64 {strides = array<i32>} : memref<432x512xf32, #tpu.memory_space<vmem>>, vector<8x512xf32>,
    %c0_47 = arith.constant 0 : index
    %c0_48 = arith.constant 0 : index
    %66 = vector.load %arg4[%c0_47, %c0_48] : memref<72x72xf32, #tpu.memory_space<vmem>>, vector<72x72xf32>
    %c0_49 = arith.constant 0 : index
    %c0_50 = arith.constant 0 : index
    %67 = vector.load %arg10[%c0_49, %c0_50] : memref<432x512xf32, #tpu.memory_space<vmem>>, vector<72x512xf32>
    %cst = arith.constant dense<0.000000e+00> : vector<72x512xf32>
    %68 = tpu.matmul %66, %67, %cst {dimension_numbers = #tpu.dot_dimension_numbers<[1], [0], [0], [1], [0, 0, 1, 1], [], []>} : vector<72x72xf32>, vector<72x512xf32>, vector<72x512xf32> -> vector<72x512xf32>
    %c0_51 = arith.constant 0 : index
    %c0_52 = arith.constant 0 : index
    %69 = vector.load %arg3[%c0_51, %c0_52] : memref<72x512xf32, #tpu.memory_space<vmem>>, vector<72x512xf32>
    %70 = arith.addf %68, %69 : vector<72x512xf32>
    %cst_53 = arith.constant 0.000000e+00 : f32
    %71 = vector.broadcast %cst_53 : f32 to vector<72x512xf32>
    %72 = arith.maximumf %70, %71 : vector<72x512xf32>
    %73 = vector.extract_strided_slice %72 {offsets = [48, 0], sizes = [24, 512], strides = [1, 1]} : vector<72x512xf32> to vector<24x512xf32>
    %c48_54 = arith.constant 48 : index
    %c0_55 = arith.constant 0 : index
    %74 = vector.load %arg12[%c48_54, %c0_55] : memref<72x512xf32, #tpu.memory_space<vmem>>, vector<24x512xf32>
    tpu.vector_store %arg12[%c48_54, %c0_55], %73 {strides = array<i32>} : memref<72x512xf32, #tpu.memory_space<vmem>>, vector<24x512xf32>,
    %75 = vector.extract_strided_slice %72 {offsets = [0, 0], sizes = [48, 512], strides = [1, 1]} : vector<72x512xf32> to vector<48x512xf32>
    %c17_i32_56 = arith.constant 17 : i32
    %76 = tpu.dynamic_rotate %75 by %c17_i32_56 dim 1 : vector<48x512xf32>, i32 -> vector<48x512xf32>
    %c0_57 = arith.constant 0 : index
    %c0_58 = arith.constant 0 : index
    %77 = vector.load %arg11[%c0_57, %c0_58] : memref<384x512xf32, #tpu.memory_space<vmem>>, vector<48x512xf32>
    %78 = arith.mulf %76, %77 : vector<48x512xf32>
    %c0_59 = arith.constant 0 : index
    %c0_60 = arith.constant 0 : index
    %79 = vector.load %arg10[%c0_59, %c0_60] : memref<432x512xf32, #tpu.memory_space<vmem>>, vector<48x512xf32>
    tpu.vector_store %arg10[%c0_59, %c0_60], %78 {strides = array<i32>} : memref<432x512xf32, #tpu.memory_space<vmem>>, vector<48x512xf32>,
    %c16_i32_61 = arith.constant 16 : i32
    %80 = tpu.dynamic_rotate %75 by %c16_i32_61 dim 1 : vector<48x512xf32>, i32 -> vector<48x512xf32>
    %c48_62 = arith.constant 48 : index
    %c0_63 = arith.constant 0 : index
    %81 = vector.load %arg11[%c48_62, %c0_63] : memref<384x512xf32, #tpu.memory_space<vmem>>, vector<48x512xf32>
    %82 = arith.mulf %80, %81 : vector<48x512xf32>
    %c48_64 = arith.constant 48 : index
    %c0_65 = arith.constant 0 : index
    %83 = vector.load %arg10[%c48_64, %c0_65] : memref<432x512xf32, #tpu.memory_space<vmem>>, vector<48x512xf32>
    tpu.vector_store %arg10[%c48_64, %c0_65], %82 {strides = array<i32>} : memref<432x512xf32, #tpu.memory_space<vmem>>, vector<48x512xf32>,
    %c15_i32_66 = arith.constant 15 : i32
    %84 = tpu.dynamic_rotate %75 by %c15_i32_66 dim 1 : vector<48x512xf32>, i32 -> vector<48x512xf32>
    %c96_67 = arith.constant 96 : index
    %c0_68 = arith.constant 0 : index
    %85 = vector.load %arg11[%c96_67, %c0_68] : memref<384x512xf32, #tpu.memory_space<vmem>>, vector<48x512xf32>
    %86 = arith.mulf %84, %85 : vector<48x512xf32>
    %c96_69 = arith.constant 96 : index
    %c0_70 = arith.constant 0 : index
    %87 = vector.load %arg10[%c96_69, %c0_70] : memref<432x512xf32, #tpu.memory_space<vmem>>, vector<48x512xf32>
    tpu.vector_store %arg10[%c96_69, %c0_70], %86 {strides = array<i32>} : memref<432x512xf32, #tpu.memory_space<vmem>>, vector<48x512xf32>,
    %c1_i32_71 = arith.constant 1 : i32
    %88 = tpu.dynamic_rotate %75 by %c1_i32_71 dim 1 : vector<48x512xf32>, i32 -> vector<48x512xf32>
    %c144_72 = arith.constant 144 : index
    %c0_73 = arith.constant 0 : index
    %89 = vector.load %arg11[%c144_72, %c0_73] : memref<384x512xf32, #tpu.memory_space<vmem>>, vector<48x512xf32>
    %90 = arith.mulf %88, %89 : vector<48x512xf32>
    %c144_74 = arith.constant 144 : index
    %c0_75 = arith.constant 0 : index
    %91 = vector.load %arg10[%c144_74, %c0_75] : memref<432x512xf32, #tpu.memory_space<vmem>>, vector<48x512xf32>
    tpu.vector_store %arg10[%c144_74, %c0_75], %90 {strides = array<i32>} : memref<432x512xf32, #tpu.memory_space<vmem>>, vector<48x512xf32>,
    %c192_76 = arith.constant 192 : index
    %c0_77 = arith.constant 0 : index
    %92 = vector.load %arg10[%c192_76, %c0_77] : memref<432x512xf32, #tpu.memory_space<vmem>>, vector<48x512xf32>
    tpu.vector_store %arg10[%c192_76, %c0_77], %75 {strides = array<i32>} : memref<432x512xf32, #tpu.memory_space<vmem>>, vector<48x512xf32>,
    %c511_i32_78 = arith.constant 511 : i32
    %93 = tpu.dynamic_rotate %75 by %c511_i32_78 dim 1 : vector<48x512xf32>, i32 -> vector<48x512xf32>
    %c192_79 = arith.constant 192 : index
    %c0_80 = arith.constant 0 : index
    %94 = vector.load %arg11[%c192_79, %c0_80] : memref<384x512xf32, #tpu.memory_space<vmem>>, vector<48x512xf32>
    %95 = arith.mulf %93, %94 : vector<48x512xf32>
    %c240_81 = arith.constant 240 : index
    %c0_82 = arith.constant 0 : index
    %96 = vector.load %arg10[%c240_81, %c0_82] : memref<432x512xf32, #tpu.memory_space<vmem>>, vector<48x512xf32>
    tpu.vector_store %arg10[%c240_81, %c0_82], %95 {strides = array<i32>} : memref<432x512xf32, #tpu.memory_space<vmem>>, vector<48x512xf32>,
    %c497_i32_83 = arith.constant 497 : i32
    %97 = tpu.dynamic_rotate %75 by %c497_i32_83 dim 1 : vector<48x512xf32>, i32 -> vector<48x512xf32>
    %c240_84 = arith.constant 240 : index
    %c0_85 = arith.constant 0 : index
    %98 = vector.load %arg11[%c240_84, %c0_85] : memref<384x512xf32, #tpu.memory_space<vmem>>, vector<48x512xf32>
    %99 = arith.mulf %97, %98 : vector<48x512xf32>
    %c288_86 = arith.constant 288 : index
    %c0_87 = arith.constant 0 : index
    %100 = vector.load %arg10[%c288_86, %c0_87] : memref<432x512xf32, #tpu.memory_space<vmem>>, vector<48x512xf32>
    tpu.vector_store %arg10[%c288_86, %c0_87], %99 {strides = array<i32>} : memref<432x512xf32, #tpu.memory_space<vmem>>, vector<48x512xf32>,
    %c496_i32_88 = arith.constant 496 : i32
    %101 = tpu.dynamic_rotate %75 by %c496_i32_88 dim 1 : vector<48x512xf32>, i32 -> vector<48x512xf32>
    %c288_89 = arith.constant 288 : index
    %c0_90 = arith.constant 0 : index
    %102 = vector.load %arg11[%c288_89, %c0_90] : memref<384x512xf32, #tpu.memory_space<vmem>>, vector<48x512xf32>
    %103 = arith.mulf %101, %102 : vector<48x512xf32>
    %c336_91 = arith.constant 336 : index
    %c0_92 = arith.constant 0 : index
    %104 = vector.load %arg10[%c336_91, %c0_92] : memref<432x512xf32, #tpu.memory_space<vmem>>, vector<48x512xf32>
    tpu.vector_store %arg10[%c336_91, %c0_92], %103 {strides = array<i32>} : memref<432x512xf32, #tpu.memory_space<vmem>>, vector<48x512xf32>,
    %c495_i32_93 = arith.constant 495 : i32
    %105 = tpu.dynamic_rotate %75 by %c495_i32_93 dim 1 : vector<48x512xf32>, i32 -> vector<48x512xf32>
    %c336_94 = arith.constant 336 : index
    %c0_95 = arith.constant 0 : index
    %106 = vector.load %arg11[%c336_94, %c0_95] : memref<384x512xf32, #tpu.memory_space<vmem>>, vector<48x512xf32>
    %107 = arith.mulf %105, %106 : vector<48x512xf32>
    %c384 = arith.constant 384 : index
    %c0_96 = arith.constant 0 : index
    %108 = vector.load %arg10[%c384, %c0_96] : memref<432x512xf32, #tpu.memory_space<vmem>>, vector<48x512xf32>
    tpu.vector_store %arg10[%c384, %c0_96], %107 {strides = array<i32>} : memref<432x512xf32, #tpu.memory_space<vmem>>, vector<48x512xf32>,
    %c0_97 = arith.constant 0 : index
    %c0_98 = arith.constant 0 : index
    %109 = vector.load %arg5[%c0_97, %c0_98] : memref<48x432xf32, #tpu.memory_space<vmem>>, vector<48x432xf32>
    %c0_99 = arith.constant 0 : index
    %c0_100 = arith.constant 0 : index
    %110 = vector.load %arg10[%c0_99, %c0_100] : memref<432x512xf32, #tpu.memory_space<vmem>>, vector<432x512xf32>
    %cst_101 = arith.constant dense<0.000000e+00> : vector<48x512xf32>
    %111 = tpu.matmul %109, %110, %cst_101 {dimension_numbers = #tpu.dot_dimension_numbers<[1], [0], [0], [1], [0, 0, 1, 1], [], []>} : vector<48x432xf32>, vector<432x512xf32>, vector<48x512xf32> -> vector<48x512xf32>
    %c0_102 = arith.constant 0 : index
    %c0_103 = arith.constant 0 : index
    %112 = vector.load %arg8[%c0_102, %c0_103] : memref<80x1xf32, #tpu.memory_space<vmem>>, vector<48x1xf32>
    %113 = vector.broadcast %112 : vector<48x1xf32> to vector<48x512xf32>
    %114 = arith.addf %111, %113 : vector<48x512xf32>
    %cst_104 = arith.constant 0.000000e+00 : f32
    %115 = vector.broadcast %cst_104 : f32 to vector<48x512xf32>
    %116 = arith.maximumf %114, %115 : vector<48x512xf32>
    %117 = vector.extract_strided_slice %116 {offsets = [0, 0], sizes = [24, 512], strides = [1, 1]} : vector<48x512xf32> to vector<24x512xf32>
    %c24_105 = arith.constant 24 : index
    %c0_106 = arith.constant 0 : index
    %118 = vector.load %arg12[%c24_105, %c0_106] : memref<72x512xf32, #tpu.memory_space<vmem>>, vector<24x512xf32>
    tpu.vector_store %arg12[%c24_105, %c0_106], %117 {strides = array<i32>} : memref<72x512xf32, #tpu.memory_space<vmem>>, vector<24x512xf32>,
    %119 = vector.extract_strided_slice %116 {offsets = [24, 0], sizes = [24, 512], strides = [1, 1]} : vector<48x512xf32> to vector<24x512xf32>
    %c17_i32_107 = arith.constant 17 : i32
    %120 = tpu.dynamic_rotate %119 by %c17_i32_107 dim 1 : vector<24x512xf32>, i32 -> vector<24x512xf32>
    %c0_108 = arith.constant 0 : index
    %c0_109 = arith.constant 0 : index
    %121 = vector.load %arg11[%c0_108, %c0_109] : memref<384x512xf32, #tpu.memory_space<vmem>>, vector<24x512xf32>
    %122 = arith.mulf %120, %121 : vector<24x512xf32>
    %c0_110 = arith.constant 0 : index
    %c0_111 = arith.constant 0 : index
    %123 = vector.load %arg10[%c0_110, %c0_111] : memref<432x512xf32, #tpu.memory_space<vmem>>, vector<24x512xf32>
    tpu.vector_store %arg10[%c0_110, %c0_111], %122 {strides = array<i32>} : memref<432x512xf32, #tpu.memory_space<vmem>>, vector<24x512xf32>,
    %c16_i32_112 = arith.constant 16 : i32
    %124 = tpu.dynamic_rotate %119 by %c16_i32_112 dim 1 : vector<24x512xf32>, i32 -> vector<24x512xf32>
    %c48_113 = arith.constant 48 : index
    %c0_114 = arith.constant 0 : index
    %125 = vector.load %arg11[%c48_113, %c0_114] : memref<384x512xf32, #tpu.memory_space<vmem>>, vector<24x512xf32>
    %126 = arith.mulf %124, %125 : vector<24x512xf32>
    %c24_115 = arith.constant 24 : index
    %c0_116 = arith.constant 0 : index
    %127 = vector.load %arg10[%c24_115, %c0_116] : memref<432x512xf32, #tpu.memory_space<vmem>>, vector<24x512xf32>
    tpu.vector_store %arg10[%c24_115, %c0_116], %126 {strides = array<i32>} : memref<432x512xf32, #tpu.memory_space<vmem>>, vector<24x512xf32>,
    %c15_i32_117 = arith.constant 15 : i32
    %128 = tpu.dynamic_rotate %119 by %c15_i32_117 dim 1 : vector<24x512xf32>, i32 -> vector<24x512xf32>
    %c96_118 = arith.constant 96 : index
    %c0_119 = arith.constant 0 : index
    %129 = vector.load %arg11[%c96_118, %c0_119] : memref<384x512xf32, #tpu.memory_space<vmem>>, vector<24x512xf32>
    %130 = arith.mulf %128, %129 : vector<24x512xf32>
    %c48_120 = arith.constant 48 : index
    %c0_121 = arith.constant 0 : index
    %131 = vector.load %arg10[%c48_120, %c0_121] : memref<432x512xf32, #tpu.memory_space<vmem>>, vector<24x512xf32>
    tpu.vector_store %arg10[%c48_120, %c0_121], %130 {strides = array<i32>} : memref<432x512xf32, #tpu.memory_space<vmem>>, vector<24x512xf32>,
    %c1_i32_122 = arith.constant 1 : i32
    %132 = tpu.dynamic_rotate %119 by %c1_i32_122 dim 1 : vector<24x512xf32>, i32 -> vector<24x512xf32>
    %c144_123 = arith.constant 144 : index
    %c0_124 = arith.constant 0 : index
    %133 = vector.load %arg11[%c144_123, %c0_124] : memref<384x512xf32, #tpu.memory_space<vmem>>, vector<24x512xf32>
    %134 = arith.mulf %132, %133 : vector<24x512xf32>
    %c72 = arith.constant 72 : index
    %c0_125 = arith.constant 0 : index
    %135 = vector.load %arg10[%c72, %c0_125] : memref<432x512xf32, #tpu.memory_space<vmem>>, vector<24x512xf32>
    tpu.vector_store %arg10[%c72, %c0_125], %134 {strides = array<i32>} : memref<432x512xf32, #tpu.memory_space<vmem>>, vector<24x512xf32>,
    %c96_126 = arith.constant 96 : index
    %c0_127 = arith.constant 0 : index
    %136 = vector.load %arg10[%c96_126, %c0_127] : memref<432x512xf32, #tpu.memory_space<vmem>>, vector<24x512xf32>
    tpu.vector_store %arg10[%c96_126, %c0_127], %119 {strides = array<i32>} : memref<432x512xf32, #tpu.memory_space<vmem>>, vector<24x512xf32>,
    %c511_i32_128 = arith.constant 511 : i32
    %137 = tpu.dynamic_rotate %119 by %c511_i32_128 dim 1 : vector<24x512xf32>, i32 -> vector<24x512xf32>
    %c192_129 = arith.constant 192 : index
    %c0_130 = arith.constant 0 : index
    %138 = vector.load %arg11[%c192_129, %c0_130] : memref<384x512xf32, #tpu.memory_space<vmem>>, vector<24x512xf32>
    %139 = arith.mulf %137, %138 : vector<24x512xf32>
    %c120 = arith.constant 120 : index
    %c0_131 = arith.constant 0 : index
    %140 = vector.load %arg10[%c120, %c0_131] : memref<432x512xf32, #tpu.memory_space<vmem>>, vector<24x512xf32>
    tpu.vector_store %arg10[%c120, %c0_131], %139 {strides = array<i32>} : memref<432x512xf32, #tpu.memory_space<vmem>>, vector<24x512xf32>,
    %c497_i32_132 = arith.constant 497 : i32
    %141 = tpu.dynamic_rotate %119 by %c497_i32_132 dim 1 : vector<24x512xf32>, i32 -> vector<24x512xf32>
    %c240_133 = arith.constant 240 : index
    %c0_134 = arith.constant 0 : index
    %142 = vector.load %arg11[%c240_133, %c0_134] : memref<384x512xf32, #tpu.memory_space<vmem>>, vector<24x512xf32>
    %143 = arith.mulf %141, %142 : vector<24x512xf32>
    %c144_135 = arith.constant 144 : index
    %c0_136 = arith.constant 0 : index
    %144 = vector.load %arg10[%c144_135, %c0_136] : memref<432x512xf32, #tpu.memory_space<vmem>>, vector<24x512xf32>
    tpu.vector_store %arg10[%c144_135, %c0_136], %143 {strides = array<i32>} : memref<432x512xf32, #tpu.memory_space<vmem>>, vector<24x512xf32>,
    %c496_i32_137 = arith.constant 496 : i32
    %145 = tpu.dynamic_rotate %119 by %c496_i32_137 dim 1 : vector<24x512xf32>, i32 -> vector<24x512xf32>
    %c288_138 = arith.constant 288 : index
    %c0_139 = arith.constant 0 : index
    %146 = vector.load %arg11[%c288_138, %c0_139] : memref<384x512xf32, #tpu.memory_space<vmem>>, vector<24x512xf32>
    %147 = arith.mulf %145, %146 : vector<24x512xf32>
    %c168 = arith.constant 168 : index
    %c0_140 = arith.constant 0 : index
    %148 = vector.load %arg10[%c168, %c0_140] : memref<432x512xf32, #tpu.memory_space<vmem>>, vector<24x512xf32>
    tpu.vector_store %arg10[%c168, %c0_140], %147 {strides = array<i32>} : memref<432x512xf32, #tpu.memory_space<vmem>>, vector<24x512xf32>,
    %c495_i32_141 = arith.constant 495 : i32
    %149 = tpu.dynamic_rotate %119 by %c495_i32_141 dim 1 : vector<24x512xf32>, i32 -> vector<24x512xf32>
    %c336_142 = arith.constant 336 : index
    %c0_143 = arith.constant 0 : index
    %150 = vector.load %arg11[%c336_142, %c0_143] : memref<384x512xf32, #tpu.memory_space<vmem>>, vector<24x512xf32>
    %151 = arith.mulf %149, %150 : vector<24x512xf32>
    %c192_144 = arith.constant 192 : index
    %c0_145 = arith.constant 0 : index
    %152 = vector.load %arg10[%c192_144, %c0_145] : memref<432x512xf32, #tpu.memory_space<vmem>>, vector<24x512xf32>
    tpu.vector_store %arg10[%c192_144, %c0_145], %151 {strides = array<i32>} : memref<432x512xf32, #tpu.memory_space<vmem>>, vector<24x512xf32>,
    %c0_146 = arith.constant 0 : index
    %c0_147 = arith.constant 0 : index
    %153 = vector.load %arg6[%c0_146, %c0_147] : memref<24x216xf32, #tpu.memory_space<vmem>>, vector<24x216xf32>
    %c0_148 = arith.constant 0 : index
    %c0_149 = arith.constant 0 : index
    %154 = vector.load %arg10[%c0_148, %c0_149] : memref<432x512xf32, #tpu.memory_space<vmem>>, vector<216x512xf32>
    %cst_150 = arith.constant dense<0.000000e+00> : vector<24x512xf32>
    %155 = tpu.matmul %153, %154, %cst_150 {dimension_numbers = #tpu.dot_dimension_numbers<[1], [0], [0], [1], [0, 0, 1, 1], [], []>} : vector<24x216xf32>, vector<216x512xf32>, vector<24x512xf32> -> vector<24x512xf32>
    %c48_151 = arith.constant 48 : index
    %c0_152 = arith.constant 0 : index
    %156 = vector.load %arg8[%c48_151, %c0_152] : memref<80x1xf32, #tpu.memory_space<vmem>>, vector<24x1xf32>
    %157 = vector.broadcast %156 : vector<24x1xf32> to vector<24x512xf32>
    %158 = arith.addf %155, %157 : vector<24x512xf32>
    %cst_153 = arith.constant 0.000000e+00 : f32
    %159 = vector.broadcast %cst_153 : f32 to vector<24x512xf32>
    %160 = arith.maximumf %158, %159 : vector<24x512xf32>
    %c0_154 = arith.constant 0 : index
    %c0_155 = arith.constant 0 : index
    %161 = vector.load %arg12[%c0_154, %c0_155] : memref<72x512xf32, #tpu.memory_space<vmem>>, vector<24x512xf32>
    tpu.vector_store %arg12[%c0_154, %c0_155], %160 {strides = array<i32>} : memref<72x512xf32, #tpu.memory_space<vmem>>, vector<24x512xf32>,
    %c0_156 = arith.constant 0 : index
    %c0_157 = arith.constant 0 : index
    %162 = vector.load %arg7[%c0_156, %c0_157] : memref<8x72xf32, #tpu.memory_space<vmem>>, vector<8x72xf32>
    %c0_158 = arith.constant 0 : index
    %c0_159 = arith.constant 0 : index
    %163 = vector.load %arg12[%c0_158, %c0_159] : memref<72x512xf32, #tpu.memory_space<vmem>>, vector<72x512xf32>
    %cst_160 = arith.constant dense<0.000000e+00> : vector<8x512xf32>
    %164 = tpu.matmul %162, %163, %cst_160 {dimension_numbers = #tpu.dot_dimension_numbers<[1], [0], [0], [1], [0, 0, 1, 1], [], []>} : vector<8x72xf32>, vector<72x512xf32>, vector<8x512xf32> -> vector<8x512xf32>
    %c72_161 = arith.constant 72 : index
    %c0_162 = arith.constant 0 : index
    %165 = vector.load %arg8[%c72_161, %c0_162] : memref<80x1xf32, #tpu.memory_space<vmem>>, vector<8x1xf32>
    %166 = vector.broadcast %165 : vector<8x1xf32> to vector<8x512xf32>
    %167 = arith.addf %164, %166 : vector<8x512xf32>
    %c0_163 = arith.constant 0 : index
    %c0_164 = arith.constant 0 : index
    %168 = vector.load %arg9[%c0_163, %c0_164] : memref<8x512xf32, #tpu.memory_space<vmem>>, vector<8x512xf32>
    tpu.vector_store %arg9[%c0_163, %c0_164], %167 {strides = array<i32>} : memref<8x512xf32, #tpu.memory_space<vmem>>, vector<8x512xf32>,
    return
  }
  func.func @transform_0(%arg0: i32) -> (i32, i32) {
    %c0_i32 = arith.constant 0 : i32
    %c0_i32_0 = arith.constant 0 : i32
    return %c0_i32, %arg0 : i32, i32
  }
  func.func @transform_1(%arg0: i32) -> (i32, i32) {
    %c0_i32 = arith.constant 0 : i32
    %c0_i32_0 = arith.constant 0 : i32
    %c0_i32_1 = arith.constant 0 : i32
    return %c0_i32, %c0_i32_0 : i32, i32
  }
  func.func @transform_2(%arg0: i32) -> (i32, i32) {
    %c0_i32 = arith.constant 0 : i32
    %c0_i32_0 = arith.constant 0 : i32
    %c0_i32_1 = arith.constant 0 : i32
    return %c0_i32, %c0_i32_0 : i32, i32
  }
  func.func @transform_3(%arg0: i32) -> (i32, i32) {
    %c0_i32 = arith.constant 0 : i32
    %c0_i32_0 = arith.constant 0 : i32
    %c0_i32_1 = arith.constant 0 : i32
    return %c0_i32, %c0_i32_0 : i32, i32
  }
  func.func @transform_4(%arg0: i32) -> (i32, i32) {
    %c0_i32 = arith.constant 0 : i32
    %c0_i32_0 = arith.constant 0 : i32
    %c0_i32_1 = arith.constant 0 : i32
    return %c0_i32, %c0_i32_0 : i32, i32
  }
  func.func @transform_5(%arg0: i32) -> (i32, i32) {
    %c0_i32 = arith.constant 0 : i32
    %c0_i32_0 = arith.constant 0 : i32
    %c0_i32_1 = arith.constant 0 : i32
    return %c0_i32, %c0_i32_0 : i32, i32
  }
  func.func @transform_6(%arg0: i32) -> (i32, i32) {
    %c0_i32 = arith.constant 0 : i32
    %c0_i32_0 = arith.constant 0 : i32
    %c0_i32_1 = arith.constant 0 : i32
    return %c0_i32, %c0_i32_0 : i32, i32
  }
  func.func @transform_7(%arg0: i32) -> (i32, i32) {
    %c0_i32 = arith.constant 0 : i32
    %c0_i32_0 = arith.constant 0 : i32
    %c0_i32_1 = arith.constant 0 : i32
    return %c0_i32, %c0_i32_0 : i32, i32
  }
  func.func @transform_8(%arg0: i32) -> (i32, i32) {
    %c0_i32 = arith.constant 0 : i32
    %c0_i32_0 = arith.constant 0 : i32
    return %c0_i32, %arg0 : i32, i32
  }
}

</mosaic_0001>

<bundles_post_ra>
// kernel: multi_block_forward.1
= control target key start
LH: loop header
LB: loop body
LE: loop exit
PB: predicated region body
PF: predicated region fallthrough
CT: control target
= control target key end

     0   :  { %s4133_s9 = smov 17   ;;  %s4134_s10 = smov 16   ;;  %v320_v14 = vlaneseq  ;;  %vm599_vm8 = vcmask 588800   ;;  %vm2303_vm9 = vcmask 392192   ;;  %vm3638_vm10 = vcmask 719872   ;;  %s8006_s0 = inlined_call_operand.vmem [shape: f32[8,512], index: 0, kind: input, shape index: {}]   ;;  %s8007_s1 = inlined_call_operand.vmem [shape: f32[9,512], index: 1, kind: input, shape index: {}]   ;;  %s8008_s3 = inlined_call_operand.vmem [shape: f32[72,72], index: 3, kind: input, shape index: {}]   ;;  %s8009_s2 = inlined_call_operand.vmem [shape: f32[72,512], index: 2, kind: input, shape index: {}]   ;;  %s8010_s4 = inlined_call_operand.vmem [shape: f32[48,432], index: 4, kind: input, shape index: {}]   ;;  %s8011_s7 = inlined_call_operand.vmem [shape: f32[80,1], index: 7, kind: input, shape index: {}]   ;;  %s8012_s5 = inlined_call_operand.vmem [shape: f32[24,216], index: 5, kind: input, shape index: {}]   ;;  %s8013_s6 = inlined_call_operand.vmem [shape: f32[8,72], index: 6, kind: input, shape index: {}]   ;;  %s8014_s8 = inlined_call_operand.vmem [shape: f32[8,512], index: 8, kind: output, shape index: {}]  }
   0x1   :  { %v4190_v0 = vld [vmem:[%s8006_s0 + $0x10] sm:$0xff]  ;;  %v4195_v1 = vld [vmem:[%s8006_s0] sm:$0xff]  ;;  %v4206_v2 = vld [vmem:[%s8006_s0 + $0x18] sm:$0xff]  ;;  %s4135_s15 = smov 15   ;;  %s4137_s16 = smov 112  }
   0x2   :  { %316 = vrot.lane.b32.xlu1 %v4190_v0, %s4133_s9  ;;  %339 = vrot.lane.b32.xlu2 %v4195_v1, %s4134_s10  ;;  %v4211_v3 = vld [vmem:[%s8006_s0 + $0x8] sm:$0xff]  ;;  %s4136_s0 = smov 111   ;;  %s4138_s17 = smov 113   ;;  %v4294_v17 = vand.u32 127, %v320_v14 }
   0x3   :  { %312 = vrot.lane.b32.xlu0 %v4195_v1, %s4133_s9  ;;  %s4139_s18 = smov 127   ;;  %s4140_s19 = smov 1   ;;  %v4020_v16 = vld [vmem:[%s8007_s1 + $0x20] ss:$8 sm:$0xf] }
   0x4   :  { %vm501_vm0 = vcmp.lt.s32.totalorder %v4294_v17, 111  ;;  %v4297_v18 = vperm.slane %v4020_v16, 1  ;;  %v4301_v20 = vperm.slane %v4020_v16, 0  ;;  %v4019_v27 = vld [vmem:[%s8007_s1 + $0x7] ss:$8 sm:$0xf] }
   0x5   :  { %vm476_vm1 = vcmp.lt.s32.totalorder %v4294_v17, 112  ;;  %v4313_v28 = vperm.slane %v4019_v27, 1  ;;  %v4315_v29 = vperm.slane %v4019_v27, 0  ;;  %v4018_v37 = vld [vmem:[%s8007_s1 + $0x6] ss:$8 sm:$0xf] }
   0x6   :  { %8255 = vst [vmem:[#allocation5_spill] sm:$0xff] %v4297_v18  ;;  %v4327_v38 = vperm.slane %v4018_v37, 1  ;;  %v4329_v39 = vperm.slane %v4018_v37, 0  ;;  %vm451_vm2 = vcmp.lt.s32.totalorder %v4294_v17, 113  ;;  %vm426_vm3 = vcmp.lt.s32.totalorder %v4294_v17, 127 }
   0x7   :  { %8256 = vst [vmem:[#allocation6_spill] sm:$0xff] %v4301_v20  ;;  %v4342_v47 = vld [vmem:[%s8007_s1 + $0x5] ss:$8 sm:$0xf]  ;;  %v4348_v49 = vperm.slane %v4020_v16, 2  ;;  %v4350_v50 = vperm.slane %v4020_v16, 3 }
   0x8   :  { %8257 = vst [vmem:[#allocation7_spill] sm:$0xff] %v4313_v28  ;;  %v4345_v48 = vperm.slane %v4342_v47, 0  ;;  %v4366_v60 = vperm.slane %v4019_v27, 2  ;;  %v4368_v61 = vperm.slane %v4019_v27, 3  ;;  %v4372_v62 = vperm.slane %v4342_v47, 1 }
   0x9   :  { %8258 = vst [vmem:[#allocation8_spill] sm:$0xff] %v4315_v29  ;;  %v4376_v14 = vperm.slane %v4018_v37, 3  ;;  %vm397_vm4 = vcmp.lt.s32.totalorder %v4294_v17, 1  ;;  %vm372_vm5 = vcmp.lt.s32.totalorder %v4294_v17, 15  ;;  %vm347_vm6 = vcmp.lt.s32.totalorder %v4294_v17, 16 }
   0xa   :  { %318 = vrot.lane.b32.xlu1 %v4206_v2, %s4133_s9  ;;  %341 = vrot.lane.b32.xlu2 %v4211_v3, %s4134_s10  ;;  %8259 = vst [vmem:[#allocation9_spill] sm:$0xff] %v4327_v38  ;;  %vm322_vm7 = vcmp.lt.s32.totalorder %v4294_v17, 17 }
   0xb   :  { %314 = vrot.lane.b32.xlu0 %v4211_v3, %s4133_s9  ;;  %8260 = vst [vmem:[#allocation10_spill] sm:$0xff] %v4329_v39 }
   0xc   :  { %8261 = vst [vmem:[#allocation11_spill] sm:$0xff] %v4345_v48 }
   0xd   :  { %8262 = vst [vmem:[#allocation12_spill] sm:$0xff] %v4348_v49 }
   0xe   :  { %8263 = vst [vmem:[#allocation13_spill] sm:$0xff] %v4350_v50 }
   0xf   :  { %8264 = vst [vmem:[#allocation14_spill] sm:$0xff] %v4366_v60 }
  0x10   :  { %8265 = vst [vmem:[#allocation15_spill] sm:$0xff] %v4368_v61 }
  0x11   :  { %8266 = vst [vmem:[#allocation16_spill] sm:$0xff] %v4372_v62 }
  0x12   :  { %345 = vrot.lane.b32.xlu1 %v4206_v2, %s4134_s10  ;;  %364 = vrot.lane.b32.xlu2 %v4195_v1, %s4135_s15  ;;  %8268 = vst [vmem:[#allocation18_spill] sm:$0xff] %v4376_v14 }
  0x13   :  { %343 = vrot.lane.b32.xlu0 %v4190_v0, %s4134_s10 }
  0x1a   :  { %495 = vrot.lane.b32.xlu1 %v4211_v3, %s4136_s0  ;;  %497 = vrot.lane.b32.xlu2 %v4190_v0, %s4136_s0 }
  0x1b   :  { %493 = vrot.lane.b32.xlu0 %v4195_v1, %s4136_s0 }
  0x22   :  { %470 = vrot.lane.b32.xlu1 %v4211_v3, %s4137_s16  ;;  %472 = vrot.lane.b32.xlu2 %v4190_v0, %s4137_s16 }
  0x23   :  { %468 = vrot.lane.b32.xlu0 %v4195_v1, %s4137_s16 }
  0x2a   :  { %445 = vrot.lane.b32.xlu1 %v4211_v3, %s4138_s17  ;;  %447 = vrot.lane.b32.xlu2 %v4190_v0, %s4138_s17 }
  0x2b   :  { %443 = vrot.lane.b32.xlu0 %v4195_v1, %s4138_s17 }
  0x32   :  { %418 = vrot.lane.b32.xlu1 %v4195_v1, %s4139_s18  ;;  %420 = vrot.lane.b32.xlu2 %v4211_v3, %s4139_s18 }
  0x33   :  { %499 = vrot.lane.b32.xlu0 %v4206_v2, %s4136_s0 }
  0x3a   :  { %474 = vrot.lane.b32.xlu1 %v4206_v2, %s4137_s16  ;;  %449 = vrot.lane.b32.xlu2 %v4206_v2, %s4138_s17 }
  0x3b   :  { %422 = vrot.lane.b32.xlu0 %v4190_v0, %s4139_s18 }
  0x42   :  { %391 = vrot.lane.b32.xlu1 %v4211_v3, %s4140_s19  ;;  %395 = vrot.lane.b32.xlu2 %v4206_v2, %s4140_s19 }
  0x43   :  { %389 = vrot.lane.b32.xlu0 %v4195_v1, %s4140_s19 }
  0x4a   :  { %366 = vrot.lane.b32.xlu1 %v4211_v3, %s4135_s15  ;;  %370 = vrot.lane.b32.xlu2 %v4206_v2, %s4135_s15 }
  0x4b   :  { %424 = vrot.lane.b32.xlu0 %v4206_v2, %s4139_s18 }
  0x52   :  { %368 = vrot.lane.b32.xlu1 %v4190_v0, %s4135_s15 }
  0x53   :  { %393 = vrot.lane.b32.xlu0 %v4190_v0, %s4140_s19 }
  0x5c   :  { %v4271_v4 = vpop.permute.xlu2 %339 }
  0x64   :  { %v4273_v5 = vpop.permute.xlu2 %341 }
  0x6c   :  { %v4275_v6 = vpop.permute.xlu2 %364 }
  0x74   :  { %v4277_v7 = vpop.permute.xlu1 %316  ;;  %v498_v9 = vpop.permute.xlu2 %497 }
  0x75   :  { %v4279_v8 = vpop.permute.xlu0 %312 }
  0x7c   :  { %v4281_v10 = vpop.permute.xlu1 %318  ;;  %v4285_v12 = vpop.permute.xlu2 %472 }
  0x7d   :  { %v4283_v11 = vpop.permute.xlu0 %314 }
  0x84   :  { %v4287_v13 = vpop.permute.xlu1 %345  ;;  %v4299_v19 = vpop.permute.xlu2 %447 }
  0x85   :  { %v4289_v15 = vpop.permute.xlu0 %343 }
  0x8c   :  { %v496_v21 = vpop.permute.xlu1 %495  ;;  %v421_v31 = vpop.permute.xlu2 %420 }
  0x8d   :  { %v494_v22 = vpop.permute.xlu0 %493  ;;  %v503_v23 = vsel %vm501_vm0, %v496_v21, %v498_v9 }
  0x8e   :  { %v504_v24 = vsel %vm501_vm0, %v494_v22, %v496_v21  ;;  %v511_v25 = vmul.f32 %v503_v23, %v4297_v18 }
  0x8f   :  { %v510_v26 = vmul.f32 %v504_v24, %v4301_v20 }
  0x90   :  { %678 = vmatpush.msra.mxu1 %v511_v25 }
  0x91   :  { %634 = vmatpush.msra.mxu0 %v510_v26 }
  0x94   :  { %v471_v30 = vpop.permute.xlu1 %470  ;;  %v450_v45 = vpop.permute.xlu2 %449 }
  0x95   :  { %v469_v32 = vpop.permute.xlu0 %468  ;;  %v478_v33 = vsel %vm476_vm1, %v471_v30, %v4285_v12 }
  0x96   :  { %v479_v34 = vsel %vm476_vm1, %v469_v32, %v471_v30  ;;  %v486_v35 = vmul.f32 %v478_v33, %v4313_v28 }
  0x97   :  { %v485_v36 = vmul.f32 %v479_v34, %v4315_v29 }
  0x98   :  { %679 = vmatpush.msra.mxu1 %v486_v35 }
  0x99   :  { %635 = vmatpush.msra.mxu0 %v485_v36 }
  0x9c   :  { %v446_v40 = vpop.permute.xlu1 %445  ;;  %v4364_v59 = vpop.permute.xlu2 %395 }
  0x9d   :  { %v444_v41 = vpop.permute.xlu0 %443  ;;  %v453_v42 = vsel %vm451_vm2, %v446_v40, %v4299_v19 }
  0x9e   :  { %v454_v43 = vsel %vm451_vm2, %v444_v41, %v446_v40  ;;  %v461_v44 = vmul.f32 %v453_v42, %v4327_v38  ;;  %v455_v23 = vsel %vm451_vm2, %v450_v45, %v444_v41  ;;  %v4418_v40 = vld [vmem:[%s8007_s1 + $0x1] ss:$8 sm:$0xf] }
  0x9f   :  { %v460_v46 = vmul.f32 %v454_v43, %v4329_v39  ;;  %v463_v30 = vmul.f32 %v455_v23, %v4376_v14  ;;  %v4433_v43 = vld [vmem:[%s8007_s1] ss:$8 sm:$0xf] }
  0xa0   :  { %680 = vmatpush.msra.mxu1 %v461_v44 }
  0xa1   :  { %636 = vmatpush.msra.mxu0 %v460_v46  ;;  %v4438_v46 = vperm.slane %v4418_v40, 0 }
  0xa3   :  { %8272 = vst [vmem:[#allocation22_spill] sm:$0xff] %v4438_v46 }
  0xa4   :  { %v4352_v51 = vpop.permute.xlu1 %418 }
  0xa5   :  { %v500_v52 = vpop.permute.xlu0 %499  ;;  %v429_v53 = vsel %vm426_vm3, %v4352_v51, %v421_v31 }
  0xa6   :  { %v435_v54 = vmul.f32 %v429_v53, %v4345_v48  ;;  %v502_v55 = vsel %vm501_vm0, %v498_v9, %v500_v52  ;;  %v505_v56 = vsel %vm501_vm0, %v500_v52, %v494_v22  ;;  %v4374_v9 = vperm.slane %v4018_v37, 2 }
  0xa7   :  { %v512_v57 = vmul.f32 %v502_v55, %v4348_v49  ;;  %v513_v58 = vmul.f32 %v505_v56, %v4350_v50  ;;  %v351_v52 = vsel %vm347_vm6, %v4287_v13, %v4271_v4  ;;  %v326_v55 = vsel %vm322_vm7, %v4281_v10, %v4279_v8 }
  0xa8   :  { %637 = vmatpush.msra.mxu0 %v435_v54  ;;  %8267 = vst [vmem:[#allocation17_spill] sm:$0xff] %v4374_v9  ;;  %v4447_v54 = vperm.slane %v4433_v43, 0 }
  0xa9   :  { %722 = vmatpush.msra.mxu2 %v512_v57  ;;  %766 = vmatpush.msra.mxu3 %v513_v58  ;;  %v356_v57 = vmul.f32 %v351_v52, %v4438_v46  ;;  %v4458_v58 = vperm.slane %v4342_v47, 2 }
  0xaa   :  { %638 = vmatpush.msra.mxu0 %v4195_v1  ;;  %v452_v1 = vsel %vm451_vm2, %v4299_v19, %v450_v45  ;;  %v4016_v19 = vld [vmem:[%s8007_s1 + $0x3] ss:$8 sm:$0xf]  ;;  %8273 = vst [vmem:[#allocation23_spill] sm:$0xff] %v4447_v54  ;;  %v331_v23 = vmul.f32 %v326_v55, %v4447_v54 }
  0xab   :  { %v4406_v33 = vperm.slane %v4016_v19, 0  ;;  %v4409_v34 = vperm.slane %v4016_v19, 1  ;;  %8275 = vst [vmem:[#allocation25_spill] sm:$0xff] %v4458_v58 }
  0xac   :  { %v475_v63 = vpop.permute.xlu1 %474 }
  0xad   :  { %v423_v16 = vpop.permute.xlu0 %422  ;;  %v477_v21 = vsel %vm476_vm1, %v4285_v12, %v475_v63  ;;  %v480_v22 = vsel %vm476_vm1, %v475_v63, %v469_v32  ;;  %v462_v12 = vmul.f32 %v452_v1, %v4374_v9  ;;  %v4403_v32 = vpop.permute.xlu2 %370  ;;  %8269 = vst [vmem:[#allocation19_spill] sm:$0xff] %v4406_v33  ;;  %v4461_v63 = vperm.slane %v4342_v47, 3 }
  0xae   :  { %v428_v24 = vsel %vm426_vm3, %v421_v31, %v423_v16  ;;  %v487_v25 = vmul.f32 %v477_v21, %v4366_v60  ;;  %v488_v26 = vmul.f32 %v480_v22, %v4368_v61  ;;  %v4401_v31 = vld [vmem:[%s8007_s1 + $0x2] ss:$8 sm:$0xf]  ;;  %8270 = vst [vmem:[#allocation20_spill] sm:$0xff] %v4409_v34  ;;  %v376_v42 = vsel %vm372_vm5, %v4403_v32, %v4275_v6 }
  0xaf   :  { %v436_v27 = vmul.f32 %v428_v24, %v4372_v62  ;;  %v4413_v37 = vperm.slane %v4401_v31, 0  ;;  %v4454_v56 = vperm.slane %v4401_v31, 1  ;;  %8276 = vst [vmem:[#allocation26_spill] sm:$0xff] %v4461_v63  ;;  %v4464_v22 = vperm.slane %v4418_v40, 1  ;;  %v518_v24 = vld [vmem:[%s8008_s3] sm:$0xff] }
  0xb0   :  { %723 = vmatpush.msra.mxu2 %v487_v25  ;;  %767 = vmatpush.msra.mxu3 %v488_v26  ;;  %v350_v47 = vsel %vm347_vm6, %v4271_v4, %v4273_v5  ;;  %v325_v4 = vsel %vm322_vm7, %v4279_v8, %v4283_v11 }
  0xb1   :  { %681 = vmatpush.msra.mxu1 %v436_v27  ;;  %8271 = vst [vmem:[#allocation21_spill] sm:$0xff] %v4413_v37  ;;  %v381_v53 = vmul.f32 %v376_v42, %v4413_v37 }
  0xb2   :  { %724 = vmatpush.msra.mxu2 %v462_v12  ;;  %768 = vmatpush.msra.mxu3 %v463_v30  ;;  %8274 = vst [vmem:[#allocation24_spill] sm:$0xff] %v4454_v56  ;;  %v4484_v30 = vperm.slane %v4433_v43, 1 }
  0xb3   :  { %682 = vmatpush.msra.mxu1 %v4211_v3  ;;  %8277 = vst [vmem:[#allocation27_spill] sm:$0xff] %v4464_v22 }
  0xb4   :  { %v392_v35 = vpop.permute.xlu1 %391  ;;  %8278 = vst [vmem:[#allocation28_spill] sm:$0xff] %v4484_v30 }
  0xb5   :  { %v390_v36 = vpop.permute.xlu0 %389 }
  0xb6   :  { %v401_v3 = vsel %vm397_vm4, %v4364_v59, %v390_v36  ;;  %v400_v41 = vsel %vm397_vm4, %v390_v36, %v392_v35 }
  0xb7   :  { %v406_v44 = vmul.f32 %v401_v3, %v4406_v33  ;;  %v407_v45 = vmul.f32 %v400_v41, %v4409_v34  ;;  %v4497_v3 = vperm.slane %v4016_v19, 2  ;;  %v4499_v41 = vperm.slane %v4016_v19, 3  ;;  %v581_v34 = vld [vmem:[%s8009_s2 + $0x90] sm:$0xff] }
  0xb9   :  { %639 = vmatpush.msra.mxu0 %v406_v44  ;;  %683 = vmatpush.msra.mxu1 %v407_v45  ;;  %8279 = vst [vmem:[#allocation29_spill] sm:$0xff] %v4497_v3  ;;  %v519_v44 = vld [vmem:[%s8008_s3 + $0x8] sm:$0xff]  ;;  %v4506_v45 = vperm.slane %v4401_v31, 2 }
  0xba   :  { %8280 = vst [vmem:[#allocation30_spill] sm:$0xff] %v4499_v41 }
  0xbb   :  { %640 = vmatpush.msra.mxu0 %v381_v53  ;;  %8281 = vst [vmem:[#allocation31_spill] sm:$0xff] %v4506_v45 }
  0xbc   :  { %v367_v21 = vpop.permute.xlu1 %366 }
  0xbd   :  { %641 = vmatpush.msra.mxu0 %v356_v57  ;;  %v425_v1 = vpop.permute.xlu0 %424  ;;  %v375_v25 = vsel %vm372_vm5, %v4275_v6, %v367_v21 }
  0xbe   :  { %v382_v26 = vmul.f32 %v375_v25, %v4454_v56  ;;  %v427_v27 = vsel %vm426_vm3, %v423_v16, %v425_v1  ;;  %v430_v12 = vsel %vm426_vm3, %v425_v1, %v4352_v51  ;;  %v357_v16 = vmul.f32 %v350_v47, %v4464_v22  ;;  %v586_v22 = vld [vmem:[%s8009_s2 + $0xb8] sm:$0xff] }
  0xbf   :  { %642 = vmatpush.msra.mxu0 %v331_v23  ;;  %v437_v6 = vmul.f32 %v427_v27, %v4458_v58  ;;  %v438_v36 = vmul.f32 %v430_v12, %v4461_v63  ;;  %v332_v51 = vmul.f32 %v325_v4, %v4484_v30  ;;  %v4544_v23 = vperm.slane %v4433_v43, 3 }
  0xc0   :  { %4021 = vmatmul.msk.f32.vlgmr.msra.gmra.mxu0 %vm599_vm8, %v518_v24  ;;  %684 = vmatpush.msra.mxu1 %v382_v26  ;;  %v563_v26 = vld [vmem:[%s8009_s2] sm:$0xff] }
  0xc1   :  { %725 = vmatpush.msra.mxu2 %v437_v6  ;;  %769 = vmatpush.msra.mxu3 %v438_v36  ;;  %8286 = vst [vmem:[#allocation36_spill] sm:$0xff] %v4544_v23  ;;  %v564_v36 = vld [vmem:[%s8009_s2 + $0x8] sm:$0xff] }
  0xc2   :  { %685 = vmatpush.msra.mxu1 %v357_v16 }
  0xc3   :  { %726 = vmatpush.msra.mxu2 %v4190_v0  ;;  %770 = vmatpush.msra.mxu3 %v4206_v2  ;;  %v4509_v0 = vperm.slane %v4401_v31, 3  ;;  %v4524_v31 = vperm.slane %v4418_v40, 2 }
  0xc4   :  { %v369_v42 = vpop.permute.xlu1 %368  ;;  %686 = vmatpush.msra.mxu1 %v332_v51  ;;  %v567_v51 = vld [vmem:[%s8009_s2 + $0x20] sm:$0xff] }
  0xc5   :  { %v394_v8 = vpop.permute.xlu0 %393  ;;  %4030 = vmatmul.msk.f32.vlgmr.msra.gmra.mxu1 %vm599_vm8, %v518_v24  ;;  %8282 = vst [vmem:[#allocation32_spill] sm:$0xff] %v4509_v0  ;;  %v374_v52 = vsel %vm372_vm5, %v367_v21, %v369_v42  ;;  %v373_v53 = vsel %vm372_vm5, %v369_v42, %v4403_v32  ;;  %v348_v32 = vsel %vm347_vm6, %v4289_v15, %v4287_v13 }
  0xc6   :  { %v399_v2 = vsel %vm397_vm4, %v392_v35, %v394_v8  ;;  %v398_v19 = vsel %vm397_vm4, %v394_v8, %v4364_v59  ;;  %8283 = vst [vmem:[#allocation33_spill] sm:$0xff] %v4524_v31  ;;  %v4527_v35 = vperm.slane %v4418_v40, 3  ;;  %v349_v59 = vsel %vm347_vm6, %v4273_v5, %v4289_v15 }
  0xc7   :  { %v408_v55 = vmul.f32 %v399_v2, %v4497_v3  ;;  %v409_v57 = vmul.f32 %v398_v19, %v4499_v41  ;;  %v383_v21 = vmul.f32 %v374_v52, %v4506_v45  ;;  %v384_v1 = vmul.f32 %v373_v53, %v4509_v0  ;;  %v568_v19 = vld [vmem:[%s8009_s2 + $0x28] sm:$0xff] }
  0xc8   :  { %8284 = vst [vmem:[#allocation34_spill] sm:$0xff] %v4527_v35  ;;  %4022 = vmatmul.msk.f32.gmra.mxu0 %vm599_vm8, %v519_v44  ;;  %v4541_v40 = vperm.slane %v4433_v43, 2  ;;  %v324_v5 = vsel %vm322_vm7, %v4283_v11, %v4277_v7  ;;  %v323_v13 = vsel %vm322_vm7, %v4277_v7, %v4281_v10  ;;  %v358_v15 = vmul.f32 %v349_v59, %v4524_v31  ;;  %v520_v11 = vld [vmem:[%s8008_s3 + $0x10] sm:$0xff]  ;;  %v521_v7 = vld [vmem:[%s8008_s3 + $0x18] sm:$0xff]  ;;  %v522_v10 = vld [vmem:[%s8008_s3 + $0x20] sm:$0xff] }
  0xc9   :  { %727 = vmatpush.msra.mxu2 %v408_v55  ;;  %771 = vmatpush.msra.mxu3 %v409_v57  ;;  %v359_v25 = vmul.f32 %v348_v32, %v4527_v35  ;;  %v334_v47 = vmul.f32 %v323_v13, %v4544_v23  ;;  %v566_v57 = vld [vmem:[%s8009_s2 + $0x18] sm:$0xff]  ;;  %v583_v35 = vld [vmem:[%s8009_s2 + $0xa0] sm:$0xff] }
  0xca   :  { %8285 = vst [vmem:[#allocation35_spill] sm:$0xff] %v4541_v40  ;;  %v333_v43 = vmul.f32 %v324_v5, %v4541_v40 }
  0xcb   :  { %728 = vmatpush.msra.mxu2 %v383_v21  ;;  %772 = vmatpush.msra.mxu3 %v384_v1  ;;  %v571_v1 = vld [vmem:[%s8009_s2 + $0x40] sm:$0xff] }
  0xcd   :  { %729 = vmatpush.msra.mxu2 %v358_v15  ;;  %773 = vmatpush.msra.mxu3 %v359_v25  ;;  %v565_v15 = vld [vmem:[%s8009_s2 + $0x10] sm:$0xff] }
  0xce   :  { %4031 = vmatmul.msk.f32.gmra.mxu1 %vm599_vm8, %v519_v44 }
  0xcf   :  { %730 = vmatpush.msra.mxu2 %v333_v43  ;;  %774 = vmatpush.msra.mxu3 %v334_v47 }
  0xd0   :  { %4048 = vmatmul.msk.f32.vlgmr.msra.gmra.mxu3 %vm599_vm8, %v518_v24  ;;  %4039 = vmatmul.msk.f32.vlgmr.msra.gmra.mxu2 %vm599_vm8, %v518_v24  ;;  %v523_v24 = vld [vmem:[%s8008_s3 + $0x28] sm:$0xff] }
  0xd1   :  { %4023 = vmatmul.msk.f32.gmra.mxu0 %vm599_vm8, %v520_v11 }
  0xd6   :  { %4032 = vmatmul.msk.f32.gmra.mxu1 %vm599_vm8, %v520_v11 }
  0xd8   :  { %4040 = vmatmul.msk.f32.gmra.mxu2 %vm599_vm8, %v519_v44  ;;  %4049 = vmatmul.msk.f32.gmra.mxu3 %vm599_vm8, %v519_v44 }
  0xd9   :  { %4024 = vmatmul.msk.f32.gmra.mxu0 %vm599_vm8, %v521_v7 }
  0xde   :  { %4033 = vmatmul.msk.f32.gmra.mxu1 %vm599_vm8, %v521_v7 }
  0xe0   :  { %4041 = vmatmul.msk.f32.gmra.mxu2 %vm599_vm8, %v520_v11  ;;  %4050 = vmatmul.msk.f32.gmra.mxu3 %vm599_vm8, %v520_v11  ;;  %v572_v11 = vld [vmem:[%s8009_s2 + $0x48] sm:$0xff] }
  0xe1   :  { %4025 = vmatmul.msk.f32.gmra.mxu0 %vm599_vm8, %v522_v10 }
  0xe6   :  { %4034 = vmatmul.msk.f32.gmra.mxu1 %vm599_vm8, %v522_v10 }
  0xe8   :  { %4051 = vmatmul.msk.f32.gmra.mxu3 %vm599_vm8, %v521_v7  ;;  %4042 = vmatmul.msk.f32.gmra.mxu2 %vm599_vm8, %v521_v7 }
  0xe9   :  { %4026 = vmatmul.msk.f32.gmra.mxu0 %vm599_vm8, %v523_v24 }
  0xee   :  { %4035 = vmatmul.msk.f32.gmra.mxu1 %vm599_vm8, %v523_v24 }
  0xf0   :  { %4052 = vmatmul.msk.f32.gmra.mxu3 %vm599_vm8, %v522_v10  ;;  %4043 = vmatmul.msk.f32.gmra.mxu2 %vm599_vm8, %v522_v10 }
  0xf8   :  { %4044 = vmatmul.msk.f32.gmra.mxu2 %vm599_vm8, %v523_v24  ;;  %4053 = vmatmul.msk.f32.gmra.mxu3 %vm599_vm8, %v523_v24  ;;  %v569_v24 = vld [vmem:[%s8009_s2 + $0x30] sm:$0xff] }
 0x13d   :  { %v644_v27 = vpop.f32.mrf.mxu0 }
 0x13e   :  { %v645_v12 = vadd.f32 %v644_v27, %v563_v26 }
 0x140   :  { %v4594_v6 = vmax.f32 %v645_v12, 0.0 }
 0x142   :  { %1451 = vrot.lane.b32.xlu0 %v4594_v6, %s4139_s18  ;;  %851 = vrot.lane.b32.xlu2 %v4594_v6, %s4133_s9  ;;  %v688_v4 = vpop.f32.mrf.mxu1 }
 0x143   :  { %v689_v16 = vadd.f32 %v688_v4, %v564_v36 }
 0x145   :  { %v4606_v42 = vmax.f32 %v689_v16, 0.0  ;;  %v647_v8 = vpop.f32.mrf.mxu0  ;;  %v570_v16 = vld [vmem:[%s8009_s2 + $0x38] sm:$0xff] }
 0x146   :  { %v648_v44 = vadd.f32 %v647_v8, %v567_v51 }
 0x147   :  { %1463 = vrot.lane.b32.xlu1 %v4606_v42, %s4139_s18 }
 0x148   :  { %v4610_v2 = vmax.f32 %v648_v44, 0.0 }
 0x14a   :  { %853 = vrot.lane.b32.xlu0 %v4610_v2, %s4133_s9  ;;  %863 = vrot.lane.b32.xlu2 %v4606_v42, %s4133_s9 }
 0x14b   :  { %v691_v52 = vpop.f32.mrf.mxu1 }
 0x14c   :  { %v692_v53 = vadd.f32 %v691_v52, %v568_v19  ;;  %v573_v19 = vld [vmem:[%s8009_s2 + $0x50] sm:$0xff] }
 0x14e   :  { %v4619_v55 = vmax.f32 %v692_v53, 0.0  ;;  %v650_v5 = vpop.f32.mrf.mxu0 }
 0x14f   :  { %1739 = vrot.lane.b32.xlu1 %v4594_v6, %s4137_s16  ;;  %v651_v25 = vadd.f32 %v650_v5, %v571_v1 }
 0x151   :  { %v4656_v47 = vmax.f32 %v651_v25, 0.0  ;;  %v575_v25 = vld [vmem:[%s8009_s2 + $0x60] sm:$0xff] }
 0x152   :  { %865 = vrot.lane.b32.xlu0 %v4619_v55, %s4133_s9  ;;  %995 = vrot.lane.b32.xlu2 %v4594_v6, %s4134_s10 }
 0x153   :  { %v776_v59 = vpop.f32.mrf.mxu3  ;;  %v732_v13 = vpop.f32.mrf.mxu2 }
 0x154   :  { %v777_v32 = vadd.f32 %v776_v59, %v566_v57  ;;  %v733_v43 = vadd.f32 %v732_v13, %v565_v15  ;;  %v694_v7 = vpop.f32.mrf.mxu1 }
 0x155   :  { %v695_v27 = vadd.f32 %v694_v7, %v572_v11 }
 0x156   :  { %v4630_v21 = vmax.f32 %v777_v32, 0.0  ;;  %v4661_v10 = vmax.f32 %v733_v43, 0.0  ;;  %v574_v32 = vld [vmem:[%s8009_s2 + $0x58] sm:$0xff]  ;;  %v653_v43 = vpop.f32.mrf.mxu0 }
 0x157   :  { %v4672_v36 = vmax.f32 %v695_v27, 0.0  ;;  %v654_v11 = vadd.f32 %v653_v43, %v575_v25 }
 0x158   :  { %8287 = vst [vmem:[#allocation37_spill] sm:$0xff] %v4630_v21  ;;  %1175 = vrot.lane.b32.xlu1 %v4630_v21, %s4135_s15 }
 0x159   :  { %8288 = vst [vmem:[#allocation38_spill] sm:$0xff] %v4661_v10 }
 0x15a   :  { %997 = vrot.lane.b32.xlu0 %v4610_v2, %s4134_s10  ;;  %1007 = vrot.lane.b32.xlu2 %v4606_v42, %s4134_s10 }
 0x15b   :  { %v735_v26 = vpop.f32.mrf.mxu2  ;;  %v779_v51 = vpop.f32.mrf.mxu3 }
 0x15c   :  { %v736_v12 = vadd.f32 %v735_v26, %v569_v24  ;;  %v780_v8 = vadd.f32 %v779_v51, %v570_v16  ;;  %v4742_v24 = vmax.f32 %v654_v11, 0.0  ;;  %v578_v26 = vld [vmem:[%s8009_s2 + $0x78] sm:$0xff] }
 0x15e   :  { %v4674_v4 = vmax.f32 %v736_v12, 0.0  ;;  %v4685_v44 = vmax.f32 %v780_v8, 0.0  ;;  %v576_v8 = vld [vmem:[%s8009_s2 + $0x68] sm:$0xff] }
 0x160   :  { %1453 = vrot.lane.b32.xlu1 %v4610_v2, %s4139_s18  ;;  %8289 = vst [vmem:[#allocation39_spill] sm:$0xff] %v4685_v44 }
 0x162   :  { %1009 = vrot.lane.b32.xlu0 %v4619_v55, %s4134_s10  ;;  %1139 = vrot.lane.b32.xlu2 %v4594_v6, %s4135_s15 }
 0x163   :  { %v738_v52 = vpop.f32.mrf.mxu2  ;;  %v782_v1 = vpop.f32.mrf.mxu3 }
 0x164   :  { %v739_v53 = vadd.f32 %v738_v52, %v573_v19  ;;  %v783_v5 = vadd.f32 %v782_v1, %v574_v32  ;;  %v697_v19 = vpop.f32.mrf.mxu1  ;;  %v656_v32 = vpop.f32.mrf.mxu0 }
 0x165   :  { %v698_v1 = vadd.f32 %v697_v19, %v576_v8 }
 0x166   :  { %v4714_v57 = vmax.f32 %v739_v53, 0.0  ;;  %v4727_v13 = vmax.f32 %v783_v5, 0.0  ;;  %v579_v53 = vld [vmem:[%s8009_s2 + $0x80] sm:$0xff] }
 0x167   :  { %v657_v25 = vadd.f32 %v656_v32, %v579_v53  ;;  %v4773_v43 = vmax.f32 %v698_v1, 0.0 }
 0x168   :  { %1597 = vrot.lane.b32.xlu1 %v4610_v2, %s4138_s17  ;;  %8291 = vst [vmem:[#allocation41_spill] sm:$0xff] %v4727_v13 }
 0x16a   :  { %1141 = vrot.lane.b32.xlu0 %v4610_v2, %s4135_s15  ;;  %1751 = vrot.lane.b32.xlu2 %v4606_v42, %s4137_s16 }
 0x16b   :  { %v785_v27 = vpop.f32.mrf.mxu3 }
 0x16c   :  { %v786_v12 = vadd.f32 %v785_v27, %v578_v26  ;;  %v4779_v27 = vmax.f32 %v657_v25, 0.0  ;;  %v700_v8 = vpop.f32.mrf.mxu1  ;;  %v659_v3 = vpop.f32.mrf.mxu0 }
 0x16e   :  { %v4760_v52 = vmax.f32 %v786_v12, 0.0  ;;  %v580_v12 = vld [vmem:[%s8009_s2 + $0x88] sm:$0xff] }
 0x16f   :  { %v701_v53 = vadd.f32 %v700_v8, %v580_v12  ;;  %v582_v8 = vld [vmem:[%s8009_s2 + $0x98] sm:$0xff] }
 0x170   :  { %855 = vrot.lane.b32.xlu1 %v4656_v47, %s4133_s9  ;;  %8295 = vst [vmem:[#allocation45_spill] sm:$0xff] %v4760_v52 }
 0x171   :  { %v4796_v25 = vmax.f32 %v701_v53, 0.0 }
 0x172   :  { %1753 = vrot.lane.b32.xlu0 %v4619_v55, %s4137_s16  ;;  %875 = vrot.lane.b32.xlu2 %v4661_v10, %s4133_s9 }
 0x173   :  { %v788_v53 = vpop.f32.mrf.mxu3 }
 0x174   :  { %v789_v14 = vadd.f32 %v788_v53, %v582_v8  ;;  %v660_v8 = vadd.f32 %v659_v3, %v583_v35  ;;  %v703_v40 = vpop.f32.mrf.mxu1  ;;  %v577_v3 = vld [vmem:[%s8009_s2 + $0x70] sm:$0xff]  ;;  %v741_v35 = vpop.f32.mrf.mxu2 }
 0x176   :  { %v4821_v61 = vmax.f32 %v789_v14, 0.0  ;;  %v4838_v14 = vmax.f32 %v660_v8, 0.0 }
 0x178   :  { %867 = vrot.lane.b32.xlu1 %v4672_v36, %s4133_s9  ;;  %8304 = vst [vmem:[#allocation54_spill] sm:$0xff] %v4821_v61 }
 0x17a   :  { %877 = vrot.lane.b32.xlu0 %v4674_v4, %s4133_s9  ;;  %887 = vrot.lane.b32.xlu2 %v4630_v21, %s4133_s9 }
 0x17b   :  { %v791_v62 = vpop.f32.mrf.mxu3 }
 0x17c   :  { %v744_v38 = vpop.f32.mrf.mxu2 }
 0x180   :  { %999 = vrot.lane.b32.xlu1 %v4656_v47, %s4134_s10 }
 0x182   :  { %889 = vrot.lane.b32.xlu0 %v4685_v44, %s4133_s9  ;;  %1019 = vrot.lane.b32.xlu2 %v4661_v10, %s4134_s10 }
 0x188   :  { %1011 = vrot.lane.b32.xlu1 %v4672_v36, %s4134_s10 }
 0x18a   :  { %1021 = vrot.lane.b32.xlu0 %v4674_v4, %s4134_s10  ;;  %1031 = vrot.lane.b32.xlu2 %v4630_v21, %s4134_s10 }
 0x190   :  { %1143 = vrot.lane.b32.xlu1 %v4656_v47, %s4135_s15 }
 0x192   :  { %1033 = vrot.lane.b32.xlu0 %v4685_v44, %s4134_s10  ;;  %1465 = vrot.lane.b32.xlu2 %v4619_v55, %s4139_s18 }
 0x198   :  { %1611 = vrot.lane.b32.xlu1 %v4672_v36, %s4138_s17 }
 0x19a   :  { %1755 = vrot.lane.b32.xlu0 %v4672_v36, %s4137_s16  ;;  %1741 = vrot.lane.b32.xlu2 %v4610_v2, %s4137_s16 }
 0x19c   :  { %v4716_v59 = vpop.permute.xlu2 %851 }
 0x19d   :  { %8290 = vst [vmem:[#allocation40_spill] sm:$0xff] %v4716_v59 }
 0x1a0   :  { %879 = vrot.lane.b32.xlu1 %v4714_v57, %s4133_s9 }
 0x1a2   :  { %1599 = vrot.lane.b32.xlu0 %v4656_v47, %s4138_s17  ;;  %1609 = vrot.lane.b32.xlu2 %v4619_v55, %s4138_s17 }
 0x1a4   :  { %v4729_v15 = vpop.permute.xlu2 %863 }
 0x1a5   :  { %8292 = vst [vmem:[#allocation42_spill] sm:$0xff] %v4729_v15 }
 0x1a8   :  { %891 = vrot.lane.b32.xlu1 %v4727_v13, %s4133_s9 }
 0x1aa   :  { %1179 = vrot.lane.b32.xlu0 %v4727_v13, %s4135_s15  ;;  %1177 = vrot.lane.b32.xlu2 %v4685_v44, %s4135_s15 }
 0x1ac   :  { %v4740_v7 = vpop.permute.xlu2 %995 }
 0x1b0   :  { %1023 = vrot.lane.b32.xlu1 %v4714_v57, %s4134_s10 }
 0x1b2   :  { %1745 = vrot.lane.b32.xlu0 %v4742_v24, %s4137_s16  ;;  %1743 = vrot.lane.b32.xlu2 %v4656_v47, %s4137_s16 }
 0x1b4   :  { %v4753_v16 = vpop.permute.xlu2 %1007  ;;  %v4755_v51 = vpop.permute.xlu0 %1451 }
 0x1b5   :  { %8293 = vst [vmem:[#allocation43_spill] sm:$0xff] %v4753_v16 }
 0x1b6   :  { %8294 = vst [vmem:[#allocation44_spill] sm:$0xff] %v4755_v51 }
 0x1b8   :  { %1035 = vrot.lane.b32.xlu1 %v4727_v13, %s4134_s10 }
 0x1b9   :  { %v4767_v5 = vpop.permute.xlu1 %1463 }
 0x1ba   :  { %8296 = vst [vmem:[#allocation46_spill] sm:$0xff] %v4767_v5  ;;  %1181 = vrot.lane.b32.xlu0 %v4760_v52, %s4135_s15  ;;  %857 = vrot.lane.b32.xlu2 %v4742_v24, %s4133_s9 }
 0x1bc   :  { %v4775_v11 = vpop.permute.xlu2 %1139  ;;  %v4777_v26 = vpop.permute.xlu0 %853 }
 0x1bd   :  { %8297 = vst [vmem:[#allocation47_spill] sm:$0xff] %v4775_v11 }
 0x1be   :  { %8298 = vst [vmem:[#allocation48_spill] sm:$0xff] %v4777_v26 }
 0x1c0   :  { %1757 = vrot.lane.b32.xlu1 %v4773_v43, %s4137_s16 }
 0x1c1   :  { %v4786_v19 = vpop.permute.xlu1 %1739 }
 0x1c2   :  { %8299 = vst [vmem:[#allocation49_spill] sm:$0xff] %v4786_v19  ;;  %859 = vrot.lane.b32.xlu0 %v4779_v27, %s4133_s9  ;;  %869 = vrot.lane.b32.xlu2 %v4773_v43, %s4133_s9 }
 0x1c4   :  { %v4792_v32 = vpop.permute.xlu2 %1751  ;;  %v4794_v1 = vpop.permute.xlu0 %865 }
 0x1c5   :  { %8300 = vst [vmem:[#allocation50_spill] sm:$0xff] %v4794_v1 }
 0x1c8   :  { %1601 = vrot.lane.b32.xlu1 %v4742_v24, %s4138_s17 }
 0x1ca   :  { %871 = vrot.lane.b32.xlu0 %v4796_v25, %s4133_s9  ;;  %v4802_v41 = vpop.permute.xlu1 %1175  ;;  %1001 = vrot.lane.b32.xlu2 %v4742_v24, %s4134_s10 }
 0x1cb   :  { %8301 = vst [vmem:[#allocation51_spill] sm:$0xff] %v4802_v41 }
 0x1cc   :  { %v4806_v63 = vpop.permute.xlu2 %875  ;;  %v4808_v12 = vpop.permute.xlu0 %997 }
 0x1cd   :  { %8302 = vst [vmem:[#allocation52_spill] sm:$0xff] %v4806_v63  ;;  %v584_v63 = vld [vmem:[%s8009_s2 + $0xa8] sm:$0xff] }
 0x1ce   :  { %v704_v31 = vadd.f32 %v703_v40, %v584_v63 }
 0x1d0   :  { %1747 = vrot.lane.b32.xlu1 %v4779_v27, %s4137_s16  ;;  %v4858_v58 = vmax.f32 %v704_v31, 0.0 }
 0x1d2   :  { %1003 = vrot.lane.b32.xlu0 %v4779_v27, %s4134_s10  ;;  %v4817_v50 = vpop.permute.xlu1 %1453  ;;  %1013 = vrot.lane.b32.xlu2 %v4773_v43, %s4134_s10 }
 0x1d3   :  { %8303 = vst [vmem:[#allocation53_spill] sm:$0xff] %v4817_v50 }
 0x1d4   :  { %v4823_v49 = vpop.permute.xlu2 %887  ;;  %v4825_v23 = vpop.permute.xlu0 %1009 }
 0x1d5   :  { %8305 = vst [vmem:[#allocation55_spill] sm:$0xff] %v4823_v49 }
 0x1d6   :  { %8306 = vst [vmem:[#allocation56_spill] sm:$0xff] %v4825_v23 }
 0x1d8   :  { %1327 = vrot.lane.b32.xlu1 %v4821_v61, %s4140_s19 }
 0x1da   :  { %1015 = vrot.lane.b32.xlu0 %v4796_v25, %s4134_s10  ;;  %v4834_v53 = vpop.permute.xlu1 %1597  ;;  %1145 = vrot.lane.b32.xlu2 %v4742_v24, %s4135_s15 }
 0x1db   :  { %8307 = vst [vmem:[#allocation57_spill] sm:$0xff] %v4834_v53 }
 0x1dc   :  { %v4840_v9 = vpop.permute.xlu2 %1019  ;;  %v4842_v0 = vpop.permute.xlu0 %1141 }
 0x1dd   :  { %8308 = vst [vmem:[#allocation58_spill] sm:$0xff] %v4840_v9  ;;  %v742_v9 = vadd.f32 %v741_v35, %v577_v3  ;;  %v1511_v35 = vsel %vm426_vm3, %v4755_v51, %v4767_v5  ;;  %v745_v51 = vadd.f32 %v744_v38, %v581_v34 }
 0x1de   :  { %8309 = vst [vmem:[#allocation59_spill] sm:$0xff] %v4842_v0 }
 0x1df   :  { %v4864_v18 = vmax.f32 %v742_v9, 0.0  ;;  %v4904_v1 = vmax.f32 %v745_v51, 0.0 }
 0x1e0   :  { %861 = vrot.lane.b32.xlu1 %v4838_v14, %s4133_s9 }
 0x1e2   :  { %1147 = vrot.lane.b32.xlu0 %v4779_v27, %s4135_s15  ;;  %v4854_v8 = vpop.permute.xlu1 %855  ;;  %1613 = vrot.lane.b32.xlu2 %v4773_v43, %s4138_s17 }
 0x1e3   :  { %8310 = vst [vmem:[#allocation60_spill] sm:$0xff] %v4854_v8 }
 0x1e4   :  { %v4860_v45 = vpop.permute.xlu2 %1031  ;;  %v4862_v60 = vpop.permute.xlu0 %1753 }
 0x1e5   :  { %8311 = vst [vmem:[#allocation61_spill] sm:$0xff] %v4860_v45 }
 0x1e8   :  { %873 = vrot.lane.b32.xlu1 %v4858_v58, %s4133_s9 }
 0x1ea   :  { %1615 = vrot.lane.b32.xlu0 %v4796_v25, %s4138_s17  ;;  %v4870_v63 = vpop.permute.xlu1 %867  ;;  %881 = vrot.lane.b32.xlu2 %v4864_v18, %s4133_s9 }
 0x1eb   :  { %8312 = vst [vmem:[#allocation62_spill] sm:$0xff] %v4870_v63  ;;  %v747_v63 = vpop.f32.mrf.mxu2 }
 0x1ec   :  { %v4874_v40 = vpop.permute.xlu2 %1465  ;;  %v4876_v31 = vpop.permute.xlu0 %877 }
 0x1ed   :  { %8313 = vst [vmem:[#allocation63_spill] sm:$0xff] %v4874_v40  ;;  %v1512_v9 = vsel %vm426_vm3, %v4817_v50, %v4874_v40 }
 0x1ee   :  { %8314 = vst [vmem:[#allocation64_spill] sm:$0xff] %v4876_v31  ;;  %v1551_v3 = vmul.f32 %v1512_v9, %v4345_v48  ;;  %v1547_v31 = vmul.f32 %v1511_v35, %v4345_v48 }
 0x1f0   :  { %1005 = vrot.lane.b32.xlu1 %v4838_v14, %s4134_s10  ;;  %2357 = vmatpush.msrb.mxu1 %v1551_v3 }
 0x1f2   :  { %1291 = vrot.lane.b32.xlu0 %v4779_v27, %s4140_s19  ;;  %v4895_v9 = vpop.permute.xlu1 %999  ;;  %893 = vrot.lane.b32.xlu2 %v4760_v52, %s4133_s9 }
 0x1f3   :  { %2358 = vmatpush.msrb.mxu1 %v1547_v31 }
 0x1f4   :  { %v4899_v50 = vpop.permute.xlu2 %1741  ;;  %v4901_v15 = vpop.permute.xlu0 %889 }
 0x1f5   :  { %8315 = vst [vmem:[#allocation65_spill] sm:$0xff] %v4899_v50  ;;  %2359 = vmatpush.msrb.mxu1 %v4838_v14 }
 0x1f6   :  { %8316 = vst [vmem:[#allocation66_spill] sm:$0xff] %v4901_v15 }
 0x1f7   :  { %2360 = vmatpush.msrb.mxu1 %v4779_v27 }
 0x1f8   :  { %1017 = vrot.lane.b32.xlu1 %v4858_v58, %s4134_s10 }
 0x1f9   :  { %2361 = vmatpush.msrb.mxu1 %v4742_v24 }
 0x1fa   :  { %883 = vrot.lane.b32.xlu0 %v4904_v1, %s4133_s9  ;;  %v4912_v38 = vpop.permute.xlu1 %1011  ;;  %1025 = vrot.lane.b32.xlu2 %v4864_v18, %s4134_s10 }
 0x1fb   :  { %8317 = vst [vmem:[#allocation67_spill] sm:$0xff] %v4912_v38  ;;  %2362 = vmatpush.msrb.mxu1 %v4656_v47 }
 0x1fc   :  { %v4917_v34 = vpop.permute.xlu2 %1609  ;;  %v4919_v51 = vpop.permute.xlu0 %1021 }
 0x1fd   :  { %8318 = vst [vmem:[#allocation68_spill] sm:$0xff] %v4919_v51  ;;  %2363 = vmatpush.msrb.mxu1 %v4610_v2  ;;  %v585_v51 = vld [vmem:[%s8009_s2 + $0xb0] sm:$0xff] }
 0x1fe   :  { %v748_v30 = vadd.f32 %v747_v63, %v585_v51  ;;  %v792_v63 = vadd.f32 %v791_v62, %v586_v22 }
 0x1ff   :  { %2364 = vmatpush.msrb.mxu1 %v4594_v6 }
 0x200   :  { %1749 = vrot.lane.b32.xlu1 %v4838_v14, %s4137_s16  ;;  %v4946_v5 = vmax.f32 %v748_v30, 0.0  ;;  %v4963_v30 = vmax.f32 %v792_v63, 0.0 }
 0x202   :  { %895 = vrot.lane.b32.xlu0 %v4821_v61, %s4133_s9  ;;  %v4927_v31 = vpop.permute.xlu1 %1143  ;;  %1037 = vrot.lane.b32.xlu2 %v4760_v52, %s4134_s10  ;;  %8324 = vst [vmem:[#allocation74_spill] sm:$0xff] %v4963_v30 }
 0x203   :  { %8319 = vst [vmem:[#allocation69_spill] sm:$0xff] %v4927_v31 }
 0x204   :  { %v4931_v3 = vpop.permute.xlu2 %1177  ;;  %v4933_v35 = vpop.permute.xlu0 %1033 }
 0x205   :  { %8320 = vst [vmem:[#allocation70_spill] sm:$0xff] %v4931_v3 }
 0x206   :  { %8321 = vst [vmem:[#allocation71_spill] sm:$0xff] %v4933_v35 }
 0x208   :  { %1617 = vrot.lane.b32.xlu1 %v4858_v58, %s4138_s17 }
 0x20a   :  { %1027 = vrot.lane.b32.xlu0 %v4904_v1, %s4134_s10  ;;  %v4942_v16 = vpop.permute.xlu1 %1611  ;;  %1759 = vrot.lane.b32.xlu2 %v4796_v25, %s4137_s16 }
 0x20c   :  { %v4948_v23 = vpop.permute.xlu2 %1743  ;;  %v4950_v38 = vpop.permute.xlu0 %1755 }
 0x20d   :  { %8322 = vst [vmem:[#allocation72_spill] sm:$0xff] %v4948_v23 }
 0x210   :  { %885 = vrot.lane.b32.xlu1 %v4946_v5, %s4133_s9 }
 0x212   :  { %1039 = vrot.lane.b32.xlu0 %v4821_v61, %s4134_s10  ;;  %v4959_v51 = vpop.permute.xlu1 %879  ;;  %1603 = vrot.lane.b32.xlu2 %v4779_v27, %s4138_s17 }
 0x213   :  { %8323 = vst [vmem:[#allocation73_spill] sm:$0xff] %v4959_v51 }
 0x214   :  { %v4965_v40 = vpop.permute.xlu2 %857  ;;  %v4967_v56 = vpop.permute.xlu0 %1599 }
 0x215   :  { %8325 = vst [vmem:[#allocation75_spill] sm:$0xff] %v4965_v40  ;;  %v1206_v40 = vsel %vm372_vm5, %v4931_v3, %v4842_v0 }
 0x216   :  { %8326 = vst [vmem:[#allocation76_spill] sm:$0xff] %v4967_v56 }
 0x218   :  { %897 = vrot.lane.b32.xlu1 %v4963_v30, %s4133_s9 }
 0x21a   :  { %1605 = vrot.lane.b32.xlu0 %v4838_v14, %s4138_s17  ;;  %v4973_v62 = vpop.permute.xlu1 %891  ;;  %1761 = vrot.lane.b32.xlu2 %v4858_v58, %s4137_s16 }
 0x21b   :  { %8327 = vst [vmem:[#allocation77_spill] sm:$0xff] %v4973_v62 }
 0x21c   :  { %v4977_v22 = vpop.permute.xlu2 %869  ;;  %v4979_v51 = vpop.permute.xlu0 %1179 }
 0x21d   :  { %8328 = vst [vmem:[#allocation78_spill] sm:$0xff] %v4977_v22  ;;  %v1207_v8 = vsel %vm372_vm5, %v4979_v51, %v4927_v31 }
 0x21e   :  { %8329 = vst [vmem:[#allocation79_spill] sm:$0xff] %v4979_v51  ;;  %v1243_v54 = vmul.f32 %v1207_v8, %v4413_v37  ;;  %v1239_v51 = vmul.f32 %v1206_v40, %v4413_v37 }
 0x220   :  { %1029 = vrot.lane.b32.xlu1 %v4946_v5, %s4134_s10 }
 0x222   :  { %1329 = vrot.lane.b32.xlu0 %v4963_v30, %s4140_s19  ;;  %v4985_v63 = vpop.permute.xlu1 %1023  ;;  %1293 = vrot.lane.b32.xlu2 %v4838_v14, %s4140_s19 }
 0x223   :  { %8330 = vst [vmem:[#allocation80_spill] sm:$0xff] %v4985_v63 }
 0x224   :  { %v4989_v28 = vpop.permute.xlu2 %1001  ;;  %v4991_v49 = vpop.permute.xlu0 %1745 }
 0x225   :  { %8331 = vst [vmem:[#allocation81_spill] sm:$0xff] %v4991_v49 }
 0x228   :  { %1041 = vrot.lane.b32.xlu1 %v4963_v30, %s4134_s10 }
 0x22a   :  { %1607 = vrot.lane.b32.xlu0 %v4606_v42, %s4138_s17  ;;  %v4997_v22 = vpop.permute.xlu1 %1035  ;;  %1595 = vrot.lane.b32.xlu2 %v4594_v6, %s4138_s17 }
 0x22b   :  { %8332 = vst [vmem:[#allocation82_spill] sm:$0xff] %v4997_v22 }
 0x22c   :  { %v5001_v59 = vpop.permute.xlu2 %1013  ;;  %v5003_v63 = vpop.permute.xlu0 %1181 }
 0x22d   :  { %8333 = vst [vmem:[#allocation83_spill] sm:$0xff] %v5001_v59 }
 0x22e   :  { %8334 = vst [vmem:[#allocation84_spill] sm:$0xff] %v5003_v63 }
 0x230   :  { %1893 = vrot.lane.b32.xlu1 %v4838_v14, %s4136_s0 }
 0x232   :  { %1289 = vrot.lane.b32.xlu0 %v4742_v24, %s4140_s19  ;;  %v5009_v15 = vpop.permute.xlu1 %1757  ;;  %1905 = vrot.lane.b32.xlu2 %v4858_v58, %s4136_s0 }
 0x234   :  { %v5013_v26 = vpop.permute.xlu2 %1145  ;;  %v5015_v48 = vpop.permute.xlu0 %859 }
 0x235   :  { %8335 = vst [vmem:[#allocation85_spill] sm:$0xff] %v5013_v26  ;;  %v1208_v59 = vsel %vm372_vm5, %v5003_v63, %v5013_v26 }
 0x236   :  { %v1247_v62 = vmul.f32 %v1208_v59, %v4413_v37 }
 0x238   :  { %1325 = vrot.lane.b32.xlu1 %v4760_v52, %s4140_s19  ;;  %2322 = vmatpush.msrb.mxu0 %v1247_v62  ;;  %v1205_v62 = vsel %vm372_vm5, %v4802_v41, %v4775_v11 }
 0x239   :  { %v1235_v8 = vmul.f32 %v1205_v62, %v4413_v37 }
 0x23a   :  { %1473 = vrot.lane.b32.xlu0 %v4858_v58, %s4139_s18  ;;  %v5035_v59 = vpop.permute.xlu1 %1601  ;;  %1461 = vrot.lane.b32.xlu2 %v4838_v14, %s4139_s18 }
 0x23b   :  { %8336 = vst [vmem:[#allocation86_spill] sm:$0xff] %v5035_v59  ;;  %2323 = vmatpush.msrb.mxu0 %v1243_v54 }
 0x23c   :  { %v5044_v63 = vpop.permute.xlu2 %1613  ;;  %v5046_v3 = vpop.permute.xlu0 %871 }
 0x23d   :  { %8337 = vst [vmem:[#allocation87_spill] sm:$0xff] %v5046_v3  ;;  %2324 = vmatpush.msrb.mxu0 %v1239_v51 }
 0x23f   :  { %2325 = vmatpush.msrb.mxu0 %v1235_v8 }
 0x240   :  { %1891 = vrot.lane.b32.xlu1 %v4779_v27, %s4136_s0 }
 0x242   :  { %1287 = vrot.lane.b32.xlu0 %v4656_v47, %s4140_s19  ;;  %v5053_v0 = vpop.permute.xlu1 %1747  ;;  %1903 = vrot.lane.b32.xlu2 %v4796_v25, %s4136_s0 }
 0x243   :  { %8338 = vst [vmem:[#allocation88_spill] sm:$0xff] %v5053_v0 }
 0x244   :  { %v5057_v54 = vpop.permute.xlu2 %881  ;;  %v5059_v40 = vpop.permute.xlu0 %1003 }
 0x245   :  { %8339 = vst [vmem:[#allocation89_spill] sm:$0xff] %v5057_v54 }
 0x248   :  { %1323 = vrot.lane.b32.xlu1 %v4727_v13, %s4140_s19 }
 0x24a   :  { %1471 = vrot.lane.b32.xlu0 %v4796_v25, %s4139_s18  ;;  %v5065_v51 = vpop.permute.xlu1 %1327  ;;  %1459 = vrot.lane.b32.xlu2 %v4779_v27, %s4139_s18 }
 0x24b   :  { %8340 = vst [vmem:[#allocation90_spill] sm:$0xff] %v5065_v51 }
 0x24c   :  { %v5069_v62 = vpop.permute.xlu2 %893  ;;  %v5071_v8 = vpop.permute.xlu0 %1015 }
 0x24d   :  { %8341 = vst [vmem:[#allocation91_spill] sm:$0xff] %v5069_v62 }
 0x24e   :  { %8342 = vst [vmem:[#allocation92_spill] sm:$0xff] %v5071_v8 }
 0x250   :  { %1889 = vrot.lane.b32.xlu1 %v4742_v24, %s4136_s0 }
 0x252   :  { %1285 = vrot.lane.b32.xlu0 %v4610_v2, %s4140_s19  ;;  %v5077_v41 = vpop.permute.xlu1 %861  ;;  %1901 = vrot.lane.b32.xlu2 %v4773_v43, %s4136_s0 }
 0x254   :  { %v5081_v54 = vpop.permute.xlu2 %1025  ;;  %v5083_v3 = vpop.permute.xlu0 %1147 }
 0x255   :  { %8343 = vst [vmem:[#allocation93_spill] sm:$0xff] %v5081_v54 }
 0x256   :  { %8344 = vst [vmem:[#allocation94_spill] sm:$0xff] %v5083_v3 }
 0x258   :  { %1321 = vrot.lane.b32.xlu1 %v4685_v44, %s4140_s19 }
 0x25a   :  { %1469 = vrot.lane.b32.xlu0 %v4773_v43, %s4139_s18  ;;  %v5089_v27 = vpop.permute.xlu1 %873  ;;  %1457 = vrot.lane.b32.xlu2 %v4742_v24, %s4139_s18 }
 0x25b   :  { %8345 = vst [vmem:[#allocation95_spill] sm:$0xff] %v5089_v27 }
 0x25c   :  { %v5093_v8 = vpop.permute.xlu2 %1037  ;;  %v5095_v11 = vpop.permute.xlu0 %1615 }
 0x25d   :  { %8346 = vst [vmem:[#allocation96_spill] sm:$0xff] %v5093_v8 }
 0x260   :  { %1887 = vrot.lane.b32.xlu1 %v4656_v47, %s4136_s0 }
 0x262   :  { %1283 = vrot.lane.b32.xlu0 %v4594_v6, %s4140_s19  ;;  %v5101_v54 = vpop.permute.xlu1 %1005  ;;  %1899 = vrot.lane.b32.xlu2 %v4672_v36, %s4136_s0 }
 0x264   :  { %v5105_v13 = vpop.permute.xlu2 %1759  ;;  %v5107_v27 = vpop.permute.xlu0 %1291 }
 0x268   :  { %1319 = vrot.lane.b32.xlu1 %v4630_v21, %s4140_s19 }
 0x26a   :  { %1467 = vrot.lane.b32.xlu0 %v4672_v36, %s4139_s18  ;;  %v5113_v24 = vpop.permute.xlu1 %1017  ;;  %1455 = vrot.lane.b32.xlu2 %v4656_v47, %s4139_s18 }
 0x26b   :  { %8347 = vst [vmem:[#allocation97_spill] sm:$0xff] %v5113_v24 }
 0x26c   :  { %v5117_v31 = vpop.permute.xlu2 %1603  ;;  %v5119_v26 = vpop.permute.xlu0 %883 }
 0x26d   :  { %8348 = vst [vmem:[#allocation98_spill] sm:$0xff] %v5117_v31 }
 0x26e   :  { %8349 = vst [vmem:[#allocation99_spill] sm:$0xff] %v5119_v26 }
 0x270   :  { %1885 = vrot.lane.b32.xlu1 %v4610_v2, %s4136_s0  ;;  %v1803_v2 = vsel %vm476_vm1, %v5053_v0, %v5105_v13 }
 0x271   :  { %v1851_v52 = vmul.f32 %v1803_v2, %v4315_v29  ;;  %v1800_v2 = vsel %vm476_vm1, %v4899_v50, %v4862_v60  ;;  %v1658_v50 = vsel %vm451_vm2, %v5035_v59, %v5044_v63 }
 0x272   :  { %1149 = vrot.lane.b32.xlu0 %v4838_v14, %s4135_s15  ;;  %v5125_v3 = vpop.permute.xlu1 %1749  ;;  %1897 = vrot.lane.b32.xlu2 %v4619_v55, %s4136_s0  ;;  %v1802_v14 = vsel %vm476_vm1, %v4991_v49, %v5009_v15 }
 0x273   :  { %8350 = vst [vmem:[#allocation100_spill] sm:$0xff] %v5125_v3  ;;  %v1847_v0 = vmul.f32 %v1802_v14, %v4315_v29 }
 0x274   :  { %v5129_v21 = vpop.permute.xlu2 %1761  ;;  %v5131_v24 = vpop.permute.xlu0 %895 }
 0x275   :  { %8351 = vst [vmem:[#allocation101_spill] sm:$0xff] %v5131_v24  ;;  %v1804_v47 = vsel %vm476_vm1, %v5125_v3, %v5129_v21 }
 0x276   :  { %v1855_v26 = vmul.f32 %v1804_v47, %v4315_v29 }
 0x278   :  { %1185 = vrot.lane.b32.xlu1 %v4963_v30, %s4135_s15  ;;  %2392 = vmatpush.msrb.mxu2 %v1855_v26  ;;  %v1801_v26 = vsel %vm476_vm1, %v4948_v23, %v4950_v38  ;;  %v1799_v23 = vsel %vm476_vm1, %v4786_v19, %v4792_v32  ;;  %v1659_v19 = vsel %vm451_vm2, %v5117_v31, %v5095_v11 }
 0x279   :  { %v1835_v14 = vmul.f32 %v1799_v23, %v4315_v29  ;;  %v1703_v31 = vmul.f32 %v1658_v50, %v4329_v39  ;;  %v1353_v50 = vsel %vm397_vm4, %v5065_v51, %v5107_v27 }
 0x27a   :  { %1895 = vrot.lane.b32.xlu0 %v4606_v42, %s4136_s0  ;;  %v5151_v47 = vpop.permute.xlu1 %1617  ;;  %1883 = vrot.lane.b32.xlu2 %v4594_v6, %s4136_s0  ;;  %v1843_v6 = vmul.f32 %v1801_v26, %v4315_v29 }
 0x27b   :  { %2393 = vmatpush.msrb.mxu2 %v1851_v52  ;;  %v1839_v52 = vmul.f32 %v1800_v2, %v4315_v29 }
 0x27c   :  { %v5160_v3 = vpop.permute.xlu2 %1293  ;;  %v5162_v49 = vpop.permute.xlu0 %1027 }
 0x27d   :  { %8352 = vst [vmem:[#allocation102_spill] sm:$0xff] %v5162_v49  ;;  %2394 = vmatpush.msrb.mxu2 %v1847_v0 }
 0x27f   :  { %2395 = vmatpush.msrb.mxu2 %v1843_v6 }
 0x280   :  { %1183 = vrot.lane.b32.xlu1 %v4821_v61, %s4135_s15 }
 0x281   :  { %2396 = vmatpush.msrb.mxu2 %v1839_v52 }
 0x282   :  { %1157 = vrot.lane.b32.xlu0 %v4773_v43, %s4135_s15  ;;  %v5179_v0 = vpop.permute.xlu1 %885  ;;  %1773 = vrot.lane.b32.xlu2 %v4946_v5, %s4137_s16 }
 0x283   :  { %8353 = vst [vmem:[#allocation103_spill] sm:$0xff] %v5179_v0  ;;  %2397 = vmatpush.msrb.mxu2 %v1835_v14  ;;  %v1707_v0 = vmul.f32 %v1659_v19, %v4329_v39  ;;  %v1656_v19 = vsel %vm451_vm2, %v4834_v53, %v4917_v34  ;;  %v1061_v53 = vsel %vm347_vm6, %v4860_v45, %v4740_v7  ;;  %v8370_v45 = vld [vmem:[#allocation60_spill] sm:$0xff] }
 0x284   :  { %v5183_v26 = vpop.permute.xlu2 %1595  ;;  %v5185_v6 = vpop.permute.xlu0 %1039 }
 0x285   :  { %8354 = vst [vmem:[#allocation104_spill] sm:$0xff] %v5183_v26 }
 0x286   :  { %8355 = vst [vmem:[#allocation105_spill] sm:$0xff] %v5185_v6 }
 0x288   :  { %1771 = vrot.lane.b32.xlu1 %v4904_v1, %s4137_s16 }
 0x28a   :  { %1477 = vrot.lane.b32.xlu0 %v4674_v4, %s4139_s18  ;;  %v5191_v23 = vpop.permute.xlu1 %897  ;;  %1155 = vrot.lane.b32.xlu2 %v4672_v36, %s4135_s15 }
 0x28b   :  { %8356 = vst [vmem:[#allocation106_spill] sm:$0xff] %v5191_v23 }
 0x28c   :  { %v5195_v2 = vpop.permute.xlu2 %1905  ;;  %v5197_v52 = vpop.permute.xlu0 %1605 }
 0x28d   :  { %8357 = vst [vmem:[#allocation107_spill] sm:$0xff] %v5197_v52  ;;  %v1660_v14 = vsel %vm451_vm2, %v5197_v52, %v5151_v47 }
 0x28e   :  { %v1711_v29 = vmul.f32 %v1660_v14, %v4329_v39 }
 0x290   :  { %1769 = vrot.lane.b32.xlu1 %v4864_v18, %s4137_s16  ;;  %2398 = vmatpush.msrb.mxu2 %v1711_v29  ;;  %v1657_v29 = vsel %vm451_vm2, %v4967_v56, %v4942_v16 }
 0x291   :  { %v1699_v49 = vmul.f32 %v1657_v29, %v4329_v39 }
 0x292   :  { %1475 = vrot.lane.b32.xlu0 %v4661_v10, %s4139_s18  ;;  %v5217_v14 = vpop.permute.xlu1 %1029  ;;  %1153 = vrot.lane.b32.xlu2 %v4619_v55, %s4135_s15 }
 0x293   :  { %8358 = vst [vmem:[#allocation108_spill] sm:$0xff] %v5217_v14  ;;  %2399 = vmatpush.msrb.mxu2 %v1707_v0  ;;  %v1695_v14 = vmul.f32 %v1656_v19, %v4329_v39 }
 0x294   :  { %v5226_v52 = vpop.permute.xlu2 %1461  ;;  %v5228_v59 = vpop.permute.xlu0 %1329 }
 0x295   :  { %8359 = vst [vmem:[#allocation109_spill] sm:$0xff] %v5226_v52  ;;  %2400 = vmatpush.msrb.mxu2 %v1703_v31  ;;  %v1354_v56 = vsel %vm397_vm4, %v5228_v59, %v5160_v3  ;;  %v1395_v31 = vmul.f32 %v1353_v50, %v4406_v33 }
 0x296   :  { %8360 = vst [vmem:[#allocation110_spill] sm:$0xff] %v5228_v59  ;;  %v1399_v0 = vmul.f32 %v1354_v56, %v4406_v33  ;;  %v1065_v56 = vsel %vm347_vm6, %v5185_v6, %v5059_v40  ;;  %v1064_v59 = vsel %vm347_vm6, %v5093_v8, %v4989_v28  ;;  %v8373_v8 = vld [vmem:[#allocation48_spill] sm:$0xff]  ;;  %v8374_v6 = vld [vmem:[#allocation66_spill] sm:$0xff] }
 0x297   :  { %2401 = vmatpush.msrb.mxu2 %v1699_v49 }
 0x298   :  { %1767 = vrot.lane.b32.xlu1 %v4714_v57, %s4137_s16  ;;  %2365 = vmatpush.msrb.mxu1 %v1399_v0 }
 0x299   :  { %2402 = vmatpush.msrb.mxu2 %v1695_v14 }
 0x29a   :  { %1765 = vrot.lane.b32.xlu0 %v4674_v4, %s4137_s16  ;;  %v5250_v29 = vpop.permute.xlu1 %1041  ;;  %1151 = vrot.lane.b32.xlu2 %v4606_v42, %s4135_s15 }
 0x29b   :  { %8361 = vst [vmem:[#allocation111_spill] sm:$0xff] %v5250_v29  ;;  %2366 = vmatpush.msrb.mxu1 %v1395_v31  ;;  %v1066_v49 = vsel %vm347_vm6, %v5250_v29, %v5101_v54  ;;  %v1107_v31 = vmul.f32 %v1065_v56, %v4438_v46 }
 0x29c   :  { %v5262_v14 = vpop.permute.xlu2 %1903  ;;  %v5264_v19 = vpop.permute.xlu0 %1607  ;;  %v1111_v0 = vmul.f32 %v1066_v49, %v4438_v46  ;;  %v1063_v49 = vsel %vm347_vm6, %v4997_v22, %v4895_v9 }
 0x29d   :  { %8362 = vst [vmem:[#allocation112_spill] sm:$0xff] %v5262_v14  ;;  %v1655_v50 = vsel %vm451_vm2, %v5183_v26, %v5264_v19 }
 0x29e   :  { %2326 = vmatpush.msrb.mxu0 %v1111_v0  ;;  %v1691_v51 = vmul.f32 %v1655_v50, %v4329_v39  ;;  %v1103_v0 = vmul.f32 %v1064_v59, %v4438_v46  ;;  %v1062_v50 = vsel %vm347_vm6, %v4933_v35, %v4808_v12  ;;  %v8371_v35 = vld [vmem:[#allocation77_spill] sm:$0xff] }
 0x29f   :  { %v919_v22 = vsel %vm322_vm7, %v8371_v35, %v8370_v45 }
 0x2a0   :  { %1763 = vrot.lane.b32.xlu1 %v4661_v10, %s4137_s16  ;;  %2327 = vmatpush.msrb.mxu0 %v1107_v31  ;;  %v1099_v31 = vmul.f32 %v1063_v49, %v4438_v46  ;;  %v922_v49 = vsel %vm322_vm7, %v5191_v23, %v5077_v41 }
 0x2a1   :  { %2403 = vmatpush.msrb.mxu2 %v1691_v51 }
 0x2a2   :  { %1627 = vrot.lane.b32.xlu0 %v4904_v1, %s4138_s17  ;;  %v5286_v56 = vpop.permute.xlu1 %1893  ;;  %1629 = vrot.lane.b32.xlu2 %v4946_v5, %s4138_s17 }
 0x2a3   :  { %8363 = vst [vmem:[#allocation113_spill] sm:$0xff] %v5286_v56  ;;  %2328 = vmatpush.msrb.mxu0 %v1103_v0  ;;  %v1948_v59 = vsel %vm501_vm0, %v5286_v56, %v5195_v2  ;;  %v1095_v0 = vmul.f32 %v1062_v50, %v4438_v46  ;;  %v1091_v56 = vmul.f32 %v1061_v53, %v4438_v46  ;;  %v8367_v53 = vld [vmem:[#allocation75_spill] sm:$0xff] }
 0x2a4   :  { %v5299_v51 = vpop.permute.xlu2 %1459  ;;  %v5301_v39 = vpop.permute.xlu0 %1289  ;;  %v1999_v26 = vmul.f32 %v1948_v59, %v4301_v20  ;;  %v921_v59 = vsel %vm322_vm7, %v5131_v24, %v5015_v48 }
 0x2a5   :  { %8364 = vst [vmem:[#allocation114_spill] sm:$0xff] %v5299_v51  ;;  %2329 = vmatpush.msrb.mxu0 %v1099_v31  ;;  %v8365_v31 = vld [vmem:[#allocation23_spill] sm:$0xff] }
 0x2a6   :  { %2437 = vmatpush.msrb.mxu3 %v1999_v26  ;;  %v967_v50 = vmul.f32 %v922_v49, %v8365_v31  ;;  %v963_v46 = vmul.f32 %v921_v59, %v8365_v31  ;;  %v955_v29 = vmul.f32 %v919_v22, %v8365_v31 }
 0x2a7   :  { %2330 = vmatpush.msrb.mxu0 %v1095_v0  ;;  %v920_v0 = vsel %vm322_vm7, %v5069_v62, %v8367_v53 }
 0x2a8   :  { %1625 = vrot.lane.b32.xlu1 %v4864_v18, %s4138_s17 }
 0x2a9   :  { %2331 = vmatpush.msrb.mxu0 %v1091_v56 }
 0x2aa   :  { %1305 = vrot.lane.b32.xlu0 %v4858_v58, %s4140_s19  ;;  %v5323_v26 = vpop.permute.xlu1 %1325  ;;  %1623 = vrot.lane.b32.xlu2 %v4714_v57, %s4138_s17 }
 0x2ab   :  { %8366 = vst [vmem:[#allocation115_spill] sm:$0xff] %v5323_v26  ;;  %2332 = vmatpush.msrb.mxu0 %v967_v50  ;;  %v1352_v56 = vsel %vm397_vm4, %v5323_v26, %v5301_v39  ;;  %v959_v50 = vmul.f32 %v920_v0, %v8365_v31  ;;  %v8372_v26 = vld [vmem:[#allocation11_spill] sm:$0xff] }
 0x2ac   :  { %v5336_v49 = vpop.permute.xlu2 %1901  ;;  %v5338_v24 = vpop.permute.xlu0 %1473  ;;  %v1391_v23 = vmul.f32 %v1352_v56, %v4406_v33  ;;  %v918_v56 = vsel %vm322_vm7, %v8374_v6, %v8373_v8  ;;  %v8376_v0 = vld [vmem:[#allocation55_spill] sm:$0xff] }
 0x2ad   :  { %8368 = vst [vmem:[#allocation75_spill] sm:$0xff] %v5336_v49  ;;  %2333 = vmatpush.msrb.mxu0 %v963_v46  ;;  %v1516_v59 = vsel %vm426_vm3, %v5226_v52, %v5338_v24  ;;  %v8375_v46 = vld [vmem:[#allocation40_spill] sm:$0xff] }
 0x2ae   :  { %8369 = vst [vmem:[#allocation116_spill] sm:$0xff] %v5338_v24  ;;  %2367 = vmatpush.msrb.mxu1 %v1391_v23  ;;  %v1567_v62 = vmul.f32 %v1516_v59, %v8372_v26  ;;  %v917_v52 = vsel %vm322_vm7, %v8376_v0, %v8375_v46  ;;  %v951_v23 = vmul.f32 %v918_v56, %v8365_v31  ;;  %v524_v24 = vld [vmem:[%s8008_s3 + $0x30] sm:$0xff] }
 0x2af   :  { %2334 = vmatpush.msrb.mxu0 %v959_v50  ;;  %v947_v22 = vmul.f32 %v917_v52, %v8365_v31  ;;  %4045 = vmatmul.msk.f32.gmra.mxu2 %vm599_vm8, %v524_v24 }
 0x2b0   :  { %1621 = vrot.lane.b32.xlu1 %v4674_v4, %s4138_s17  ;;  %2404 = vmatpush.msrb.mxu2 %v1567_v62 }
 0x2b1   :  { %2335 = vmatpush.msrb.mxu0 %v955_v29  ;;  %4054 = vmatmul.msk.f32.gmra.mxu3 %vm599_vm8, %v524_v24 }
 0x2b2   :  { %1619 = vrot.lane.b32.xlu0 %v4661_v10, %s4138_s17  ;;  %v5365_v59 = vpop.permute.xlu1 %1891  ;;  %1303 = vrot.lane.b32.xlu2 %v4796_v25, %s4140_s19 }
 0x2b3   :  { %8377 = vst [vmem:[#allocation60_spill] sm:$0xff] %v5365_v59  ;;  %2336 = vmatpush.msrb.mxu0 %v951_v23  ;;  %v1947_v62 = vsel %vm501_vm0, %v5365_v59, %v5262_v14  ;;  %4036 = vmatmul.msk.f32.gmra.mxu1 %vm599_vm8, %v524_v24 }
 0x2b4   :  { %v5374_v50 = vpop.permute.xlu2 %1457  ;;  %v5376_v29 = vpop.permute.xlu0 %1287  ;;  %v1995_v56 = vmul.f32 %v1947_v62, %v4301_v20  ;;  %4027 = vmatmul.msk.f32.gmra.mxu0 %vm599_vm8, %v524_v24 }
 0x2b5   :  { %8378 = vst [vmem:[#allocation48_spill] sm:$0xff] %v5374_v50  ;;  %2337 = vmatpush.msrb.mxu0 %v947_v22 }
 0x2b6   :  { %2438 = vmatpush.msrb.mxu3 %v1995_v56 }
 0x2b8   :  { %1917 = vrot.lane.b32.xlu1 %v4946_v5, %s4136_s0 }
 0x2ba   :  { %1485 = vrot.lane.b32.xlu0 %v4946_v5, %s4139_s18  ;;  %v5383_v52 = vpop.permute.xlu1 %1323  ;;  %1301 = vrot.lane.b32.xlu2 %v4773_v43, %s4140_s19 }
 0x2bb   :  { %8379 = vst [vmem:[#allocation40_spill] sm:$0xff] %v5383_v52  ;;  %v1351_v23 = vsel %vm397_vm4, %v5383_v52, %v5376_v29 }
 0x2bc   :  { %v5391_v31 = vpop.permute.xlu2 %1899  ;;  %v5393_v22 = vpop.permute.xlu0 %1471  ;;  %v1387_v62 = vmul.f32 %v1351_v23, %v4406_v33 }
 0x2bd   :  { %8380 = vst [vmem:[#allocation117_spill] sm:$0xff] %v5391_v31  ;;  %v1515_v56 = vsel %vm426_vm3, %v5299_v51, %v5393_v22 }
 0x2be   :  { %8381 = vst [vmem:[#allocation118_spill] sm:$0xff] %v5393_v22  ;;  %2368 = vmatpush.msrb.mxu1 %v1387_v62  ;;  %v1563_v59 = vmul.f32 %v1515_v56, %v8372_v26  ;;  %v8393_v22 = vld [vmem:[#allocation7_spill] sm:$0xff] }
 0x2c0   :  { %1915 = vrot.lane.b32.xlu1 %v4904_v1, %s4136_s0  ;;  %2405 = vmatpush.msrb.mxu2 %v1563_v59 }
 0x2c2   :  { %1483 = vrot.lane.b32.xlu0 %v4904_v1, %s4139_s18  ;;  %v5405_v52 = vpop.permute.xlu1 %1889  ;;  %1299 = vrot.lane.b32.xlu2 %v4672_v36, %s4140_s19 }
 0x2c3   :  { %8382 = vst [vmem:[#allocation119_spill] sm:$0xff] %v5405_v52  ;;  %v1946_v23 = vsel %vm501_vm0, %v5405_v52, %v5336_v49 }
 0x2c4   :  { %v5413_v62 = vpop.permute.xlu2 %1455  ;;  %v5415_v56 = vpop.permute.xlu0 %1285  ;;  %v1991_v51 = vmul.f32 %v1946_v23, %v4301_v20 }
 0x2c5   :  { %8383 = vst [vmem:[#allocation120_spill] sm:$0xff] %v5413_v62 }
 0x2c6   :  { %2439 = vmatpush.msrb.mxu3 %v1991_v51 }
 0x2c8   :  { %1913 = vrot.lane.b32.xlu1 %v4864_v18, %s4136_s0 }
 0x2ca   :  { %v5420_v59 = vpop.permute.xlu1 %1321  ;;  %1297 = vrot.lane.b32.xlu2 %v4619_v55, %s4140_s19  ;;  %1481 = vrot.lane.b32.xlu0 %v4864_v18, %s4139_s18 }
 0x2cb   :  { %8384 = vst [vmem:[#allocation121_spill] sm:$0xff] %v5420_v59  ;;  %v1350_v52 = vsel %vm397_vm4, %v5420_v59, %v5415_v56 }
 0x2cc   :  { %v5430_v0 = vpop.permute.xlu2 %1897  ;;  %v5432_v23 = vpop.permute.xlu0 %1469  ;;  %v1383_v51 = vmul.f32 %v1350_v52, %v4406_v33 }
 0x2cd   :  { %8385 = vst [vmem:[#allocation122_spill] sm:$0xff] %v5430_v0  ;;  %v1514_v6 = vsel %vm426_vm3, %v5374_v50, %v5432_v23 }
 0x2ce   :  { %8386 = vst [vmem:[#allocation123_spill] sm:$0xff] %v5432_v23  ;;  %2369 = vmatpush.msrb.mxu1 %v1383_v51  ;;  %v1559_v35 = vmul.f32 %v1514_v6, %v8372_v26 }
 0x2d0   :  { %1911 = vrot.lane.b32.xlu1 %v4714_v57, %s4136_s0  ;;  %2406 = vmatpush.msrb.mxu2 %v1559_v35 }
 0x2d2   :  { %v5442_v49 = vpop.permute.xlu1 %1887  ;;  %1295 = vrot.lane.b32.xlu2 %v4606_v42, %s4140_s19  ;;  %1479 = vrot.lane.b32.xlu0 %v4714_v57, %s4139_s18 }
 0x2d3   :  { %8387 = vst [vmem:[#allocation124_spill] sm:$0xff] %v5442_v49  ;;  %v1945_v52 = vsel %vm501_vm0, %v5442_v49, %v5391_v31 }
 0x2d4   :  { %v5452_v51 = vpop.permute.xlu2 %1883  ;;  %v5454_v6 = vpop.permute.xlu0 %1283  ;;  %v1987_v59 = vmul.f32 %v1945_v52, %v4301_v20 }
 0x2d5   :  { %8388 = vst [vmem:[#allocation125_spill] sm:$0xff] %v5452_v51 }
 0x2d6   :  { %8389 = vst [vmem:[#allocation126_spill] sm:$0xff] %v5454_v6  ;;  %2440 = vmatpush.msrb.mxu3 %v1987_v59 }
 0x2d8   :  { %1909 = vrot.lane.b32.xlu1 %v4674_v4, %s4136_s0 }
 0x2da   :  { %v5459_v35 = vpop.permute.xlu1 %1319  ;;  %1161 = vrot.lane.b32.xlu2 %v4858_v58, %s4135_s15  ;;  %1907 = vrot.lane.b32.xlu0 %v4661_v10, %s4136_s0 }
 0x2db   :  { %8390 = vst [vmem:[#allocation127_spill] sm:$0xff] %v5459_v35  ;;  %v1349_v50 = vsel %vm397_vm4, %v5459_v35, %v5454_v6 }
 0x2dc   :  { %v5469_v49 = vpop.permute.xlu2 %1773  ;;  %v5471_v52 = vpop.permute.xlu0 %1467  ;;  %v1379_v59 = vmul.f32 %v1349_v50, %v4406_v33 }
 0x2dd   :  { %8391 = vst [vmem:[#allocation128_spill] sm:$0xff] %v5469_v49  ;;  %v1798_v31 = vsel %vm476_vm1, %v5129_v21, %v5469_v49  ;;  %v1513_v23 = vsel %vm426_vm3, %v5413_v62, %v5471_v52  ;;  %v526_v62 = vld [vmem:[%s8008_s3 + $0x40] sm:$0xff] }
 0x2de   :  { %8392 = vst [vmem:[#allocation129_spill] sm:$0xff] %v5471_v52  ;;  %v1856_v14 = vmul.f32 %v1798_v31, %v8393_v22  ;;  %2370 = vmatpush.msrb.mxu1 %v1379_v59  ;;  %v1555_v35 = vmul.f32 %v1513_v23, %v8372_v26  ;;  %v8407_v52 = vld [vmem:[#allocation69_spill] sm:$0xff] }
 0x2e0   :  { %1159 = vrot.lane.b32.xlu1 %v4796_v25, %s4135_s15  ;;  %2407 = vmatpush.msrb.mxu2 %v1555_v35  ;;  %v525_v35 = vld [vmem:[%s8008_s3 + $0x38] sm:$0xff] }
 0x2e1   :  { %4028 = vmatmul.msk.f32.gmra.mxu0 %vm599_vm8, %v525_v35  ;;  %4046 = vmatmul.msk.f32.gmra.mxu2 %vm599_vm8, %v525_v35 }
 0x2e2   :  { %2532 = vmatpush.msra.mxu2 %v1856_v14  ;;  %v5490_v21 = vpop.permute.xlu1 %1885  ;;  %1785 = vrot.lane.b32.xlu2 %v4963_v30, %s4137_s16 }
 0x2e3   :  { %8394 = vst [vmem:[#allocation130_spill] sm:$0xff] %v5490_v21  ;;  %1169 = vrot.lane.b32.xlu0 %v4864_v18, %s4135_s15  ;;  %v1944_v31 = vsel %vm501_vm0, %v5490_v21, %v5430_v0  ;;  %4055 = vmatmul.msk.f32.gmra.mxu3 %vm599_vm8, %v525_v35  ;;  %v8400_v21 = vld [vmem:[#allocation45_spill] sm:$0xff] }
 0x2e4   :  { %v5502_v14 = vpop.permute.xlu2 %1155  ;;  %v5504_v50 = vpop.permute.xlu0 %1149  ;;  %v1983_v23 = vmul.f32 %v1944_v31, %v4301_v20  ;;  %4037 = vmatmul.msk.f32.gmra.mxu1 %vm599_vm8, %v525_v35  ;;  %v8402_v35 = vld [vmem:[#allocation37_spill] sm:$0xff] }
 0x2e5   :  { %8395 = vst [vmem:[#allocation131_spill] sm:$0xff] %v5502_v14 }
 0x2e6   :  { %8396 = vst [vmem:[#allocation132_spill] sm:$0xff] %v5504_v50  ;;  %2441 = vmatpush.msrb.mxu3 %v1983_v23 }
 0x2e8   :  { %1783 = vrot.lane.b32.xlu1 %v4821_v61, %s4137_s16 }
 0x2e9   :  { %4029 = vmatmul.msk.f32.gmra.mxu0 %vm599_vm8, %v526_v62  ;;  %4047 = vmatmul.msk.f32.gmra.mxu2 %vm599_vm8, %v526_v62 }
 0x2ea   :  { %v5514_v59 = vpop.permute.xlu1 %1185  ;;  %1167 = vrot.lane.b32.xlu2 %v4714_v57, %s4135_s15 }
 0x2eb   :  { %8397 = vst [vmem:[#allocation133_spill] sm:$0xff] %v5514_v59  ;;  %1489 = vrot.lane.b32.xlu0 %v4685_v44, %s4139_s18  ;;  %v1210_v24 = vsel %vm372_vm5, %v5514_v59, %v5504_v50  ;;  %4056 = vmatmul.msk.f32.gmra.mxu3 %vm599_vm8, %v526_v62  ;;  %v5573_v50 = vld [vmem:[%s8010_s4] sm:$0xff] }
 0x2ec   :  { %v5526_v31 = vpop.permute.xlu2 %1153  ;;  %v5528_v23 = vpop.permute.xlu0 %1895  ;;  %v1255_v33 = vmul.f32 %v1210_v24, %v4413_v37  ;;  %4038 = vmatmul.msk.f32.gmra.mxu1 %vm599_vm8, %v526_v62  ;;  %v8409_v62 = vld [vmem:[#allocation59_spill] sm:$0xff] }
 0x2ed   :  { %8398 = vst [vmem:[#allocation134_spill] sm:$0xff] %v5526_v31  ;;  %v1943_v26 = vsel %vm501_vm0, %v5452_v51, %v5528_v23 }
 0x2ee   :  { %8399 = vst [vmem:[#allocation135_spill] sm:$0xff] %v5528_v23  ;;  %2371 = vmatpush.msrb.mxu1 %v1255_v33  ;;  %v1979_v59 = vmul.f32 %v1943_v26, %v4301_v20  ;;  %v8403_v33 = vld [vmem:[#allocation94_spill] sm:$0xff]  ;;  %v8406_v23 = vld [vmem:[#allocation85_spill] sm:$0xff] }
 0x2f0   :  { %1781 = vrot.lane.b32.xlu1 %v8400_v21, %s4137_s16  ;;  %2442 = vmatpush.msrb.mxu3 %v1979_v59 }
 0x2f1   :  { %2338 = vmatmul.f32.vlgmr.msrb.gmra.mxu0 %v5573_v50 }
 0x2f2   :  { %v5543_v24 = vpop.permute.xlu1 %1183  ;;  %1165 = vrot.lane.b32.xlu2 %v4674_v4, %s4135_s15 }
 0x2f3   :  { %8401 = vst [vmem:[#allocation136_spill] sm:$0xff] %v5543_v24  ;;  %1487 = vrot.lane.b32.xlu0 %v8402_v35, %s4139_s18  ;;  %v1209_v26 = vsel %vm372_vm5, %v5543_v24, %v8403_v33  ;;  %v1201_v24 = vsel %vm372_vm5, %v8407_v52, %v5502_v14  ;;  %v8408_v33 = vld [vmem:[#allocation24_spill] sm:$0xff]  ;;  %v8414_v14 = vld [vmem:[#allocation63_spill] sm:$0xff] }
 0x2f4   :  { %v5555_v59 = vpop.permute.xlu2 %1151  ;;  %v5557_v20 = vpop.permute.xlu0 %1157  ;;  %v1251_v51 = vmul.f32 %v1209_v26, %v4413_v37  ;;  %v1200_v26 = vsel %vm372_vm5, %v8409_v62, %v5526_v31  ;;  %v1244_v37 = vmul.f32 %v1201_v24, %v8408_v33  ;;  %v8413_v62 = vld [vmem:[#allocation97_spill] sm:$0xff] }
 0x2f5   :  { %8404 = vst [vmem:[#allocation137_spill] sm:$0xff] %v5555_v59  ;;  %v1202_v0 = vsel %vm372_vm5, %v8406_v23, %v5557_v20  ;;  %v8410_v23 = vld [vmem:[#allocation41_spill] sm:$0xff]  ;;  %v1240_v24 = vmul.f32 %v1200_v26, %v8408_v33  ;;  %v8415_v26 = vld [vmem:[#allocation92_spill] sm:$0xff] }
 0x2f6   :  { %8405 = vst [vmem:[#allocation138_spill] sm:$0xff] %v5557_v20  ;;  %v1248_v49 = vmul.f32 %v1202_v0, %v8408_v33  ;;  %2372 = vmatpush.msrb.mxu1 %v1251_v51  ;;  %v8411_v0 = vld [vmem:[#allocation47_spill] sm:$0xff] }
 0x2f7   :  { %v1199_v51 = vsel %vm372_vm5, %v8411_v0, %v5555_v59  ;;  %v1060_v0 = vsel %vm347_vm6, %v5101_v54, %v8413_v62  ;;  %v8416_v54 = vld [vmem:[#allocation16_spill] sm:$0xff] }
 0x2f8   :  { %1779 = vrot.lane.b32.xlu1 %v8410_v23, %s4137_s16  ;;  %2462 = vmatpush.msra.mxu0 %v1248_v49 }
 0x2fa   :  { %v5587_v52 = vpop.permute.xlu1 %1771  ;;  %1163 = vrot.lane.b32.xlu2 %v4661_v10, %s4135_s15  ;;  %2463 = vmatpush.msra.mxu0 %v1244_v37  ;;  %v1236_v37 = vmul.f32 %v1199_v51, %v8408_v33  ;;  %v8417_v10 = vld [vmem:[#allocation27_spill] sm:$0xff] }
 0x2fb   :  { %8412 = vst [vmem:[#allocation85_spill] sm:$0xff] %v5587_v52  ;;  %1777 = vrot.lane.b32.xlu0 %v4685_v44, %s4137_s16  ;;  %v1797_v49 = vsel %vm476_vm1, %v5105_v13, %v5587_v52  ;;  %v1059_v52 = vsel %vm347_vm6, %v5059_v40, %v8415_v26  ;;  %v1112_v6 = vmul.f32 %v1060_v0, %v8417_v10  ;;  %v5628_v40 = vld [vmem:[%s8010_s4 + $0x20] sm:$0xff] }
 0x2fc   :  { %v5602_v59 = vpop.permute.xlu2 %1629  ;;  %v5604_v31 = vpop.permute.xlu0 %1477  ;;  %v1852_v20 = vmul.f32 %v1797_v49, %v8393_v22  ;;  %2464 = vmatpush.msra.mxu0 %v1240_v24  ;;  %v8418_v49 = vld [vmem:[#allocation83_spill] sm:$0xff] }
 0x2fd   :  { %v1506_v13 = vsel %vm426_vm3, %v8414_v14, %v5604_v31  ;;  %v1058_v24 = vsel %vm347_vm6, %v4989_v28, %v8418_v49  ;;  %v1108_v14 = vmul.f32 %v1059_v52, %v8417_v10  ;;  %v8421_v52 = vld [vmem:[#allocation56_spill] sm:$0xff]  ;;  %2341 = vmatmul.f32.gmra.mxu0 %v5628_v40 }
 0x2fe   :  { %v1552_v62 = vmul.f32 %v1506_v13, %v8416_v54  ;;  %2533 = vmatpush.msra.mxu2 %v1852_v20  ;;  %2465 = vmatpush.msra.mxu0 %v1236_v37  ;;  %v8419_v20 = vld [vmem:[#allocation67_spill] sm:$0xff] }
 0x2ff   :  { %v1057_v51 = vsel %vm347_vm6, %v4895_v9, %v8419_v20  ;;  %v5648_v9 = vld [vmem:[%s8010_s4 + $0x10] sm:$0xff] }
 0x300   :  { %1775 = vrot.lane.b32.xlu1 %v8402_v35, %s4137_s16  ;;  %2497 = vmatpush.msra.mxu1 %v1552_v62  ;;  %v1056_v62 = vsel %vm347_vm6, %v4808_v12, %v8421_v52  ;;  %v5669_v12 = vld [vmem:[%s8010_s4 + $0x18] sm:$0xff] }
 0x301   :  { %2466 = vmatpush.msra.mxu0 %v1112_v6  ;;  %v1104_v6 = vmul.f32 %v1058_v24, %v8417_v10  ;;  %2408 = vmatmul.f32.vlgmr.msrb.gmra.mxu2 %v5648_v9 }
 0x302   :  { %v5634_v0 = vpop.permute.xlu1 %1769  ;;  %1641 = vrot.lane.b32.xlu2 %v4963_v30, %s4138_s17  ;;  %4057 = vmatmul.msk.f32.vlgmr.msrb.gmra.mxu3 %vm2303_vm9, %v5669_v12 }
 0x303   :  { %8420 = vst [vmem:[#allocation69_spill] sm:$0xff] %v5634_v0  ;;  %1639 = vrot.lane.b32.xlu0 %v4821_v61, %s4138_s17  ;;  %v1796_v28 = vsel %vm476_vm1, %v5009_v15, %v5634_v0  ;;  %2467 = vmatpush.msra.mxu0 %v1108_v14  ;;  %v8423_v15 = vld [vmem:[#allocation46_spill] sm:$0xff]  ;;  %v1100_v14 = vmul.f32 %v1057_v51, %v8417_v10  ;;  %v8424_v0 = vld [vmem:[#allocation43_spill] sm:$0xff] }
 0x304   :  { %v5654_v13 = vpop.permute.xlu2 %1623  ;;  %v5656_v37 = vpop.permute.xlu0 %1475  ;;  %v1848_v20 = vmul.f32 %v1796_v28, %v8393_v22  ;;  %v1055_v28 = vsel %vm347_vm6, %v4740_v7, %v8424_v0  ;;  %v1096_v51 = vmul.f32 %v1056_v62, %v8417_v10  ;;  %v8426_v62 = vld [vmem:[#allocation87_spill] sm:$0xff] }
 0x305   :  { %8422 = vst [vmem:[#allocation59_spill] sm:$0xff] %v5656_v37  ;;  %2468 = vmatpush.msra.mxu0 %v1104_v6  ;;  %v1505_v24 = vsel %vm426_vm3, %v8423_v15, %v5656_v37  ;;  %v5682_v15 = vld [vmem:[%s8010_s4 + $0x8] sm:$0xff]  ;;  %v8425_v37 = vld [vmem:[#allocation95_spill] sm:$0xff]  ;;  %v1092_v7 = vmul.f32 %v1055_v28, %v8417_v10  ;;  %v8427_v28 = vld [vmem:[#allocation28_spill] sm:$0xff] }
 0x306   :  { %2534 = vmatpush.msra.mxu2 %v1848_v20  ;;  %v1548_v6 = vmul.f32 %v1505_v24, %v8416_v54  ;;  %v916_v52 = vsel %vm322_vm7, %v5077_v41, %v8425_v37  ;;  %v5694_v20 = vld [vmem:[%s8010_s4 + $0x40] sm:$0xff]  ;;  %2373 = vmatmul.f32.vlgmr.msrb.gmra.mxu1 %v5682_v15  ;;  %v915_v24 = vsel %vm322_vm7, %v5015_v48, %v8426_v62  ;;  %v5716_v48 = vld [vmem:[%s8010_s4 + $0x30] sm:$0xff] }
 0x307   :  { %2469 = vmatpush.msra.mxu0 %v1100_v14 }
 0x308   :  { %1637 = vrot.lane.b32.xlu1 %v8400_v21, %s4138_s17  ;;  %2498 = vmatpush.msra.mxu1 %v1548_v6  ;;  %v968_v6 = vmul.f32 %v916_v52, %v8427_v28  ;;  %v5738_v52 = vld [vmem:[%s8010_s4 + $0x38] sm:$0xff] }
 0x309   :  { %2470 = vmatpush.msra.mxu0 %v1096_v51  ;;  %v8428_v51 = vld [vmem:[#allocation78_spill] sm:$0xff]  ;;  %2411 = vmatmul.f32.gmra.mxu2 %v5716_v48 }
 0x30a   :  { %v5701_v41 = vpop.permute.xlu1 %1767  ;;  %1635 = vrot.lane.b32.xlu2 %v8410_v23, %s4138_s17  ;;  %2499 = vmatpush.msra.mxu1 %v4858_v58  ;;  %v914_v10 = vsel %vm322_vm7, %v8367_v53, %v8428_v51  ;;  %v964_v53 = vmul.f32 %v915_v24, %v8427_v28  ;;  %v8430_v24 = vld [vmem:[#allocation50_spill] sm:$0xff] }
 0x30b   :  { %1317 = vrot.lane.b32.xlu0 %v4946_v5, %s4140_s19  ;;  %v1795_v14 = vsel %vm476_vm1, %v4950_v38, %v5701_v41  ;;  %2471 = vmatpush.msra.mxu0 %v1092_v7  ;;  %v8429_v7 = vld [vmem:[#allocation62_spill] sm:$0xff] }
 0x30c   :  { %v5722_v62 = vpop.permute.xlu2 %1303  ;;  %v5724_v37 = vpop.permute.xlu0 %1765  ;;  %v1844_v38 = vmul.f32 %v1795_v14, %v8393_v22  ;;  %2344 = vmatmul.f32.gmra.mxu0 %v5694_v20  ;;  %2500 = vmatpush.msra.mxu1 %v4796_v25  ;;  %v913_v14 = vsel %vm322_vm7, %v8370_v45, %v8429_v7 }
 0x30d   :  { %2472 = vmatpush.msra.mxu0 %v968_v6  ;;  %v1794_v58 = vsel %vm476_vm1, %v4862_v60, %v5724_v37  ;;  %4058 = vmatmul.msk.f32.gmra.mxu3 %vm2303_vm9, %v5738_v52  ;;  %v960_v60 = vmul.f32 %v914_v10, %v8427_v28  ;;  %v912_v6 = vsel %vm322_vm7, %v8373_v8, %v8430_v24  ;;  %v5765_v10 = vld [vmem:[%s8010_s4 + $0x28] sm:$0xff] }
 0x30e   :  { %2535 = vmatpush.msra.mxu2 %v1844_v38  ;;  %v1840_v25 = vmul.f32 %v1794_v58, %v8393_v22  ;;  %2501 = vmatpush.msra.mxu1 %v4773_v43  ;;  %v956_v45 = vmul.f32 %v913_v14, %v8427_v28  ;;  %v5760_v43 = vld [vmem:[%s8010_s4 + $0x60] sm:$0xff]  ;;  %v8432_v8 = vld [vmem:[#allocation42_spill] sm:$0xff] }
 0x30f   :  { %2473 = vmatpush.msra.mxu0 %v964_v53  ;;  %8431 = vst [vmem:[#allocation47_spill] sm:$0xff] %v5760_v43  ;;  %v911_v38 = vsel %vm322_vm7, %v8375_v46, %v8432_v8  ;;  %v952_v46 = vmul.f32 %v912_v6, %v8427_v28  ;;  %2376 = vmatmul.f32.gmra.mxu1 %v5765_v10 }
 0x310   :  { %1633 = vrot.lane.b32.xlu1 %v4685_v44, %s4138_s17  ;;  %2536 = vmatpush.msra.mxu2 %v1840_v25 }
 0x311   :  { %2474 = vmatpush.msra.mxu0 %v960_v60  ;;  %2502 = vmatpush.msra.mxu1 %v4672_v36  ;;  %v1654_v36 = vsel %vm451_vm2, %v5151_v47, %v5602_v59  ;;  %v5797_v47 = vld [vmem:[%s8010_s4 + $0x50] sm:$0xff] }
 0x312   :  { %v5771_v58 = vpop.permute.xlu1 %1763  ;;  %1315 = vrot.lane.b32.xlu2 %v4904_v1, %s4140_s19  ;;  %2414 = vmatmul.f32.gmra.mxu2 %v5797_v47 }
 0x313   :  { %1631 = vrot.lane.b32.xlu0 %v8402_v35, %s4138_s17  ;;  %v1793_v53 = vsel %vm476_vm1, %v4792_v32, %v5771_v58  ;;  %2475 = vmatpush.msra.mxu0 %v956_v45  ;;  %v5804_v32 = vld [vmem:[%s8010_s4 + $0x58] sm:$0xff]  ;;  %v8434_v45 = vld [vmem:[#allocation9_spill] sm:$0xff] }
 0x314   :  { %2503 = vmatpush.msra.mxu1 %v4619_v55  ;;  %v5787_v14 = vpop.permute.xlu2 %1301  ;;  %v5789_v25 = vpop.permute.xlu0 %1627  ;;  %v1836_v60 = vmul.f32 %v1793_v53, %v8393_v22  ;;  %2347 = vmatmul.f32.gmra.mxu0 %v5760_v43  ;;  %v948_v55 = vmul.f32 %v911_v38, %v8427_v28  ;;  %v1712_v53 = vmul.f32 %v1654_v36, %v8434_v45  ;;  %v5820_v38 = vld [vmem:[%s8010_s4 + $0x80] sm:$0xff]  ;;  %v8437_v28 = vld [vmem:[#allocation20_spill] sm:$0xff] }
 0x315   :  { %8433 = vst [vmem:[#allocation63_spill] sm:$0xff] %v5787_v14  ;;  %2476 = vmatpush.msra.mxu0 %v952_v46  ;;  %v1653_v6 = vsel %vm451_vm2, %v5095_v11, %v5789_v25  ;;  %4059 = vmatmul.msk.f32.gmra.mxu3 %vm2303_vm9, %v5804_v32  ;;  %v5825_v11 = vld [vmem:[%s8010_s4 + $0x48] sm:$0xff] }
 0x316   :  { %2504 = vmatpush.msra.mxu1 %v4606_v42  ;;  %2537 = vmatpush.msra.mxu2 %v1836_v60  ;;  %v1708_v42 = vmul.f32 %v1653_v6, %v8434_v45  ;;  %8435 = vst [vmem:[#allocation92_spill] sm:$0xff] %v5820_v38  ;;  %v1651_v60 = vsel %vm451_vm2, %v4942_v16, %v5654_v13 }
 0x317   :  { %2477 = vmatpush.msra.mxu0 %v948_v55  ;;  %2379 = vmatmul.f32.gmra.mxu1 %v5825_v11 }
 0x318   :  { %1929 = vrot.lane.b32.xlu1 %v4963_v30, %s4136_s0  ;;  %2538 = vmatpush.msra.mxu2 %v1712_v53 }
 0x31a   :  { %v5827_v36 = vpop.permute.xlu1 %1625  ;;  %1313 = vrot.lane.b32.xlu2 %v4864_v18, %s4140_s19  ;;  %2539 = vmatpush.msra.mxu2 %v1708_v42  ;;  %v5860_v42 = vld [vmem:[%s8010_s4 + $0x78] sm:$0xff] }
 0x31b   :  { %1497 = vrot.lane.b32.xlu0 %v4963_v30, %s4139_s18  ;;  %v1652_v46 = vsel %vm451_vm2, %v5044_v63, %v5827_v36  ;;  %v5851_v63 = vld [vmem:[%s8010_s4 + $0x70] sm:$0xff]  ;;  %v1700_v30 = vmul.f32 %v1651_v60, %v8434_v45  ;;  %v5886_v60 = vld [vmem:[%s8010_s4 + $0x68] sm:$0xff] }
 0x31c   :  { %v5841_v55 = vpop.permute.xlu2 %1299  ;;  %v5843_v6 = vpop.permute.xlu0 %1305  ;;  %v1704_v53 = vmul.f32 %v1652_v46, %v8434_v45  ;;  %2350 = vmatmul.f32.gmra.mxu0 %v5820_v38  ;;  %v1347_v46 = vsel %vm397_vm4, %v5107_v27, %v5722_v62  ;;  %2417 = vmatmul.f32.gmra.mxu2 %v5851_v63 }
 0x31d   :  { %8436 = vst [vmem:[#allocation83_spill] sm:$0xff] %v5841_v55  ;;  %v1348_v16 = vsel %vm397_vm4, %v5160_v3, %v5843_v6  ;;  %4060 = vmatmul.msk.f32.gmra.mxu3 %vm2303_vm9, %v5860_v42  ;;  %v1346_v3 = vsel %vm397_vm4, %v5301_v39, %v5787_v14  ;;  %v1396_v27 = vmul.f32 %v1347_v46, %v8437_v28 }
 0x31e   :  { %2540 = vmatpush.msra.mxu2 %v1704_v53  ;;  %v1400_v22 = vmul.f32 %v1348_v16, %v8437_v28  ;;  %v5881_v53 = vld [vmem:[%s8010_s4 + $0xa0] sm:$0xff]  ;;  %v1345_v39 = vsel %vm397_vm4, %v5376_v29, %v5841_v55 }
 0x31f   :  { %8438 = vst [vmem:[#allocation46_spill] sm:$0xff] %v5881_v53  ;;  %2382 = vmatmul.f32.gmra.mxu1 %v5886_v60 }
 0x320   :  { %1927 = vrot.lane.b32.xlu1 %v4821_v61, %s4136_s0  ;;  %2505 = vmatpush.msra.mxu1 %v1400_v22  ;;  %v1392_v22 = vmul.f32 %v1346_v3, %v8437_v28 }
 0x321   :  { %2541 = vmatpush.msra.mxu2 %v1700_v30 }
 0x322   :  { %v5892_v16 = vpop.permute.xlu1 %1621  ;;  %1311 = vrot.lane.b32.xlu2 %v4714_v57, %s4140_s19  ;;  %2506 = vmatpush.msra.mxu1 %v1396_v27  ;;  %v1388_v27 = vmul.f32 %v1345_v39, %v8437_v28 }
 0x323   :  { %8439 = vst [vmem:[#allocation43_spill] sm:$0xff] %v5892_v16  ;;  %1495 = vrot.lane.b32.xlu0 %v4821_v61, %s4139_s18  ;;  %v1650_v30 = vsel %vm451_vm2, %v4917_v34, %v5892_v16  ;;  %v5913_v61 = vld [vmem:[%s8010_s4 + $0x90] sm:$0xff] }
 0x324   :  { %v5903_v46 = vpop.permute.xlu2 %1297  ;;  %v5905_v14 = vpop.permute.xlu0 %1619  ;;  %v1696_v29 = vmul.f32 %v1650_v30, %v8434_v45  ;;  %2353 = vmatmul.f32.gmra.mxu0 %v5881_v53  ;;  %2507 = vmatpush.msra.mxu1 %v1392_v22  ;;  %v5927_v30 = vld [vmem:[%s8010_s4 + $0x98] sm:$0xff] }
 0x325   :  { %8440 = vst [vmem:[#allocation78_spill] sm:$0xff] %v5905_v14  ;;  %v1344_v34 = vsel %vm397_vm4, %v5415_v56, %v5903_v46  ;;  %v1649_v3 = vsel %vm451_vm2, %v5264_v19, %v5905_v14  ;;  %4061 = vmatmul.msk.f32.gmra.mxu3 %vm2303_vm9, %v5927_v30  ;;  %2420 = vmatmul.f32.gmra.mxu2 %v5913_v61  ;;  %v5939_v19 = vld [vmem:[%s8010_s4 + $0x88] sm:$0xff] }
 0x326   :  { %2542 = vmatpush.msra.mxu2 %v1696_v29  ;;  %v1384_v16 = vmul.f32 %v1344_v34, %v8437_v28  ;;  %v1692_v55 = vmul.f32 %v1649_v3, %v8434_v45  ;;  %2508 = vmatpush.msra.mxu1 %v1388_v27  ;;  %v5961_v34 = vld [vmem:[%s8010_s4 + $0xb0] sm:$0xff]  ;;  %v8445_v3 = vld [vmem:[#allocation126_spill] sm:$0xff]  ;;  %v8446_v27 = vld [vmem:[#allocation116_spill] sm:$0xff] }
 0x327   :  { %2385 = vmatmul.f32.gmra.mxu1 %v5939_v19  ;;  %v5974_v45 = vld [vmem:[%s8010_s4 + $0xb8] sm:$0xff] }
 0x328   :  { %1925 = vrot.lane.b32.xlu1 %v8400_v21, %s4136_s0  ;;  %2543 = vmatpush.msra.mxu2 %v1692_v55  ;;  %v8442_v55 = vld [vmem:[#allocation5_spill] sm:$0xff] }
 0x329   :  { %2509 = vmatpush.msra.mxu1 %v1384_v16 }
 0x32a   :  { %v5941_v56 = vpop.permute.xlu1 %1917  ;;  %1309 = vrot.lane.b32.xlu2 %v4674_v4, %s4140_s19 }
 0x32b   :  { %8441 = vst [vmem:[#allocation62_spill] sm:$0xff] %v5941_v56  ;;  %1493 = vrot.lane.b32.xlu0 %v8400_v21, %s4139_s18  ;;  %v1942_v39 = vsel %vm501_vm0, %v5195_v2, %v5941_v56 }
 0x32c   :  { %v2000_v16 = vmul.f32 %v1942_v39, %v8442_v55  ;;  %v5952_v22 = vpop.permute.xlu2 %1295  ;;  %v5954_v29 = vpop.permute.xlu0 %1485  ;;  %2478 = vmatmul.f32.vlgmr.msra.gmra.mxu0 %v5573_v50 }
 0x32d   :  { %8443 = vst [vmem:[#allocation50_spill] sm:$0xff] %v5952_v22  ;;  %v1343_v2 = vsel %vm397_vm4, %v8445_v3, %v5952_v22  ;;  %v1510_v39 = vsel %vm426_vm3, %v8446_v27, %v5954_v29  ;;  %2423 = vmatmul.f32.gmra.mxu2 %v5961_v34  ;;  %4062 = vmatmul.msk.f32.gmra.mxu3 %vm2303_vm9, %v5974_v45  ;;  %v5986_v3 = vld [vmem:[%s8010_s4 + $0xa8] sm:$0xff]  ;;  %v8449_v27 = vld [vmem:[#allocation112_spill] sm:$0xff] }
 0x32e   :  { %8444 = vst [vmem:[#allocation42_spill] sm:$0xff] %v5954_v29  ;;  %2577 = vmatpush.msra.mxu3 %v2000_v16  ;;  %v1380_v21 = vmul.f32 %v1343_v2, %v8437_v28  ;;  %v1568_v56 = vmul.f32 %v1510_v39, %v8416_v54  ;;  %v8448_v2 = vld [vmem:[#allocation38_spill] sm:$0xff]  ;;  %v8452_v29 = vld [vmem:[#allocation132_spill] sm:$0xff] }
 0x32f   :  { %2388 = vmatmul.f32.gmra.mxu1 %v5986_v3  ;;  %v8453_v22 = vld [vmem:[#allocation118_spill] sm:$0xff] }
 0x330   :  { %1923 = vrot.lane.b32.xlu1 %v8410_v23, %s4136_s0  ;;  %2510 = vmatpush.msra.mxu1 %v1380_v21 }
 0x331   :  { %2544 = vmatpush.msra.mxu2 %v1568_v56 }
 0x332   :  { %v5988_v16 = vpop.permute.xlu1 %1915  ;;  %1307 = vrot.lane.b32.xlu2 %v8448_v2, %s4140_s19 }
 0x333   :  { %8447 = vst [vmem:[#allocation126_spill] sm:$0xff] %v5988_v16  ;;  %1491 = vrot.lane.b32.xlu0 %v8410_v23, %s4139_s18  ;;  %v1941_v39 = vsel %vm501_vm0, %v8449_v27, %v5988_v16 }
 0x334   :  { %v5998_v21 = vpop.permute.xlu2 %1161  ;;  %v6000_v56 = vpop.permute.xlu0 %1483  ;;  %v1996_v28 = vmul.f32 %v1941_v39, %v8442_v55  ;;  %2481 = vmatmul.f32.gmra.mxu0 %v5628_v40 }
 0x335   :  { %8450 = vst [vmem:[#allocation116_spill] sm:$0xff] %v5998_v21  ;;  %v1204_v23 = vsel %vm372_vm5, %v8452_v29, %v5998_v21  ;;  %v1509_v27 = vsel %vm426_vm3, %v8453_v22, %v6000_v56  ;;  %v8455_v22 = vld [vmem:[#allocation75_spill] sm:$0xff]  ;;  %v8466_v21 = vld [vmem:[#allocation122_spill] sm:$0xff] }
 0x336   :  { %8451 = vst [vmem:[#allocation38_spill] sm:$0xff] %v6000_v56  ;;  %v1256_v16 = vmul.f32 %v1204_v23, %v8408_v33  ;;  %2578 = vmatpush.msra.mxu3 %v1996_v28  ;;  %v1564_v14 = vmul.f32 %v1509_v27, %v8416_v54 }
 0x338   :  { %1921 = vrot.lane.b32.xlu1 %v4685_v44, %s4136_s0  ;;  %2511 = vmatpush.msra.mxu1 %v1256_v16  ;;  %v4141_v44 = vmov 0  }
 0x339   :  { %2545 = vmatpush.msra.mxu2 %v1564_v14  ;;  %v8458_v14 = vld [vmem:[#allocation123_spill] sm:$0xff]  ;;  %4108 = vset.pattern.permute.xlu1 %v4141_v44 }
 0x33a   :  { %v6017_v39 = vpop.permute.xlu1 %1913  ;;  %1173 = vrot.lane.b32.xlu2 %v4946_v5, %s4135_s15  ;;  %4107 = vset.pattern.permute.xlu0 %v4141_v44 }
 0x33b   :  { %8454 = vst [vmem:[#allocation112_spill] sm:$0xff] %v6017_v39  ;;  %1919 = vrot.lane.b32.xlu0 %v8402_v35, %s4136_s0  ;;  %v1940_v23 = vsel %vm501_vm0, %v8455_v22, %v6017_v39  ;;  %v2272_v22 = vld [vmem:[%s8011_s7 + $0x28] sm:$0xff]  ;;  %4106 = vset.pattern.permute.xlu2 %v4141_v44  ;;  %v8463_v44 = vld [vmem:[#allocation129_spill] sm:$0xff] }
 0x33c   :  { %v6027_v28 = vpop.permute.xlu2 %1785  ;;  %v6029_v29 = vpop.permute.xlu0 %1481  ;;  %v1992_v16 = vmul.f32 %v1940_v23, %v8442_v55  ;;  %2484 = vmatmul.f32.gmra.mxu0 %v5694_v20 }
 0x33d   :  { %8456 = vst [vmem:[#allocation132_spill] sm:$0xff] %v6027_v28  ;;  %v1508_v27 = vsel %vm426_vm3, %v8458_v14, %v6029_v29  ;;  %v8460_v14 = vld [vmem:[#allocation117_spill] sm:$0xff] }
 0x33e   :  { %8457 = vst [vmem:[#allocation118_spill] sm:$0xff] %v6029_v29  ;;  %2579 = vmatpush.msra.mxu3 %v1992_v16  ;;  %v1560_v35 = vmul.f32 %v1508_v27, %v8416_v54  ;;  %v8461_v27 = vld [vmem:[#allocation128_spill] sm:$0xff] }
 0x33f   :  { %v1792_v29 = vsel %vm476_vm1, %v8461_v27, %v6027_v28  ;;  %v8464_v27 = vld [vmem:[#allocation14_spill] sm:$0xff] }
 0x340   :  { %1171 = vrot.lane.b32.xlu1 %v4904_v1, %s4135_s15  ;;  %2546 = vmatpush.msra.mxu2 %v1560_v35  ;;  %v1857_v28 = vmul.f32 %v1792_v29, %v8464_v27 }
 0x342   :  { %v6043_v23 = vpop.permute.xlu1 %1911 }
 0x343   :  { %8459 = vst [vmem:[#allocation75_spill] sm:$0xff] %v6043_v23  ;;  %2300 = vperm.xlu0 %4107, %v2272_v22   ;;  %v1939_v16 = vsel %vm501_vm0, %v8460_v14, %v6043_v23  ;;  %v2271_v14 = vld [vmem:[%s8011_s7 + $0x20] sm:$0xff] }
 0x344   :  { %v6053_v39 = vpop.permute.xlu2 %1167  ;;  %v6055_v35 = vpop.permute.xlu0 %1479  ;;  %v1988_v56 = vmul.f32 %v1939_v16, %v8442_v55  ;;  %2487 = vmatmul.f32.gmra.mxu0 %v5760_v43 }
 0x345   :  { %8462 = vst [vmem:[#allocation123_spill] sm:$0xff] %v6055_v35  ;;  %v1507_v22 = vsel %vm426_vm3, %v8463_v44, %v6055_v35 }
 0x346   :  { %v1556_v23 = vmul.f32 %v1507_v22, %v8416_v54  ;;  %2580 = vmatpush.msra.mxu3 %v1988_v56  ;;  %v8468_v56 = vld [vmem:[#allocation135_spill] sm:$0xff] }
 0x348   :  { %2547 = vmatpush.msra.mxu2 %v1556_v23  ;;  %2295 = vperm.xlu1 %4108, %v2271_v14   ;;  %v8470_v23 = vld [vmem:[#allocation94_spill] sm:$0xff] }
 0x349   :  { %2548 = vmatmul.f32.vlgmr.msra.gmra.mxu2 %v5648_v9 }
 0x34a   :  { %2672 = vmatpush.msrb.mxu2 %v1857_v28  ;;  %v6068_v16 = vpop.permute.xlu1 %1909 }
 0x34b   :  { %8465 = vst [vmem:[#allocation117_spill] sm:$0xff] %v6068_v16  ;;  %v1938_v44 = vsel %vm501_vm0, %v8466_v21, %v6068_v16  ;;  %v2270_v21 = vld [vmem:[%s8011_s7 + $0x18] sm:$0xff]  ;;  %v8484_v16 = vld [vmem:[#allocation93_spill] sm:$0xff] }
 0x34c   :  { %v1984_v35 = vmul.f32 %v1938_v44, %v8442_v55  ;;  %v6076_v43 = vpop.permute.xlu2 %1165  ;;  %v6078_v22 = vpop.permute.xlu0 %1907  ;;  %2490 = vmatmul.f32.gmra.mxu0 %v5820_v38  ;;  %2290 = vperm.xlu2 %4106, %v2270_v21   ;;  %v8473_v21 = vld [vmem:[#allocation31_spill] sm:$0xff] }
 0x34d   :  { %8467 = vst [vmem:[#allocation128_spill] sm:$0xff] %v6078_v22  ;;  %v1937_v28 = vsel %vm501_vm0, %v8468_v56, %v6078_v22  ;;  %v8497_v38 = vld [vmem:[#allocation87_spill] sm:$0xff] }
 0x34e   :  { %v1980_v9 = vmul.f32 %v1937_v28, %v8442_v55  ;;  %2581 = vmatpush.msra.mxu3 %v1984_v35 }
 0x350   :  { %2582 = vmatpush.msra.mxu3 %v1980_v9 }
 0x351   :  { %4063 = vmatmul.msk.f32.vlgmr.msra.gmra.mxu3 %vm2303_vm9, %v5669_v12  ;;  %2551 = vmatmul.f32.gmra.mxu2 %v5716_v48  ;;  %v8471_v12 = vld [vmem:[#allocation131_spill] sm:$0xff]  ;;  %v8472_v48 = vld [vmem:[#allocation138_spill] sm:$0xff] }
 0x352   :  { %v6091_v29 = vpop.permute.xlu1 %1159  ;;  %v1195_v28 = vsel %vm372_vm5, %v8471_v12, %v6053_v39  ;;  %v8475_v12 = vld [vmem:[#allocation137_spill] sm:$0xff] }
 0x353   :  { %8469 = vst [vmem:[#allocation129_spill] sm:$0xff] %v6091_v29  ;;  %v1203_v14 = vsel %vm372_vm5, %v8470_v23, %v6091_v29 }
 0x354   :  { %v1252_v35 = vmul.f32 %v1203_v14, %v8408_v33  ;;  %v6099_v44 = vpop.permute.xlu2 %1163  ;;  %2493 = vmatmul.f32.gmra.mxu0 %v5881_v53  ;;  %v8474_v14 = vld [vmem:[#allocation134_spill] sm:$0xff]  ;;  %v1245_v33 = vmul.f32 %v1195_v28, %v8473_v21  ;;  %v8486_v53 = vld [vmem:[#allocation67_spill] sm:$0xff] }
 0x355   :  { %v6101_v56 = vpop.permute.xlu0 %1169  ;;  %v1194_v55 = vsel %vm372_vm5, %v8474_v14, %v6076_v43  ;;  %v1193_v54 = vsel %vm372_vm5, %v8475_v12, %v6099_v44 }
 0x356   :  { %v1196_v9 = vsel %vm372_vm5, %v8472_v48, %v6101_v56  ;;  %2512 = vmatpush.msra.mxu1 %v1252_v35  ;;  %v1241_v35 = vmul.f32 %v1194_v55, %v8473_v21  ;;  %v1237_v12 = vmul.f32 %v1193_v54, %v8473_v21  ;;  %v8483_v54 = vld [vmem:[#allocation33_spill] sm:$0xff] }
 0x357   :  { %v1249_v23 = vmul.f32 %v1196_v9, %v8473_v21  ;;  %2513 = vmatmul.f32.vlgmr.msra.gmra.mxu1 %v5682_v15  ;;  %v8477_v9 = vld [vmem:[#allocation108_spill] sm:$0xff]  ;;  %v8478_v15 = vld [vmem:[#allocation97_spill] sm:$0xff] }
 0x358   :  { %v1054_v28 = vsel %vm347_vm6, %v8478_v15, %v8477_v9 }
 0x359   :  { %2602 = vmatpush.msrb.mxu0 %v1249_v23  ;;  %4064 = vmatmul.msk.f32.gmra.mxu3 %vm2303_vm9, %v5738_v52  ;;  %v8479_v23 = vld [vmem:[#allocation85_spill] sm:$0xff] }
 0x35a   :  { %v6126_v48 = vpop.permute.xlu1 %1783  ;;  %2554 = vmatmul.f32.gmra.mxu2 %v5797_v47  ;;  %v8481_v47 = vld [vmem:[#allocation102_spill] sm:$0xff] }
 0x35b   :  { %8476 = vst [vmem:[#allocation122_spill] sm:$0xff] %v6126_v48  ;;  %2603 = vmatpush.msrb.mxu0 %v1245_v33  ;;  %v1791_v14 = vsel %vm476_vm1, %v8479_v23, %v6126_v48  ;;  %v1053_v29 = vsel %vm347_vm6, %v8415_v26, %v8481_v47  ;;  %v8482_v23 = vld [vmem:[#allocation25_spill] sm:$0xff]  ;;  %v8485_v48 = vld [vmem:[#allocation80_spill] sm:$0xff] }
 0x35c   :  { %v1853_v52 = vmul.f32 %v1791_v14, %v8464_v27  ;;  %v6139_v55 = vpop.permute.xlu2 %1641  ;;  %v1113_v14 = vmul.f32 %v1054_v28, %v8483_v54  ;;  %v1109_v26 = vmul.f32 %v1053_v29, %v8483_v54  ;;  %v8490_v29 = vld [vmem:[#allocation69_spill] sm:$0xff] }
 0x35d   :  { %2604 = vmatpush.msrb.mxu0 %v1241_v35  ;;  %v6141_v33 = vpop.permute.xlu0 %1489  ;;  %v1052_v35 = vsel %vm347_vm6, %v8418_v49, %v8484_v16 }
 0x35e   :  { %8480 = vst [vmem:[#allocation135_spill] sm:$0xff] %v6141_v33  ;;  %v1500_v15 = vsel %vm426_vm3, %v5604_v31, %v6141_v33  ;;  %2673 = vmatpush.msrb.mxu2 %v1853_v52  ;;  %v1051_v31 = vsel %vm347_vm6, %v8486_v53, %v8485_v48  ;;  %v1105_v49 = vmul.f32 %v1052_v35, %v8483_v54  ;;  %v6177_v52 = vpop.f32.mrf.mxu0  ;;  %v8492_v35 = vld [vmem:[#allocation58_spill] sm:$0xff]  ;;  %v8495_v33 = vld [vmem:[#allocation95_spill] sm:$0xff] }
 0x35f   :  { %v1553_v22 = vmul.f32 %v1500_v15, %v8482_v23  ;;  %2605 = vmatpush.msrb.mxu0 %v1237_v12  ;;  %2516 = vmatmul.f32.gmra.mxu1 %v5765_v10  ;;  %v8488_v10 = vld [vmem:[#allocation68_spill] sm:$0xff]  ;;  %8491 = vst [vmem:[#allocation131_spill] sm:$0xff] %v6177_v52 }
 0x360   :  { %v8489_v12 = vld [vmem:[#allocation56_spill] sm:$0xff] }
 0x361   :  { %2606 = vmatpush.msrb.mxu0 %v1113_v14  ;;  %2637 = vmatpush.msrb.mxu1 %v1553_v22  ;;  %v1050_v22 = vsel %vm347_vm6, %v8489_v12, %v8488_v10  ;;  %v8493_v12 = vld [vmem:[#allocation59_spill] sm:$0xff] }
 0x362   :  { %4065 = vmatmul.msk.f32.gmra.mxu3 %vm2303_vm9, %v5804_v32  ;;  %v6165_v28 = vpop.permute.xlu1 %1781  ;;  %2557 = vmatmul.f32.gmra.mxu2 %v5851_v63  ;;  %v1101_v63 = vmul.f32 %v1051_v31, %v8483_v54 }
 0x363   :  { %8487 = vst [vmem:[#allocation94_spill] sm:$0xff] %v6165_v28  ;;  %2607 = vmatpush.msrb.mxu0 %v1109_v26  ;;  %v1790_v53 = vsel %vm476_vm1, %v8490_v29, %v6165_v28  ;;  %v1049_v26 = vsel %vm347_vm6, %v8424_v0, %v8492_v35  ;;  %v8496_v28 = vld [vmem:[#allocation99_spill] sm:$0xff] }
 0x364   :  { %v1849_v32 = vmul.f32 %v1790_v53, %v8464_v27  ;;  %v6180_v15 = vpop.permute.xlu2 %1635  ;;  %v1097_v53 = vmul.f32 %v1050_v22, %v8483_v54  ;;  %v1093_v0 = vmul.f32 %v1049_v26, %v8483_v54 }
 0x365   :  { %2608 = vmatpush.msrb.mxu0 %v1105_v49  ;;  %v6182_v14 = vpop.permute.xlu0 %1487  ;;  %v8494_v49 = vld [vmem:[#allocation103_spill] sm:$0xff] }
 0x366   :  { %v1499_v29 = vsel %vm426_vm3, %v8493_v12, %v6182_v14  ;;  %v910_v31 = vsel %vm322_vm7, %v8495_v33, %v8494_v49  ;;  %2674 = vmatpush.msrb.mxu2 %v1849_v32  ;;  %v909_v12 = vsel %vm322_vm7, %v8497_v38, %v8496_v28  ;;  %v8498_v33 = vld [vmem:[#allocation35_spill] sm:$0xff] }
 0x367   :  { %v1549_v52 = vmul.f32 %v1499_v29, %v8482_v23  ;;  %2609 = vmatpush.msrb.mxu0 %v1101_v63  ;;  %2519 = vmatmul.f32.gmra.mxu1 %v5825_v11  ;;  %v969_v32 = vmul.f32 %v910_v31, %v8498_v33  ;;  %v8499_v11 = vld [vmem:[#allocation89_spill] sm:$0xff]  ;;  %v965_v26 = vmul.f32 %v909_v12, %v8498_v33 }
 0x368   :  { %v8500_v29 = vld [vmem:[#allocation73_spill] sm:$0xff] }
 0x369   :  { %2610 = vmatpush.msrb.mxu0 %v1097_v53  ;;  %2638 = vmatpush.msrb.mxu1 %v1549_v52  ;;  %v908_v52 = vsel %vm322_vm7, %v8428_v51, %v8499_v11  ;;  %v907_v51 = vsel %vm322_vm7, %v8429_v7, %v8500_v29  ;;  %v6237_v53 = vpop.f32.mrf.mxu1  ;;  %v6246_v7 = vpop.f32.mrf.mxu2 }
 0x36a   :  { %4066 = vmatmul.msk.f32.gmra.mxu3 %vm2303_vm9, %v5860_v42  ;;  %v6207_v22 = vpop.permute.xlu1 %1779  ;;  %2560 = vmatmul.f32.gmra.mxu2 %v5913_v61  ;;  %8502 = vst [vmem:[#allocation134_spill] sm:$0xff] %v6237_v53  ;;  %v961_v31 = vmul.f32 %v908_v52, %v8498_v33 }
 0x36b   :  { %2611 = vmatpush.msrb.mxu0 %v1093_v0  ;;  %2639 = vmatpush.msrb.mxu1 %v4946_v5  ;;  %v1789_v38 = vsel %vm476_vm1, %v5701_v41, %v6207_v22  ;;  %v6235_v41 = vpop.f32.mrf.mxu0  ;;  %v8503_v0 = vld [vmem:[#allocation64_spill] sm:$0xff]  ;;  %8504 = vst [vmem:[#allocation137_spill] sm:$0xff] %v6246_v7 }
 0x36c   :  { %v1845_v42 = vmul.f32 %v1789_v38, %v8464_v27  ;;  %v6221_v63 = vpop.permute.xlu2 %1315  ;;  %8501 = vst [vmem:[#allocation138_spill] sm:$0xff] %v6235_v41  ;;  %v906_v12 = vsel %vm322_vm7, %v8430_v24, %v8503_v0  ;;  %v6255_v38 = vpop.f32.mrf.mxu3 }
 0x36d   :  { %2612 = vmatpush.msrb.mxu0 %v969_v32  ;;  %2640 = vmatpush.msrb.mxu1 %v4904_v1  ;;  %v6224_v5 = vpop.permute.xlu0 %1777  ;;  %v8505_v32 = vld [vmem:[#allocation52_spill] sm:$0xff]  ;;  %8506 = vst [vmem:[#allocation108_spill] sm:$0xff] %v6255_v38 }
 0x36e   :  { %v1788_v61 = vsel %vm476_vm1, %v5724_v37, %v6224_v5  ;;  %2675 = vmatpush.msrb.mxu2 %v1845_v42  ;;  %v957_v37 = vmul.f32 %v907_v51, %v8498_v33  ;;  %v905_v52 = vsel %vm322_vm7, %v8432_v8, %v8505_v32  ;;  %v1648_v8 = vsel %vm451_vm2, %v5602_v59, %v6139_v55 }
 0x36f   :  { %v1841_v1 = vmul.f32 %v1788_v61, %v8464_v27  ;;  %2613 = vmatpush.msrb.mxu0 %v965_v26  ;;  %2641 = vmatpush.msrb.mxu1 %v4864_v18  ;;  %v953_v18 = vmul.f32 %v906_v12, %v8498_v33  ;;  %v949_v51 = vmul.f32 %v905_v52, %v8498_v33  ;;  %v8508_v61 = vld [vmem:[#allocation79_spill] sm:$0xff] }
 0x370   :  { %2522 = vmatmul.f32.gmra.mxu1 %v5886_v60  ;;  %v8507_v60 = vld [vmem:[#allocation84_spill] sm:$0xff] }
 0x371   :  { %2614 = vmatpush.msrb.mxu0 %v961_v31  ;;  %2642 = vmatpush.msrb.mxu1 %v4714_v57  ;;  %v1190_v42 = vsel %vm372_vm5, %v6101_v56, %v8507_v60  ;;  %v8511_v31 = vld [vmem:[#allocation70_spill] sm:$0xff] }
 0x372   :  { %2676 = vmatpush.msrb.mxu2 %v1841_v1  ;;  %v6257_v24 = vpop.permute.xlu1 %1775  ;;  %4067 = vmatmul.msk.f32.gmra.mxu3 %vm2303_vm9, %v5927_v30  ;;  %v1188_v12 = vsel %vm372_vm5, %v6076_v43, %v8511_v31  ;;  %v8520_v31 = vld [vmem:[#allocation29_spill] sm:$0xff] }
 0x373   :  { %2615 = vmatpush.msrb.mxu0 %v957_v37  ;;  %v1787_v57 = vsel %vm476_vm1, %v5771_v58, %v6257_v24  ;;  %2643 = vmatpush.msrb.mxu1 %v4674_v4  ;;  %v1189_v4 = vsel %vm372_vm5, %v6053_v39, %v8508_v61  ;;  %v6287_v58 = vpop.f32.mrf.mxu1  ;;  %v8512_v37 = vld [vmem:[#allocation17_spill] sm:$0xff]  ;;  %v6302_v39 = vpop.f32.mrf.mxu2 }
 0x374   :  { %2563 = vmatmul.f32.gmra.mxu2 %v5961_v34  ;;  %v1837_v30 = vmul.f32 %v1787_v57, %v8464_v27  ;;  %v6277_v26 = vpop.permute.xlu2 %1313  ;;  %8509 = vst [vmem:[#allocation97_spill] sm:$0xff] %v6287_v58  ;;  %v8510_v34 = vld [vmem:[#allocation32_spill] sm:$0xff]  ;;  %v1713_v52 = vmul.f32 %v1648_v8, %v8512_v37  ;;  %v8579_v58 = vld [vmem:[#allocation13_spill] sm:$0xff] }
 0x375   :  { %2616 = vmatpush.msrb.mxu0 %v953_v18  ;;  %v6279_v56 = vpop.permute.xlu0 %1639  ;;  %2644 = vmatpush.msrb.mxu1 %v8448_v2  ;;  %v1250_v59 = vmul.f32 %v1190_v42, %v8510_v34  ;;  %v6300_v2 = vpop.f32.mrf.mxu0  ;;  %8514 = vst [vmem:[#allocation102_spill] sm:$0xff] %v6302_v39  ;;  %v1246_v18 = vmul.f32 %v1189_v4, %v8510_v34  ;;  %v8663_v27 = vld [vmem:[#allocation16_spill] sm:$0xff] }
 0x376   :  { %v1647_v1 = vsel %vm451_vm2, %v5789_v25, %v6279_v56  ;;  %2677 = vmatpush.msrb.mxu2 %v1837_v30  ;;  %8513 = vst [vmem:[#allocation85_spill] sm:$0xff] %v6300_v2  ;;  %v8515_v25 = vld [vmem:[#allocation51_spill] sm:$0xff]  ;;  %v6311_v42 = vpop.f32.mrf.mxu3 }
 0x377   :  { %2617 = vmatpush.msrb.mxu0 %v949_v51  ;;  %v1187_v60 = vsel %vm372_vm5, %v6099_v44, %v8515_v25  ;;  %v1709_v43 = vmul.f32 %v1647_v1, %v8512_v37  ;;  %8516 = vst [vmem:[#allocation93_spill] sm:$0xff] %v6311_v42  ;;  %v1645_v51 = vsel %vm451_vm2, %v5654_v13, %v6180_v15  ;;  %v8522_v25 = vld [vmem:[#allocation96_spill] sm:$0xff]  ;;  %v8569_v42 = vld [vmem:[#allocation15_spill] sm:$0xff] }
 0x378   :  { %2618 = vmatmul.f32.vlgmr.msrb.gmra.mxu0 %v5573_v50  ;;  %2525 = vmatmul.f32.gmra.mxu1 %v5939_v19  ;;  %v1242_v50 = vmul.f32 %v1188_v12, %v8510_v34  ;;  %v8517_v19 = vld [vmem:[#allocation111_spill] sm:$0xff]  ;;  %v1238_v30 = vmul.f32 %v1187_v60, %v8510_v34  ;;  %v1341_v13 = vsel %vm397_vm4, %v5722_v62, %v6221_v63 }
 0x379   :  { %2742 = vmatpush.msra.mxu0 %v1250_v59  ;;  %2678 = vmatpush.msrb.mxu2 %v1713_v52  ;;  %v1048_v8 = vsel %vm347_vm6, %v8477_v9, %v8517_v19  ;;  %v8518_v9 = vld [vmem:[#allocation105_spill] sm:$0xff]  ;;  %v8521_v52 = vld [vmem:[#allocation34_spill] sm:$0xff]  ;;  %v1701_v60 = vmul.f32 %v1645_v51, %v8512_v37 }
 0x37a   :  { %v6314_v57 = vpop.permute.xlu1 %1637  ;;  %4068 = vmatmul.msk.f32.gmra.mxu3 %vm2303_vm9, %v5974_v45  ;;  %v8525_v19 = vld [vmem:[#allocation82_spill] sm:$0xff] }
 0x37b   :  { %2743 = vmatpush.msra.mxu0 %v1246_v18  ;;  %v1646_v44 = vsel %vm451_vm2, %v5827_v36, %v6314_v57  ;;  %2679 = vmatpush.msrb.mxu2 %v1709_v43  ;;  %v1047_v36 = vsel %vm347_vm6, %v8481_v47, %v8518_v9  ;;  %v6344_v1 = vpop.f32.mrf.mxu1  ;;  %v1114_v18 = vmul.f32 %v1048_v8, %v8521_v52  ;;  %v8524_v43 = vld [vmem:[#allocation63_spill] sm:$0xff] }
 0x37c   :  { %v1705_v45 = vmul.f32 %v1646_v44, %v8512_v37  ;;  %v6332_v61 = vpop.permute.xlu2 %1311  ;;  %8519 = vst [vmem:[#allocation80_spill] sm:$0xff] %v6344_v1  ;;  %v1046_v47 = vsel %vm347_vm6, %v8484_v16, %v8522_v25  ;;  %v1340_v62 = vsel %vm397_vm4, %v8524_v43, %v6277_v26  ;;  %v1045_v16 = vsel %vm347_vm6, %v8485_v48, %v8525_v19  ;;  %v8529_v9 = vld [vmem:[#allocation43_spill] sm:$0xff] }
 0x37d   :  { %2744 = vmatpush.msra.mxu0 %v1242_v50  ;;  %v6334_v4 = vpop.permute.xlu0 %1317  ;;  %v1110_v50 = vmul.f32 %v1047_v36, %v8521_v52  ;;  %v1397_v8 = vmul.f32 %v1341_v13, %v8520_v31  ;;  %v1393_v48 = vmul.f32 %v1340_v62, %v8520_v31  ;;  %v8531_v62 = vld [vmem:[#allocation78_spill] sm:$0xff] }
 0x37e   :  { %v1342_v59 = vsel %vm397_vm4, %v5843_v6, %v6334_v4  ;;  %2680 = vmatpush.msrb.mxu2 %v1705_v45  ;;  %v6358_v6 = vpop.f32.mrf.mxu2  ;;  %v6373_v44 = vpop.f32.mrf.mxu3  ;;  %v1106_v45 = vmul.f32 %v1046_v47, %v8521_v52  ;;  %v1102_v47 = vmul.f32 %v1045_v16, %v8521_v52 }
 0x37f   :  { %v1401_v12 = vmul.f32 %v1342_v59, %v8520_v31  ;;  %2745 = vmatpush.msra.mxu0 %v1238_v30  ;;  %8523 = vst [vmem:[#allocation67_spill] sm:$0xff] %v6358_v6  ;;  %v8528_v30 = vld [vmem:[#allocation83_spill] sm:$0xff]  ;;  %v8576_v6 = vld [vmem:[#allocation128_spill] sm:$0xff] }
 0x380   :  { %2621 = vmatmul.f32.gmra.mxu0 %v5628_v40  ;;  %2528 = vmatmul.f32.gmra.mxu1 %v5986_v3  ;;  %v6371_v40 = vpop.f32.mrf.mxu0  ;;  %8527 = vst [vmem:[#allocation56_spill] sm:$0xff] %v6373_v44  ;;  %v1339_v3 = vsel %vm397_vm4, %v8528_v30, %v6332_v61  ;;  %v8530_v59 = vld [vmem:[#allocation71_spill] sm:$0xff] }
 0x381   :  { %2746 = vmatpush.msra.mxu0 %v1114_v18  ;;  %2645 = vmatpush.msrb.mxu1 %v1401_v12  ;;  %8526 = vst [vmem:[#allocation68_spill] sm:$0xff] %v6371_v40  ;;  %v1044_v13 = vsel %vm347_vm6, %v8488_v10, %v8530_v59 }
 0x382   :  { %2681 = vmatpush.msrb.mxu2 %v1701_v60  ;;  %v6379_v51 = vpop.permute.xlu1 %1633  ;;  %v1389_v60 = vmul.f32 %v1339_v3, %v8520_v31 }
 0x383   :  { %2747 = vmatpush.msra.mxu0 %v1110_v50  ;;  %v1644_v36 = vsel %vm451_vm2, %v8529_v9, %v6379_v51  ;;  %2646 = vmatpush.msrb.mxu1 %v1397_v8  ;;  %v8532_v50 = vld [vmem:[#allocation61_spill] sm:$0xff]  ;;  %v6413_v30 = vpop.f32.mrf.mxu1 }
 0x384   :  { %v1697_v12 = vmul.f32 %v1644_v36, %v8512_v37  ;;  %v6392_v18 = vpop.permute.xlu2 %1309  ;;  %v1043_v19 = vsel %vm347_vm6, %v8492_v35, %v8532_v50  ;;  %8533 = vst [vmem:[#allocation69_spill] sm:$0xff] %v6413_v30  ;;  %v8536_v9 = vld [vmem:[#allocation101_spill] sm:$0xff]  ;;  %v8568_v30 = vld [vmem:[#allocation122_spill] sm:$0xff] }
 0x385   :  { %2748 = vmatpush.msra.mxu0 %v1106_v45  ;;  %v6394_v25 = vpop.permute.xlu0 %1631  ;;  %v1338_v43 = vsel %vm397_vm4, %v5903_v46, %v6392_v18  ;;  %2647 = vmatpush.msrb.mxu1 %v1393_v48  ;;  %v1098_v46 = vmul.f32 %v1044_v13, %v8521_v52  ;;  %v8535_v45 = vld [vmem:[#allocation106_spill] sm:$0xff]  ;;  %v1094_v35 = vmul.f32 %v1043_v19, %v8521_v52 }
 0x386   :  { %v1643_v10 = vsel %vm451_vm2, %v8531_v62, %v6394_v25  ;;  %v1385_v16 = vmul.f32 %v1338_v43, %v8520_v31  ;;  %2682 = vmatpush.msrb.mxu2 %v1697_v12  ;;  %v6415_v3 = vpop.f32.mrf.mxu2  ;;  %v904_v48 = vsel %vm322_vm7, %v8494_v49, %v8535_v45  ;;  %v903_v36 = vsel %vm322_vm7, %v8496_v28, %v8536_v9  ;;  %v8537_v13 = vld [vmem:[#allocation62_spill] sm:$0xff]  ;;  %v8538_v12 = vld [vmem:[#allocation36_spill] sm:$0xff]  ;;  %v8541_v43 = vld [vmem:[#allocation91_spill] sm:$0xff] }
 0x387   :  { %v1693_v8 = vmul.f32 %v1643_v10, %v8512_v37  ;;  %2749 = vmatpush.msra.mxu0 %v1102_v47  ;;  %2648 = vmatpush.msrb.mxu1 %v1389_v60  ;;  %8534 = vst [vmem:[#allocation58_spill] sm:$0xff] %v6415_v3  ;;  %v6436_v60 = vpop.f32.mrf.mxu3  ;;  %v902_v28 = vsel %vm322_vm7, %v8499_v11, %v8541_v43  ;;  %v8542_v62 = vld [vmem:[#allocation12_spill] sm:$0xff]  ;;  %v8545_v11 = vld [vmem:[#allocation77_spill] sm:$0xff] }
 0x388   :  { %2624 = vmatmul.f32.gmra.mxu0 %v5694_v20  ;;  %v970_v20 = vmul.f32 %v904_v48, %v8538_v12  ;;  %v6434_v47 = vpop.f32.mrf.mxu0  ;;  %8540 = vst [vmem:[#allocation103_spill] sm:$0xff] %v6436_v60  ;;  %v966_v48 = vmul.f32 %v903_v36, %v8538_v12 }
 0x389   :  { %2750 = vmatpush.msra.mxu0 %v1098_v46  ;;  %2649 = vmatpush.msrb.mxu1 %v1385_v16  ;;  %8539 = vst [vmem:[#allocation59_spill] sm:$0xff] %v6434_v47  ;;  %v8543_v16 = vld [vmem:[#allocation50_spill] sm:$0xff] }
 0x38a   :  { %2683 = vmatpush.msrb.mxu2 %v1693_v8  ;;  %v6427_v59 = vpop.permute.xlu1 %1929  ;;  %v8544_v46 = vld [vmem:[#allocation42_spill] sm:$0xff] }
 0x38b   :  { %2751 = vmatpush.msra.mxu0 %v1094_v35  ;;  %v1936_v49 = vsel %vm501_vm0, %v8537_v13, %v6427_v59  ;;  %v901_v35 = vsel %vm322_vm7, %v8500_v29, %v8545_v11 }
 0x38c   :  { %v2001_v10 = vmul.f32 %v1936_v49, %v8542_v62  ;;  %v6443_v50 = vpop.permute.xlu2 %1307  ;;  %v962_v49 = vmul.f32 %v902_v28, %v8538_v12  ;;  %v958_v29 = vmul.f32 %v901_v35, %v8538_v12  ;;  %v6469_v36 = vpop.f32.mrf.mxu1 }
 0x38d   :  { %v6445_v19 = vpop.permute.xlu0 %1497  ;;  %2752 = vmatpush.msra.mxu0 %v970_v20  ;;  %v1337_v8 = vsel %vm397_vm4, %v8543_v16, %v6443_v50  ;;  %v8546_v20 = vld [vmem:[#allocation66_spill] sm:$0xff]  ;;  %v8547_v16 = vld [vmem:[#allocation47_spill] sm:$0xff]  ;;  %8548 = vst [vmem:[#allocation95_spill] sm:$0xff] %v6469_v36 }
 0x38e   :  { %v1504_v45 = vsel %vm426_vm3, %v8544_v46, %v6445_v19  ;;  %v1381_v9 = vmul.f32 %v1337_v8, %v8520_v31  ;;  %2717 = vmatpush.msrb.mxu3 %v2001_v10  ;;  %v900_v43 = vsel %vm322_vm7, %v8503_v0, %v8546_v20  ;;  %v6471_v8 = vpop.f32.mrf.mxu2  ;;  %v8550_v10 = vld [vmem:[#allocation55_spill] sm:$0xff]  ;;  %v8551_v0 = vld [vmem:[#allocation126_spill] sm:$0xff] }
 0x38f   :  { %v1569_v13 = vmul.f32 %v1504_v45, %v8482_v23  ;;  %2753 = vmatpush.msra.mxu0 %v966_v48  ;;  %8549 = vst [vmem:[#allocation99_spill] sm:$0xff] %v6471_v8  ;;  %v899_v28 = vsel %vm322_vm7, %v8505_v32, %v8550_v10  ;;  %v954_v48 = vmul.f32 %v900_v43, %v8538_v12  ;;  %v8565_v8 = vld [vmem:[#allocation132_spill] sm:$0xff] }
 0x390   :  { %2627 = vmatmul.f32.gmra.mxu0 %v8547_v16  ;;  %2650 = vmatpush.msrb.mxu1 %v1381_v9  ;;  %v950_v16 = vmul.f32 %v899_v28, %v8538_v12  ;;  %v6498_v43 = vpop.f32.mrf.mxu3 }
 0x391   :  { %2754 = vmatpush.msra.mxu0 %v962_v49  ;;  %2684 = vmatpush.msrb.mxu2 %v1569_v13  ;;  %v8552_v13 = vld [vmem:[#allocation116_spill] sm:$0xff]  ;;  %v8553_v49 = vld [vmem:[#allocation38_spill] sm:$0xff]  ;;  %8554 = vst [vmem:[#allocation87_spill] sm:$0xff] %v6498_v43 }
 0x392   :  { %v6477_v46 = vpop.permute.xlu1 %1927 }
 0x393   :  { %2755 = vmatpush.msra.mxu0 %v958_v29  ;;  %v1935_v45 = vsel %vm501_vm0, %v8551_v0, %v6477_v46  ;;  %v6502_v0 = vpop.f32.mrf.mxu0 }
 0x394   :  { %v1997_v11 = vmul.f32 %v1935_v45, %v8542_v62  ;;  %v6485_v35 = vpop.permute.xlu2 %1173  ;;  %8555 = vst [vmem:[#allocation89_spill] sm:$0xff] %v6502_v0  ;;  %v8556_v45 = vld [vmem:[#allocation92_spill] sm:$0xff] }
 0x395   :  { %v6487_v9 = vpop.permute.xlu0 %1495  ;;  %2756 = vmatpush.msra.mxu0 %v954_v48  ;;  %v1198_v32 = vsel %vm372_vm5, %v8552_v13, %v6485_v35  ;;  %v6505_v48 = vpop.f32.mrf.mxu1  ;;  %v8567_v0 = vld [vmem:[#allocation88_spill] sm:$0xff] }
 0x396   :  { %v1503_v20 = vsel %vm426_vm3, %v8553_v49, %v6487_v9  ;;  %v1257_v29 = vmul.f32 %v1198_v32, %v8473_v21  ;;  %2718 = vmatpush.msrb.mxu3 %v1997_v11  ;;  %8557 = vst [vmem:[#allocation73_spill] sm:$0xff] %v6505_v48  ;;  %v8558_v49 = vld [vmem:[#allocation112_spill] sm:$0xff]  ;;  %v6510_v60 = vpop.f32.mrf.mxu2  ;;  %v8560_v11 = vld [vmem:[#allocation118_spill] sm:$0xff] }
 0x397   :  { %v1565_v10 = vmul.f32 %v1503_v20, %v8482_v23  ;;  %2757 = vmatpush.msra.mxu0 %v950_v16  ;;  %8559 = vst [vmem:[#allocation64_spill] sm:$0xff] %v6510_v60  ;;  %v8564_v48 = vld [vmem:[#allocation100_spill] sm:$0xff] }
 0x398   :  { %2630 = vmatmul.f32.gmra.mxu0 %v8556_v45  ;;  %2651 = vmatpush.msrb.mxu1 %v1257_v29  ;;  %v8562_v45 = vld [vmem:[#allocation46_spill] sm:$0xff] }
 0x399   :  { %2685 = vmatpush.msrb.mxu2 %v1565_v10  ;;  %v6520_v10 = vpop.f32.mrf.mxu3 }
 0x39a   :  { %v1926_v13 = vpop.permute.xlu1 %1925  ;;  %8561 = vst [vmem:[#allocation52_spill] sm:$0xff] %v6520_v10 }
 0x39b   :  { %v1934_v28 = vsel %vm501_vm0, %v8558_v49, %v1926_v13  ;;  %v2348_v49 = vpop.f32.mrf.mxu0 }
 0x39c   :  { %v1993_v32 = vmul.f32 %v1934_v28, %v8542_v62  ;;  %v8563_v28 = vld [vmem:[#allocation75_spill] sm:$0xff] }
 0x39d   :  { %v6513_v20 = vpop.permute.xlu0 %1493  ;;  %v2383_v60 = vpop.f32.mrf.mxu1 }
 0x39e   :  { %v1502_v16 = vsel %vm426_vm3, %v8560_v11, %v6513_v20  ;;  %2719 = vmatpush.msrb.mxu3 %v1993_v32  ;;  %v1810_v11 = vsel %vm476_vm1, %v8565_v8, %v8564_v48  ;;  %v8570_v48 = vld [vmem:[#allocation81_spill] sm:$0xff] }
 0x39f   :  { %v1561_v29 = vmul.f32 %v1502_v16, %v8482_v23  ;;  %v2418_v10 = vpop.f32.mrf.mxu2  ;;  %v1858_v8 = vmul.f32 %v1810_v11, %v8569_v42 }
 0x3a0   :  { %2633 = vmatmul.f32.gmra.mxu0 %v8562_v45 }
 0x3a1   :  { %2686 = vmatpush.msrb.mxu2 %v1561_v29  ;;  %v8566_v29 = vld [vmem:[#allocation123_spill] sm:$0xff] }
 0x3a2   :  { %v6523_v43 = vpop.permute.xlu1 %1923 }
 0x3a3   :  { %v1933_v3 = vsel %vm501_vm0, %v8563_v28, %v6523_v43  ;;  %v1809_v28 = vsel %vm476_vm1, %v8568_v30, %v8567_v0  ;;  %v2453_v30 = vpop.f32.mrf.mxu3  ;;  %v8572_v0 = vld [vmem:[#allocation72_spill] sm:$0xff] }
 0x3a4   :  { %v1989_v32 = vmul.f32 %v1933_v3, %v8542_v62  ;;  %v8571_v3 = vld [vmem:[#allocation94_spill] sm:$0xff]  ;;  %v1854_v7 = vmul.f32 %v1809_v28, %v8569_v42  ;;  %v1807_v11 = vsel %vm476_vm1, %v6207_v22, %v8572_v0  ;;  %v8573_v28 = vld [vmem:[#allocation117_spill] sm:$0xff] }
 0x3a5   :  { %v6534_v16 = vpop.permute.xlu0 %1491  ;;  %v1808_v38 = vsel %vm476_vm1, %v8571_v3, %v8570_v48  ;;  %v6566_v48 = vpop.f32.mrf.mxu0  ;;  %v8574_v3 = vld [vmem:[#allocation65_spill] sm:$0xff] }
 0x3a6   :  { %v1501_v45 = vsel %vm426_vm3, %v8566_v29, %v6534_v16  ;;  %2720 = vmatpush.msrb.mxu3 %v1989_v32  ;;  %v4109_v29 = vld [vmem:[%s8010_s4] sm:$0xff]  ;;  %v6573_v22 = vpop.permute.xlu2 %2290  ;;  %v6586_v44 = vpop.f32.mrf.mxu1 }
 0x3a7   :  { %v1557_v36 = vmul.f32 %v1501_v45, %v8482_v23  ;;  %v6563_v45 = vld [vmem:[%s8010_s4 + $0x10] sm:$0xff]  ;;  %v8575_v0 = vld [vmem:[#allocation113_spill] sm:$0xff] }
 0x3a8   :  { %2758 = vmatmul.f32.vlgmr.msra.gmra.mxu0 %v4109_v29  ;;  %v1806_v29 = vsel %vm476_vm1, %v6224_v5, %v8574_v3  ;;  %v1954_v40 = vsel %vm501_vm0, %v6427_v59, %v8575_v0  ;;  %v8577_v3 = vld [vmem:[#allocation49_spill] sm:$0xff] }
 0x3a9   :  { %2687 = vmatpush.msrb.mxu2 %v1557_v36  ;;  %v1850_v36 = vmul.f32 %v1808_v38, %v8569_v42  ;;  %v1805_v59 = vsel %vm476_vm1, %v6257_v24, %v8577_v3  ;;  %v1842_v39 = vmul.f32 %v1806_v29, %v8569_v42  ;;  %v2002_v53 = vmul.f32 %v1954_v40, %v8579_v58  ;;  %v8581_v3 = vld [vmem:[#allocation119_spill] sm:$0xff] }
 0x3aa   :  { %v6558_v32 = vpop.permute.xlu1 %1921  ;;  %2688 = vmatmul.f32.vlgmr.msrb.gmra.mxu2 %v6563_v45  ;;  %v1838_v40 = vmul.f32 %v1805_v59, %v8569_v42  ;;  %v8585_v59 = vld [vmem:[#allocation18_spill] sm:$0xff] }
 0x3ab   :  { %2812 = vmatpush.msra.mxu2 %v1858_v8  ;;  %v1932_v8 = vsel %vm501_vm0, %v8573_v28, %v6558_v32  ;;  %v1846_v28 = vmul.f32 %v1807_v11, %v8569_v42 }
 0x3ac   :  { %v1985_v38 = vmul.f32 %v1932_v8, %v8542_v62  ;;  %v8578_v8 = vld [vmem:[#allocation60_spill] sm:$0xff] }
 0x3ad   :  { %2813 = vmatpush.msra.mxu2 %v1854_v7  ;;  %v6584_v47 = vpop.permute.xlu0 %1919  ;;  %v2349_v7 = vadd.f32 %v2348_v49, %v6573_v22  ;;  %v1953_v0 = vsel %vm501_vm0, %v6477_v46, %v8578_v8  ;;  %v1952_v46 = vsel %vm501_vm0, %v1926_v13, %v8581_v3  ;;  %v8587_v3 = vld [vmem:[#allocation86_spill] sm:$0xff] }
 0x3ae   :  { %v1931_v5 = vsel %vm501_vm0, %v8576_v6, %v6584_v47  ;;  %2721 = vmatpush.msrb.mxu3 %v1985_v38  ;;  %v6605_v6 = vpop.f32.mrf.mxu2  ;;  %v1998_v38 = vmul.f32 %v1953_v0, %v8579_v58  ;;  %v1994_v0 = vmul.f32 %v1952_v46, %v8579_v58  ;;  %v2354_v46 = vpop.f32.mrf.mxu0 }
 0x3af   :  { %2814 = vmatpush.msra.mxu2 %v1850_v36  ;;  %v1981_v49 = vmul.f32 %v1931_v5, %v8542_v62  ;;  %v2384_v11 = vadd.f32 %v2383_v60, %v2349_v7  ;;  %v8580_v36 = vld [vmem:[#allocation107_spill] sm:$0xff]  ;;  %v4111_v60 = vld [vmem:[%s8010_s4 + $0x20] sm:$0xff]  ;;  %v8584_v5 = vld [vmem:[#allocation98_spill] sm:$0xff] }
 0x3b0   :  { %v1666_v24 = vsel %vm451_vm2, %v6139_v55, %v8580_v36  ;;  %2761 = vmatmul.f32.gmra.mxu0 %v4111_v60  ;;  %v8582_v7 = vld [vmem:[#allocation53_spill] sm:$0xff]  ;;  %v1665_v13 = vsel %vm451_vm2, %v6279_v56, %v8584_v5  ;;  %v6648_v36 = vpop.f32.mrf.mxu3  ;;  %v1664_v60 = vsel %vm451_vm2, %v6314_v57, %v8587_v3  ;;  %v8591_v3 = vld [vmem:[#allocation76_spill] sm:$0xff] }
 0x3b1   :  { %2815 = vmatpush.msra.mxu2 %v1846_v28  ;;  %2722 = vmatpush.msrb.mxu3 %v1981_v49  ;;  %v2419_v29 = vadd.f32 %v2418_v10, %v2384_v11  ;;  %v8583_v28 = vld [vmem:[#allocation135_spill] sm:$0xff]  ;;  %v6632_v10 = vld [vmem:[%s8010_s4 + $0x18] sm:$0xff]  ;;  %v1714_v56 = vmul.f32 %v1666_v24, %v8585_v59  ;;  %v8586_v49 = vld [vmem:[#allocation129_spill] sm:$0xff]  ;;  %v1710_v5 = vmul.f32 %v1665_v13, %v8585_v59 }
 0x3b2   :  { %v1518_v55 = vsel %vm426_vm3, %v8583_v28, %v8582_v7  ;;  %v6627_v8 = vpop.permute.xlu1 %1171  ;;  %4069 = vmatmul.msk.f32.vlgmr.msrb.gmra.mxu3 %vm2303_vm9, %v6632_v10  ;;  %v8588_v7 = vld [vmem:[#allocation124_spill] sm:$0xff]  ;;  %v1706_v13 = vmul.f32 %v1664_v60, %v8585_v59 }
 0x3b3   :  { %2816 = vmatpush.msra.mxu2 %v1842_v39  ;;  %2857 = vmatpush.msra.mxu3 %v2002_v53  ;;  %v6639_v53 = vld [vmem:[%s8010_s4 + $0x30] sm:$0xff]  ;;  %v2454_v39 = vadd.f32 %v2453_v30, %v2419_v29  ;;  %v1197_v11 = vsel %vm372_vm5, %v8586_v49, %v6627_v8  ;;  %v1951_v30 = vsel %vm501_vm0, %v6523_v43, %v8588_v7  ;;  %v8590_v49 = vld [vmem:[#allocation26_spill] sm:$0xff]  ;;  %v8664_v62 = vld [vmem:[#allocation20_spill] sm:$0xff] }
 0x3b4   :  { %2691 = vmatmul.f32.gmra.mxu2 %v6639_v53  ;;  %v1253_v24 = vmul.f32 %v1197_v11, %v8473_v21  ;;  %v1554_v43 = vmul.f32 %v1518_v55, %v8590_v49  ;;  %v8592_v11 = vld [vmem:[#allocation130_spill] sm:$0xff] }
 0x3b5   :  { %2817 = vmatpush.msra.mxu2 %v1838_v40  ;;  %2858 = vmatpush.msra.mxu3 %v1998_v38  ;;  %v6659_v29 = vmax.f32 %v2454_v39, 0.0  ;;  %v6661_v28 = vpop.permute.xlu0 %2300  ;;  %v8589_v40 = vld [vmem:[#allocation44_spill] sm:$0xff]  ;;  %v1663_v39 = vsel %vm451_vm2, %v6180_v15, %v8591_v3  ;;  %v1950_v7 = vsel %vm501_vm0, %v6558_v32, %v8592_v11  ;;  %v6685_v55 = vld [vmem:[%s8010_s4 + $0x8] sm:$0xff] }
 0x3b6   :  { %v1517_v38 = vsel %vm426_vm3, %v6182_v14, %v8589_v40  ;;  %v2355_v57 = vadd.f32 %v2354_v46, %v6661_v28  ;;  %2652 = vmatpush.msrb.mxu1 %v1253_v24  ;;  %v2389_v14 = vpop.f32.mrf.mxu1  ;;  %v8594_v46 = vld [vmem:[#allocation125_spill] sm:$0xff]  ;;  %v1702_v40 = vmul.f32 %v1663_v39, %v8585_v59 }
 0x3b7   :  { %2818 = vmatpush.msra.mxu2 %v1714_v56  ;;  %2859 = vmatpush.msra.mxu3 %v1994_v0  ;;  %v1990_v56 = vmul.f32 %v1951_v30, %v8579_v58  ;;  %v1550_v32 = vmul.f32 %v1517_v38, %v8590_v49  ;;  %v8593_v0 = vld [vmem:[#allocation57_spill] sm:$0xff]  ;;  %v1949_v60 = vsel %vm501_vm0, %v6584_v47, %v8594_v46  ;;  %v6709_v47 = vld [vmem:[%s8010_s4 + $0x38] sm:$0xff] }
 0x3b8   :  { %3062 = vrot.lane.b32.xlu1 %v6659_v29, %s4135_s15  ;;  %2653 = vmatmul.f32.vlgmr.msrb.gmra.mxu1 %v6685_v55  ;;  %v2390_v15 = vadd.f32 %v2389_v14, %v2355_v57  ;;  %v1662_v24 = vsel %vm451_vm2, %v6379_v51, %v8593_v0  ;;  %v4115_v30 = vld [vmem:[%s8010_s4 + $0x40] sm:$0xff]  ;;  %v1986_v38 = vmul.f32 %v1950_v7, %v8579_v58  ;;  %v8595_v57 = vld [vmem:[#allocation104_spill] sm:$0xff]  ;;  %v8598_v0 = vld [vmem:[#allocation114_spill] sm:$0xff] }
 0x3b9   :  { %2819 = vmatpush.msra.mxu2 %v1710_v5  ;;  %2764 = vmatmul.f32.gmra.mxu0 %v4115_v30  ;;  %v2424_v5 = vpop.f32.mrf.mxu2  ;;  %v1661_v51 = vsel %vm451_vm2, %v6394_v25, %v8595_v57  ;;  %v1698_v39 = vmul.f32 %v1662_v24, %v8585_v59  ;;  %v1982_v11 = vmul.f32 %v1949_v60, %v8579_v58  ;;  %v8596_v7 = vld [vmem:[#allocation109_spill] sm:$0xff]  ;;  %v8599_v24 = vld [vmem:[#allocation54_spill] sm:$0xff] }
 0x3ba   :  { %2777 = vmatpush.msra.mxu1 %v1554_v43  ;;  %2860 = vmatpush.msra.mxu3 %v1990_v56  ;;  %v6713_v43 = vpop.permute.xlu1 %2295  ;;  %v2425_v3 = vadd.f32 %v2424_v5, %v2390_v15  ;;  %v1522_v14 = vsel %vm426_vm3, %v6445_v19, %v8596_v7  ;;  %v6727_v56 = vld [vmem:[%s8010_s4 + $0x50] sm:$0xff]  ;;  %v1694_v15 = vmul.f32 %v1661_v51, %v8585_v59  ;;  %v6743_v30 = vld [vmem:[%s8010_s4 + $0x28] sm:$0xff]  ;;  %v8601_v5 = vld [vmem:[#allocation45_spill] sm:$0xff] }
 0x3bb   :  { %2820 = vmatpush.msra.mxu2 %v1706_v13  ;;  %4070 = vmatmul.msk.f32.gmra.mxu3 %vm2303_vm9, %v6709_v47  ;;  %v2352_v25 = vadd.f32 %v6566_v48, %v6713_v43  ;;  %v8597_v13 = vld [vmem:[#allocation74_spill] sm:$0xff]  ;;  %v1521_v19 = vsel %vm426_vm3, %v6487_v9, %v8598_v0  ;;  %v1570_v60 = vmul.f32 %v1522_v14, %v8590_v49  ;;  %v8605_v14 = vld [vmem:[#allocation39_spill] sm:$0xff] }
 0x3bc   :  { %2778 = vmatpush.msra.mxu1 %v1550_v32  ;;  %2861 = vmatpush.msra.mxu3 %v1986_v38  ;;  %v2459_v32 = vpop.f32.mrf.mxu3  ;;  %v4119_v38 = vld [vmem:[%s8010_s4 + $0x60] sm:$0xff]  ;;  %v1566_v57 = vmul.f32 %v1521_v19, %v8590_v49 }
 0x3bd   :  { %2821 = vmatpush.msra.mxu2 %v1702_v40  ;;  %v2387_v48 = vadd.f32 %v6586_v44, %v2352_v25  ;;  %v2460_v46 = vadd.f32 %v2459_v32, %v2425_v3  ;;  %3218 = vrot.lane.b32.xlu2 %v6659_v29, %s4139_s18  ;;  %v8600_v40 = vld [vmem:[#allocation48_spill] sm:$0xff]  ;;  %v8603_v3 = vld [vmem:[#allocation41_spill] sm:$0xff] }
 0x3be   :  { %2779 = vmatpush.msra.mxu1 %v8597_v13  ;;  %2694 = vmatmul.f32.gmra.mxu2 %v6727_v56  ;;  %v1520_v9 = vsel %vm426_vm3, %v6513_v20, %v8600_v40  ;;  %v6784_v13 = vld [vmem:[%s8010_s4 + $0x70] sm:$0xff]  ;;  %v8608_v19 = vld [vmem:[#allocation37_spill] sm:$0xff] }
 0x3bf   :  { %2862 = vmatpush.msra.mxu3 %v1982_v11  ;;  %2822 = vmatpush.msra.mxu2 %v1698_v39  ;;  %v2422_v44 = vadd.f32 %v6605_v6, %v2387_v48  ;;  %v8602_v6 = vld [vmem:[#allocation120_spill] sm:$0xff]  ;;  %v6771_v11 = vmax.f32 %v2460_v46, 0.0  ;;  %v1562_v7 = vmul.f32 %v1520_v9, %v8590_v49  ;;  %v8607_v48 = vld [vmem:[#allocation30_spill] sm:$0xff]  ;;  %v4123_v40 = vld [vmem:[%s8010_s4 + $0x80] sm:$0xff] }
 0x3c0   :  { %2780 = vmatpush.msra.mxu1 %v8599_v24  ;;  %3134 = vrot.lane.b32.xlu0 %v6659_v29, %s4140_s19  ;;  %v1519_v20 = vsel %vm426_vm3, %v6534_v16, %v8602_v6  ;;  %v6767_v39 = vld [vmem:[%s8010_s4 + $0x58] sm:$0xff]  ;;  %v8609_v24 = vld [vmem:[#allocation115_spill] sm:$0xff] }
 0x3c1   :  { %2656 = vmatmul.f32.gmra.mxu1 %v6743_v30  ;;  %2823 = vmatpush.msra.mxu2 %v1694_v15  ;;  %v2457_v51 = vadd.f32 %v6648_v36, %v2422_v44  ;;  %v8604_v36 = vld [vmem:[#allocation110_spill] sm:$0xff]  ;;  %v1334_v46 = vsel %vm397_vm4, %v6277_v26, %v8609_v24  ;;  %v8611_v9 = vld [vmem:[#allocation40_spill] sm:$0xff]  ;;  %v6836_v6 = vld [vmem:[%s8010_s4 + $0x90] sm:$0xff] }
 0x3c2   :  { %2767 = vmatmul.f32.gmra.mxu0 %v4119_v38  ;;  %2781 = vmatpush.msra.mxu1 %v8601_v5  ;;  %v1336_v25 = vsel %vm397_vm4, %v6334_v4, %v8604_v36  ;;  %v8606_v15 = vld [vmem:[#allocation90_spill] sm:$0xff]  ;;  %v1558_v4 = vmul.f32 %v1519_v20, %v8590_v49  ;;  %v1333_v26 = vsel %vm397_vm4, %v6332_v61, %v8611_v9  ;;  %v6824_v5 = vld [vmem:[%s8010_s4 + $0x78] sm:$0xff]  ;;  %v8613_v20 = vld [vmem:[#allocation127_spill] sm:$0xff] }
 0x3c3   :  { %2824 = vmatpush.msra.mxu2 %v1570_v60  ;;  %4071 = vmatmul.msk.f32.gmra.mxu3 %vm2303_vm9, %v6767_v39  ;;  %v6778_v16 = vmax.f32 %v2457_v51, 0.0  ;;  %v1335_v32 = vsel %vm397_vm4, %v6221_v63, %v8606_v15  ;;  %v1402_v0 = vmul.f32 %v1336_v25, %v8607_v48  ;;  %v6802_v60 = vpop.f32.mrf.mxu0  ;;  %v6807_v63 = vld [vmem:[%s8010_s4 + $0x48] sm:$0xff]  ;;  %v1394_v38 = vmul.f32 %v1334_v46, %v8607_v48  ;;  %v8615_v25 = vld [vmem:[#allocation133_spill] sm:$0xff] }
 0x3c4   :  { %2782 = vmatpush.msra.mxu1 %v8603_v3  ;;  %8610 = vst [vmem:[#allocation84_spill] sm:$0xff] %v6802_v60  ;;  %v1398_v44 = vmul.f32 %v1335_v32, %v8607_v48  ;;  %v1390_v61 = vmul.f32 %v1333_v26, %v8607_v48  ;;  %v1331_v3 = vsel %vm397_vm4, %v6443_v50, %v8613_v20  ;;  %v6857_v50 = vld [vmem:[%s8010_s4 + $0x68] sm:$0xff]  ;;  %v4127_v15 = vld [vmem:[%s8010_s4 + $0xa0] sm:$0xff]  ;;  %v8616_v32 = vld [vmem:[#allocation136_spill] sm:$0xff] }
 0x3c5   :  { %2825 = vmatpush.msra.mxu2 %v1566_v57  ;;  %3136 = vrot.lane.b32.xlu1 %v6778_v16, %s4140_s19  ;;  %v8612_v57 = vld [vmem:[#allocation121_spill] sm:$0xff]  ;;  %v4130_v9 = vld [vmem:[%s8010_s4 + $0x88] sm:$0xff]  ;;  %v4131_v26 = vld [vmem:[%s8010_s4 + $0xb8] sm:$0xff] }
 0x3c6   :  { %2783 = vmatpush.msra.mxu1 %v8605_v14  ;;  %2697 = vmatmul.f32.gmra.mxu2 %v6784_v13  ;;  %v1332_v51 = vsel %vm397_vm4, %v6392_v18, %v8612_v57  ;;  %v1382_v14 = vmul.f32 %v1331_v3, %v8607_v48 }
 0x3c7   :  { %2826 = vmatpush.msra.mxu2 %v1562_v7  ;;  %3138 = vrot.lane.b32.xlu2 %v6771_v11, %s4140_s19  ;;  %v1386_v18 = vmul.f32 %v1332_v51, %v8607_v48  ;;  %v1192_v7 = vsel %vm372_vm5, %v6485_v35, %v8615_v25  ;;  %v1191_v35 = vsel %vm372_vm5, %v6627_v8, %v8616_v32 }
 0x3c8   :  { %2784 = vmatpush.msra.mxu1 %v8608_v19  ;;  %3064 = vrot.lane.b32.xlu0 %v6778_v16, %s4135_s15  ;;  %v6876_v19 = vld [vmem:[%s8010_s4 + $0x98] sm:$0xff]  ;;  %v1254_v24 = vmul.f32 %v1191_v35, %v8510_v34 }
 0x3c9   :  { %2659 = vmatmul.f32.gmra.mxu1 %v6807_v63  ;;  %2827 = vmatpush.msra.mxu2 %v1558_v4 }
 0x3ca   :  { %2770 = vmatmul.f32.gmra.mxu0 %v4123_v40  ;;  %2785 = vmatpush.msra.mxu1 %v1402_v0  ;;  %v1258_v0 = vmul.f32 %v1192_v7, %v8510_v34 }
 0x3cb   :  { %4072 = vmatmul.msk.f32.gmra.mxu3 %vm2303_vm9, %v6824_v5  ;;  %v6868_v4 = vpop.f32.mrf.mxu0 }
 0x3cc   :  { %2786 = vmatpush.msra.mxu1 %v1398_v44  ;;  %v6843_v36 = vpop.f32.mrf.mxu2  ;;  %8617 = vst [vmem:[#allocation32_spill] sm:$0xff] %v6868_v4  ;;  %v4129_v44 = vld [vmem:[%s8010_s4 + $0xb0] sm:$0xff] }
 0x3cd   :  { %8614 = vst [vmem:[#allocation79_spill] sm:$0xff] %v6843_v36  ;;  %2992 = vrot.lane.b32.xlu1 %v6778_v16, %s4134_s10 }
 0x3ce   :  { %2787 = vmatpush.msra.mxu1 %v1394_v38  ;;  %2700 = vmatmul.f32.gmra.mxu2 %v6836_v6 }
 0x3cf   :  { %3066 = vrot.lane.b32.xlu2 %v6771_v11, %s4135_s15 }
 0x3d0   :  { %2788 = vmatpush.msra.mxu1 %v1390_v61  ;;  %2990 = vrot.lane.b32.xlu0 %v6659_v29, %s4134_s10  ;;  %v4132_v61 = vld [vmem:[%s8010_s4 + $0xa8] sm:$0xff] }
 0x3d1   :  { %2662 = vmatmul.f32.gmra.mxu1 %v6857_v50 }
 0x3d2   :  { %2773 = vmatmul.f32.gmra.mxu0 %v4127_v15  ;;  %2789 = vmatpush.msra.mxu1 %v1386_v18 }
 0x3d3   :  { %4073 = vmatmul.msk.f32.gmra.mxu3 %vm2303_vm9, %v6876_v19  ;;  %v6903_v38 = vpop.f32.mrf.mxu0 }
 0x3d4   :  { %2790 = vmatpush.msra.mxu1 %v1382_v14  ;;  %v6881_v8 = vpop.f32.mrf.mxu1  ;;  %v6883_v46 = vpop.f32.mrf.mxu3  ;;  %8621 = vst [vmem:[#allocation105_spill] sm:$0xff] %v6903_v38 }
 0x3d5   :  { %8618 = vst [vmem:[#allocation70_spill] sm:$0xff] %v6881_v8  ;;  %v6888_v40 = vpop.f32.mrf.mxu2  ;;  %2922 = vrot.lane.b32.xlu1 %v6771_v11, %s4133_s9 }
 0x3d6   :  { %2791 = vmatpush.msra.mxu1 %v1258_v0  ;;  %8619 = vst [vmem:[#allocation51_spill] sm:$0xff] %v6883_v46  ;;  %2703 = vmatmul.f32.gmra.mxu2 %v4129_v44 }
 0x3d7   :  { %8620 = vst [vmem:[#allocation111_spill] sm:$0xff] %v6888_v40  ;;  %2994 = vrot.lane.b32.xlu2 %v6771_v11, %s4134_s10 }
 0x3d8   :  { %2792 = vmatpush.msra.mxu1 %v1254_v24  ;;  %3438 = vrot.lane.b32.xlu0 %v6771_v11, %s4136_s0 }
 0x3d9   :  { %2665 = vmatmul.f32.gmra.mxu1 %v4130_v9 }
 0x3db   :  { %4074 = vmatmul.msk.f32.gmra.mxu3 %vm2303_vm9, %v4131_v26  ;;  %v2488_v25 = vpop.f32.mrf.mxu0 }
 0x3dc   :  { %v6905_v57 = vpop.f32.mrf.mxu1  ;;  %v6907_v51 = vpop.f32.mrf.mxu3  ;;  %v2489_v7 = vadd.f32 %v2488_v25, %v6573_v22 }
 0x3dd   :  { %8622 = vst [vmem:[#allocation96_spill] sm:$0xff] %v6905_v57  ;;  %v6913_v20 = vpop.f32.mrf.mxu2 }
 0x3de   :  { %8623 = vst [vmem:[#allocation63_spill] sm:$0xff] %v6907_v51  ;;  %2828 = vmatmul.f32.vlgmr.msra.gmra.mxu2 %v6563_v45 }
 0x3df   :  { %8624 = vst [vmem:[#allocation82_spill] sm:$0xff] %v6913_v20 }
 0x3e1   :  { %2668 = vmatmul.f32.gmra.mxu1 %v4132_v61 }
 0x3e3   :  { %4075 = vmatmul.msk.f32.vlgmr.msra.gmra.mxu3 %vm2303_vm9, %v6632_v10  ;;  %v2491_v32 = vpop.f32.mrf.mxu0 }
 0x3e4   :  { %v6917_v3 = vpop.f32.mrf.mxu1 }
 0x3e5   :  { %8625 = vst [vmem:[#allocation83_spill] sm:$0xff] %v6917_v3  ;;  %v6919_v18 = vpop.f32.mrf.mxu3  ;;  %v2558_v45 = vpop.f32.mrf.mxu2 }
 0x3e6   :  { %8626 = vst [vmem:[#allocation43_spill] sm:$0xff] %v6919_v18  ;;  %2831 = vmatmul.f32.gmra.mxu2 %v6639_v53 }
 0x3e9   :  { %2793 = vmatmul.f32.vlgmr.msra.gmra.mxu1 %v6685_v55 }
 0x3eb   :  { %4076 = vmatmul.msk.f32.gmra.mxu3 %vm2303_vm9, %v6709_v47 }
 0x3ed   :  { %v2593_v14 = vpop.f32.mrf.mxu3  ;;  %v2523_v15 = vpop.f32.mrf.mxu1 }
 0x3ee   :  { %2834 = vmatmul.f32.gmra.mxu2 %v6727_v56  ;;  %v2524_v10 = vadd.f32 %v2523_v15, %v2489_v7  ;;  %v2561_v53 = vpop.f32.mrf.mxu2  ;;  %v2494_v56 = vpop.f32.mrf.mxu0 }
 0x3f0   :  { %v2559_v35 = vadd.f32 %v2558_v45, %v2524_v10 }
 0x3f1   :  { %2796 = vmatmul.f32.gmra.mxu1 %v6743_v30  ;;  %v2492_v30 = vadd.f32 %v2491_v32, %v6713_v43 }
 0x3f2   :  { %v2594_v0 = vadd.f32 %v2593_v14, %v2559_v35 }
 0x3f3   :  { %4077 = vmatmul.msk.f32.gmra.mxu3 %vm2303_vm9, %v6767_v39  ;;  %v2495_v39 = vadd.f32 %v2494_v56, %v6661_v28 }
 0x3f4   :  { %v6930_v55 = vmax.f32 %v2594_v0, 0.0 }
 0x3f5   :  { %v2526_v24 = vpop.f32.mrf.mxu1  ;;  %v2596_v47 = vpop.f32.mrf.mxu3 }
 0x3f6   :  { %2837 = vmatmul.f32.gmra.mxu2 %v6784_v13  ;;  %3140 = vrot.lane.b32.xlu1 %v6930_v55, %s4140_s19  ;;  %v2527_v45 = vadd.f32 %v2526_v24, %v2492_v30 }
 0x3f7   :  { %3224 = vrot.lane.b32.xlu2 %v6930_v55, %s4139_s18  ;;  %v2564_v25 = vpop.f32.mrf.mxu2 }
 0x3f8   :  { %v2562_v15 = vadd.f32 %v2561_v53, %v2527_v45 }
 0x3f9   :  { %2799 = vmatmul.f32.gmra.mxu1 %v6807_v63 }
 0x3fb   :  { %4078 = vmatmul.msk.f32.gmra.mxu3 %vm2303_vm9, %v6824_v5 }
 0x3fd   :  { %v2529_v13 = vpop.f32.mrf.mxu1  ;;  %v2599_v63 = vpop.f32.mrf.mxu3 }
 0x3fe   :  { %2840 = vmatmul.f32.gmra.mxu2 %v6836_v6  ;;  %v2530_v7 = vadd.f32 %v2529_v13, %v2495_v39  ;;  %3368 = vrot.lane.b32.xlu1 %v6930_v55, %s4137_s16  ;;  %v2597_v6 = vadd.f32 %v2596_v47, %v2562_v15 }
 0x3ff   :  { %3440 = vrot.lane.b32.xlu2 %v6930_v55, %s4136_s0 }
 0x400   :  { %v2565_v14 = vadd.f32 %v2564_v25, %v2530_v7 }
 0x401   :  { %2802 = vmatmul.f32.gmra.mxu1 %v6857_v50  ;;  %v6958_v50 = vmax.f32 %v2597_v6, 0.0 }
 0x402   :  { %v2600_v10 = vadd.f32 %v2599_v63, %v2565_v14 }
 0x403   :  { %4079 = vmatmul.msk.f32.gmra.mxu3 %vm2303_vm9, %v6876_v19  ;;  %v6973_v19 = vpop.f32.mrf.mxu0 }
 0x404   :  { %v6950_v5 = vmax.f32 %v2600_v10, 0.0  ;;  %8627 = vst [vmem:[#allocation71_spill] sm:$0xff] %v6973_v19 }
 0x406   :  { %2843 = vmatmul.f32.gmra.mxu2 %v4129_v44  ;;  %2996 = vrot.lane.b32.xlu1 %v6930_v55, %s4134_s10 }
 0x407   :  { %3144 = vrot.lane.b32.xlu0 %v6950_v5, %s4140_s19  ;;  %3068 = vrot.lane.b32.xlu2 %v6930_v55, %s4135_s15 }
 0x409   :  { %2805 = vmatmul.f32.gmra.mxu1 %v4130_v9 }
 0x40b   :  { %4080 = vmatmul.msk.f32.gmra.mxu3 %vm2303_vm9, %v4131_v26  ;;  %v6981_v44 = vpop.f32.mrf.mxu0 }
 0x40c   :  { %8628 = vst [vmem:[#allocation78_spill] sm:$0xff] %v6981_v44 }
 0x40e   :  { %3442 = vrot.lane.b32.xlu1 %v6958_v50, %s4136_s0 }
 0x40f   :  { %3444 = vrot.lane.b32.xlu0 %v6950_v5, %s4136_s0  ;;  %3142 = vrot.lane.b32.xlu2 %v6958_v50, %s4140_s19 }
 0x411   :  { %2808 = vmatmul.f32.gmra.mxu1 %v4132_v61 }
 0x413   :  { %v6993_v61 = vpop.f32.mrf.mxu0 }
 0x414   :  { %8630 = vst [vmem:[#allocation106_spill] sm:$0xff] %v6993_v61 }
 0x416   :  { %3070 = vrot.lane.b32.xlu1 %v6958_v50, %s4135_s15 }
 0x417   :  { %3072 = vrot.lane.b32.xlu0 %v6950_v5, %s4135_s15  ;;  %3370 = vrot.lane.b32.xlu2 %v6958_v50, %s4137_s16  ;;  %v6989_v9 = vpop.permute.xlu2 %3218 }
 0x41b   :  { %v2628_v24 = vpop.f32.mrf.mxu0 }
 0x41c   :  { %v2629_v15 = vadd.f32 %v2628_v24, %v6573_v22 }
 0x41e   :  { %3300 = vrot.lane.b32.xlu1 %v6950_v5, %s4138_s17 }
 0x41f   :  { %3372 = vrot.lane.b32.xlu0 %v6950_v5, %s4137_s16  ;;  %2998 = vrot.lane.b32.xlu2 %v6958_v50, %s4134_s10 }
 0x421   :  { %v7001_v32 = vpop.permute.xlu2 %3138 }
 0x423   :  { %v2631_v13 = vpop.f32.mrf.mxu0 }
 0x424   :  { %v2632_v24 = vadd.f32 %v2631_v13, %v6713_v43 }
 0x426   :  { %3298 = vrot.lane.b32.xlu1 %v6958_v50, %s4138_s17 }
 0x427   :  { %3000 = vrot.lane.b32.xlu0 %v6950_v5, %s4134_s10  ;;  %2928 = vrot.lane.b32.xlu2 %v6950_v5, %s4133_s9 }
 0x429   :  { %v7015_v56 = vpop.permute.xlu2 %3066 }
 0x42a   :  { %v7027_v63 = vpop.permute.xlu1 %3062 }
 0x42b   :  { %v2634_v10 = vpop.f32.mrf.mxu0 }
 0x42d   :  { %v6991_v26 = vpop.f32.mrf.mxu2 }
 0x42e   :  { %8629 = vst [vmem:[#allocation61_spill] sm:$0xff] %v6991_v26  ;;  %2920 = vrot.lane.b32.xlu1 %v6778_v16, %s4133_s9 }
 0x42f   :  { %3436 = vrot.lane.b32.xlu0 %v6778_v16, %s4136_s0  ;;  %2926 = vrot.lane.b32.xlu2 %v6958_v50, %s4133_s9 }
 0x431   :  { %v7025_v7 = vpop.permute.xlu2 %2994 }
 0x435   :  { %v7003_v35 = vpop.f32.mrf.mxu1  ;;  %v7005_v0 = vpop.f32.mrf.mxu3 }
 0x436   :  { %8631 = vst [vmem:[#allocation101_spill] sm:$0xff] %v7003_v35  ;;  %3296 = vrot.lane.b32.xlu1 %v6930_v55, %s4138_s17 }
 0x437   :  { %8632 = vst [vmem:[#allocation62_spill] sm:$0xff] %v7005_v0  ;;  %3434 = vrot.lane.b32.xlu0 %v6659_v29, %s4136_s0  ;;  %v7011_v53 = vpop.f32.mrf.mxu2  ;;  %v7032_v18 = vpop.permute.xlu1 %3136 }
 0x438   :  { %8633 = vst [vmem:[#allocation91_spill] sm:$0xff] %v7011_v53  ;;  %v7039_v53 = vpop.permute.xlu0 %3134 }
 0x43e   :  { %v7013_v47 = vpop.f32.mrf.mxu1  ;;  %v7017_v30 = vpop.f32.mrf.mxu3 }
 0x43f   :  { %8634 = vst [vmem:[#allocation50_spill] sm:$0xff] %v7013_v47  ;;  %v7056_v13 = vpop.permute.xlu1 %2992 }
 0x440   :  { %8635 = vst [vmem:[#allocation42_spill] sm:$0xff] %v7017_v30 }
 0x441   :  { %v7019_v39 = vpop.f32.mrf.mxu2 }
 0x442   :  { %8636 = vst [vmem:[#allocation77_spill] sm:$0xff] %v7019_v39  ;;  %v8639_v39 = vld [vmem:[#allocation11_spill] sm:$0xff] }
 0x446   :  { %v7021_v25 = vpop.f32.mrf.mxu1  ;;  %v7023_v45 = vpop.f32.mrf.mxu3 }
 0x447   :  { %8637 = vst [vmem:[#allocation66_spill] sm:$0xff] %v7021_v25  ;;  %v7048_v25 = vpop.f32.mrf.mxu0  ;;  %v7074_v61 = vpop.permute.xlu1 %2922 }
 0x448   :  { %8638 = vst [vmem:[#allocation47_spill] sm:$0xff] %v7023_v45 }
 0x449   :  { %v2698_v14 = vpop.f32.mrf.mxu2  ;;  %8640 = vst [vmem:[#allocation55_spill] sm:$0xff] %v7048_v25 }
 0x44e   :  { %v2663_v6 = vpop.f32.mrf.mxu1  ;;  %v2733_v46 = vpop.f32.mrf.mxu3 }
 0x44f   :  { %v2664_v0 = vadd.f32 %v2663_v6, %v2629_v15 }
 0x451   :  { %v2699_v26 = vadd.f32 %v2698_v14, %v2664_v0  ;;  %v2701_v30 = vpop.f32.mrf.mxu2  ;;  %v7030_v51 = vpop.permute.xlu2 %3224 }
 0x452   :  { %v3248_v45 = vsel %vm426_vm3, %v6989_v9, %v7030_v51 }
 0x453   :  { %v2734_v36 = vadd.f32 %v2733_v46, %v2699_v26  ;;  %v3266_v20 = vmul.f32 %v3248_v45, %v8639_v39  ;;  %v2635_v26 = vadd.f32 %v2634_v10, %v6661_v28 }
 0x455   :  { %v7042_v15 = vmax.f32 %v2734_v36, 0.0  ;;  %3648 = vmatpush.msrb.mxu0 %v3266_v20 }
 0x456   :  { %v2666_v0 = vpop.f32.mrf.mxu1  ;;  %v2736_v6 = vpop.f32.mrf.mxu3 }
 0x457   :  { %v2667_v14 = vadd.f32 %v2666_v0, %v2632_v24  ;;  %3230 = vrot.lane.b32.xlu1 %v7042_v15, %s4139_s18  ;;  %3446 = vrot.lane.b32.xlu0 %v7042_v15, %s4136_s0  ;;  %v7060_v0 = vpop.permute.xlu0 %3064 }
 0x458   :  { %3374 = vrot.lane.b32.xlu2 %v7042_v15, %s4137_s16  ;;  %3649 = vmatpush.msrb.mxu0 %v6771_v11 }
 0x459   :  { %v2702_v46 = vadd.f32 %v2701_v30, %v2667_v14  ;;  %v2704_v36 = vpop.f32.mrf.mxu2 }
 0x45a   :  { %3650 = vmatpush.msrb.mxu0 %v6778_v16 }
 0x45b   :  { %v2737_v20 = vadd.f32 %v2736_v6, %v2702_v46  ;;  %v7068_v46 = vpop.f32.mrf.mxu0 }
 0x45c   :  { %3651 = vmatpush.msrb.mxu0 %v6659_v29  ;;  %8642 = vst [vmem:[#allocation116_spill] sm:$0xff] %v7068_v46 }
 0x45d   :  { %v7058_v45 = vmax.f32 %v2737_v20, 0.0 }
 0x45e   :  { %v2669_v24 = vpop.f32.mrf.mxu1  ;;  %v2739_v30 = vpop.f32.mrf.mxu3 }
 0x45f   :  { %v2670_v3 = vadd.f32 %v2669_v24, %v2635_v26  ;;  %3376 = vrot.lane.b32.xlu0 %v7058_v45, %s4137_s16 }
 0x460   :  { %3302 = vrot.lane.b32.xlu2 %v7042_v15, %s4138_s17 }
 0x461   :  { %v2705_v14 = vadd.f32 %v2704_v36, %v2670_v3  ;;  %v7066_v6 = vpop.f32.mrf.mxu2  ;;  %v7084_v3 = vpop.permute.xlu0 %2990 }
 0x462   :  { %8641 = vst [vmem:[#allocation126_spill] sm:$0xff] %v7066_v6 }
 0x463   :  { %v2740_v10 = vadd.f32 %v2739_v30, %v2705_v14  ;;  %v7088_v24 = vpop.f32.mrf.mxu0  ;;  %v7090_v30 = vpop.permute.xlu2 %3440 }
 0x464   :  { %8646 = vst [vmem:[#allocation118_spill] sm:$0xff] %v7088_v24 }
 0x465   :  { %v7070_v40 = vmax.f32 %v2740_v10, 0.0 }
 0x466   :  { %v7072_v20 = vpop.f32.mrf.mxu1  ;;  %v7080_v26 = vpop.f32.mrf.mxu3 }
 0x467   :  { %8643 = vst [vmem:[#allocation38_spill] sm:$0xff] %v7072_v20  ;;  %3450 = vrot.lane.b32.xlu1 %v7070_v40, %s4136_s0  ;;  %3366 = vrot.lane.b32.xlu0 %v6771_v11, %s4137_s16 }
 0x468   :  { %8644 = vst [vmem:[#allocation92_spill] sm:$0xff] %v7080_v26  ;;  %3448 = vrot.lane.b32.xlu2 %v7058_v45, %s4136_s0  ;;  %v7104_v6 = vpop.permute.xlu1 %3140 }
 0x469   :  { %v7086_v36 = vpop.f32.mrf.mxu2  ;;  %v7102_v26 = vpop.permute.xlu0 %3438  ;;  %8649 = vst [vmem:[#allocation100_spill] sm:$0xff] %v7104_v6 }
 0x46a   :  { %8645 = vst [vmem:[#allocation112_spill] sm:$0xff] %v7086_v36 }
 0x46b   :  { %v2768_v24 = vpop.f32.mrf.mxu0  ;;  %v7114_v47 = vpop.permute.xlu2 %3068 }
 0x46c   :  { %8653 = vst [vmem:[#allocation122_spill] sm:$0xff] %v7114_v47 }
 0x46e   :  { %v7092_v14 = vpop.f32.mrf.mxu1  ;;  %v7098_v10 = vpop.f32.mrf.mxu3 }
 0x46f   :  { %8647 = vst [vmem:[#allocation46_spill] sm:$0xff] %v7092_v14  ;;  %3378 = vrot.lane.b32.xlu1 %v7070_v40, %s4137_s16  ;;  %3226 = vrot.lane.b32.xlu0 %v6958_v50, %s4139_s18 }
 0x470   :  { %8648 = vst [vmem:[#allocation75_spill] sm:$0xff] %v7098_v10  ;;  %3304 = vrot.lane.b32.xlu2 %v7058_v45, %s4138_s17  ;;  %v7120_v35 = vpop.permute.xlu1 %3368 }
 0x471   :  { %v7106_v36 = vpop.f32.mrf.mxu2 }
 0x472   :  { %8650 = vst [vmem:[#allocation132_spill] sm:$0xff] %v7106_v36  ;;  %v2769_v36 = vadd.f32 %v2768_v24, %v6573_v22 }
 0x473   :  { %v2771_v46 = vpop.f32.mrf.mxu0  ;;  %v7127_v44 = vpop.permute.xlu2 %3142 }
 0x474   :  { %8655 = vst [vmem:[#allocation94_spill] sm:$0xff] %v7127_v44 }
 0x476   :  { %v7108_v38 = vpop.f32.mrf.mxu1  ;;  %v7112_v14 = vpop.f32.mrf.mxu3 }
 0x477   :  { %8651 = vst [vmem:[#allocation123_spill] sm:$0xff] %v7108_v38  ;;  %2918 = vrot.lane.b32.xlu1 %v6659_v29, %s4133_s9 }
 0x478   :  { %8652 = vst [vmem:[#allocation88_spill] sm:$0xff] %v7112_v14  ;;  %3306 = vrot.lane.b32.xlu2 %v7070_v40, %s4138_s17  ;;  %v7136_v60 = vpop.permute.xlu1 %2996 }
 0x479   :  { %v7118_v10 = vpop.permute.xlu0 %3144  ;;  %v2838_v20 = vpop.f32.mrf.mxu2 }
 0x47a   :  { %8654 = vst [vmem:[#allocation81_spill] sm:$0xff] %v7118_v10 }
 0x47e   :  { %v2803_v8 = vpop.f32.mrf.mxu1  ;;  %v2873_v38 = vpop.f32.mrf.mxu3 }
 0x47f   :  { %v2804_v57 = vadd.f32 %v2803_v8, %v2769_v36  ;;  %3228 = vrot.lane.b32.xlu1 %v6950_v5, %s4139_s18  ;;  %v8656_v8 = vld [vmem:[#allocation6_spill] sm:$0xff] }
 0x480   :  { %2924 = vrot.lane.b32.xlu2 %v6930_v55, %s4133_s9  ;;  %v7152_v2 = vpop.permute.xlu1 %3442 }
 0x481   :  { %v2839_v14 = vadd.f32 %v2838_v20, %v2804_v57  ;;  %v7129_v25 = vpop.permute.xlu0 %3444  ;;  %v2841_v19 = vpop.f32.mrf.mxu2  ;;  %v2772_v57 = vadd.f32 %v2771_v46, %v6713_v43 }
 0x482   :  { %v3466_v22 = vsel %vm501_vm0, %v7102_v26, %v7129_v25 }
 0x483   :  { %v2874_v24 = vadd.f32 %v2873_v38, %v2839_v14  ;;  %v3490_v36 = vmul.f32 %v3466_v22, %v8656_v8  ;;  %v2774_v14 = vpop.f32.mrf.mxu0 }
 0x485   :  { %v7138_v4 = vmax.f32 %v2874_v24, 0.0  ;;  %3679 = vmatpush.msrb.mxu1 %v3490_v36  ;;  %v7149_v24 = vpop.permute.xlu2 %3370  ;;  %v2775_v36 = vadd.f32 %v2774_v14, %v6661_v28 }
 0x486   :  { %v2806_v41 = vpop.f32.mrf.mxu1  ;;  %v2876_v20 = vpop.f32.mrf.mxu3 }
 0x487   :  { %3232 = vrot.lane.b32.xlu1 %v7058_v45, %s4139_s18  ;;  %3236 = vrot.lane.b32.xlu0 %v7138_v4, %s4139_s18  ;;  %v2807_v38 = vadd.f32 %v2806_v41, %v2772_v57 }
 0x488   :  { %3234 = vrot.lane.b32.xlu2 %v7070_v40, %s4139_s18 }
 0x489   :  { %v7147_v22 = vpop.permute.xlu0 %3072  ;;  %v2842_v1 = vadd.f32 %v2841_v19, %v2807_v38  ;;  %v2844_v46 = vpop.f32.mrf.mxu2 }
 0x48a   :  { %8657 = vst [vmem:[#allocation72_spill] sm:$0xff] %v7147_v22 }
 0x48b   :  { %v2877_v57 = vadd.f32 %v2876_v20, %v2842_v1  ;;  %v7174_v1 = vpop.permute.xlu1 %3070 }
 0x48c   :  { %8658 = vst [vmem:[#allocation117_spill] sm:$0xff] %v7174_v1 }
 0x48d   :  { %v7162_v19 = vmax.f32 %v2877_v57, 0.0  ;;  %v7166_v14 = vpop.permute.xlu2 %2998 }
 0x48e   :  { %v2809_v43 = vpop.f32.mrf.mxu1  ;;  %v2879_v41 = vpop.f32.mrf.mxu3 }
 0x48f   :  { %v2810_v33 = vadd.f32 %v2809_v43, %v2775_v36  ;;  %3148 = vrot.lane.b32.xlu1 %v7058_v45, %s4140_s19  ;;  %3080 = vrot.lane.b32.xlu0 %v7138_v4, %s4135_s15 }
 0x490   :  { %3150 = vrot.lane.b32.xlu2 %v7070_v40, %s4140_s19 }
 0x491   :  { %v2845_v12 = vadd.f32 %v2844_v46, %v2810_v33  ;;  %v7160_v54 = vpop.permute.xlu0 %3372 }
 0x493   :  { %v2880_v28 = vadd.f32 %v2879_v41, %v2845_v12  ;;  %v7188_v36 = vpop.permute.xlu1 %3300 }
 0x495   :  { %v7164_v38 = vmax.f32 %v2880_v28, 0.0  ;;  %v7182_v12 = vpop.permute.xlu2 %2928 }
 0x497   :  { %3156 = vrot.lane.b32.xlu1 %v7164_v38, %s4140_s19  ;;  %3154 = vrot.lane.b32.xlu0 %v7162_v19, %s4140_s19 }
 0x498   :  { %3152 = vrot.lane.b32.xlu2 %v7138_v4, %s4140_s19 }
 0x499   :  { %v7176_v33 = vpop.permute.xlu0 %3000 }
 0x49d   :  { %v7201_v41 = vpop.permute.xlu2 %2926 }
 0x49e   :  { %8659 = vst [vmem:[#allocation65_spill] sm:$0xff] %v7201_v41 }
 0x49f   :  { %3012 = vrot.lane.b32.xlu1 %v7164_v38, %s4134_s10  ;;  %3082 = vrot.lane.b32.xlu0 %v7162_v19, %s4135_s15 }
 0x4a0   :  { %3364 = vrot.lane.b32.xlu2 %v6778_v16, %s4137_s16 }
 0x4a1   :  { %v7186_v20 = vpop.permute.xlu0 %3436 }
 0x4a2   :  { %v3465_v43 = vsel %vm501_vm0, %v7186_v20, %v7152_v2 }
 0x4a3   :  { %v3486_v46 = vmul.f32 %v3465_v43, %v8656_v8 }
 0x4a5   :  { %3680 = vmatpush.msrb.mxu1 %v3486_v46  ;;  %v7210_v46 = vpop.permute.xlu1 %3298 }
 0x4a7   :  { %3146 = vrot.lane.b32.xlu1 %v7042_v15, %s4140_s19  ;;  %3010 = vrot.lane.b32.xlu0 %v7162_v19, %s4134_s10 }
 0x4a8   :  { %3362 = vrot.lane.b32.xlu2 %v6659_v29, %s4137_s16 }
 0x4a9   :  { %v7203_v57 = vpop.permute.xlu0 %3434 }
 0x4aa   :  { %8660 = vst [vmem:[#allocation113_spill] sm:$0xff] %v7203_v57  ;;  %v3464_v28 = vsel %vm501_vm0, %v7203_v57, %v7090_v30 }
 0x4ab   :  { %v3482_v43 = vmul.f32 %v3464_v28, %v8656_v8 }
 0x4ad   :  { %3681 = vmatpush.msrb.mxu1 %v3482_v43  ;;  %v7220_v37 = vpop.permute.xlu1 %2920 }
 0x4af   :  { %2940 = vrot.lane.b32.xlu1 %v7164_v38, %s4133_s9  ;;  %3084 = vrot.lane.b32.xlu0 %v7164_v38, %s4135_s15 }
 0x4b0   :  { %3294 = vrot.lane.b32.xlu2 %v6771_v11, %s4138_s17 }
 0x4b2   :  { %v7218_v59 = vpop.permute.xlu2 %3374 }
 0x4b5   :  { %v7236_v28 = vpop.permute.xlu1 %3296 }
 0x4b7   :  { %3454 = vrot.lane.b32.xlu1 %v7162_v19, %s4136_s0  ;;  %3008 = vrot.lane.b32.xlu0 %v7138_v4, %s4134_s10 }
 0x4b8   :  { %3078 = vrot.lane.b32.xlu2 %v7070_v40, %s4135_s15 }
 0x4ba   :  { %v7228_v8 = vpop.permute.xlu2 %3302 }
 0x4bb   :  { %8661 = vst [vmem:[#allocation128_spill] sm:$0xff] %v7228_v8 }
 0x4bf   :  { %3290 = vrot.lane.b32.xlu1 %v6659_v29, %s4138_s17  ;;  %3456 = vrot.lane.b32.xlu0 %v7164_v38, %s4136_s0 }
 0x4c0   :  { %2938 = vrot.lane.b32.xlu2 %v7162_v19, %s4133_s9 }
 0x4c2   :  { %v7238_v43 = vpop.permute.xlu2 %3448 }
 0x4c7   :  { %3074 = vrot.lane.b32.xlu1 %v7042_v15, %s4135_s15  ;;  %3292 = vrot.lane.b32.xlu0 %v6778_v16, %s4138_s17 }
 0x4c8   :  { %3452 = vrot.lane.b32.xlu2 %v7138_v4, %s4136_s0 }
 0x4c9   :  { %v7246_v29 = vpop.permute.xlu1 %3230  ;;  %v7248_v21 = vpop.permute.xlu0 %3446 }
 0x4ca   :  { %v3245_v31 = vsel %vm426_vm3, %v7030_v51, %v7246_v29  ;;  %v7254_v42 = vpop.permute.xlu2 %3304  ;;  %v3166_v51 = vsel %vm397_vm4, %v7001_v32, %v7118_v10 }
 0x4cb   :  { %8662 = vst [vmem:[#allocation49_spill] sm:$0xff] %v7254_v42  ;;  %v3267_v23 = vmul.f32 %v3245_v31, %v8663_v27  ;;  %v3165_v31 = vsel %vm397_vm4, %v7032_v18, %v7127_v44  ;;  %v8668_v44 = vld [vmem:[#allocation8_spill] sm:$0xff] }
 0x4cc   :  { %v3187_v10 = vmul.f32 %v3165_v31, %v8664_v62 }
 0x4cd   :  { %3700 = vmatpush.msrb.mxu2 %v3267_v23 }
 0x4cf   :  { %3006 = vrot.lane.b32.xlu1 %v7070_v40, %s4134_s10  ;;  %3076 = vrot.lane.b32.xlu0 %v7058_v45, %s4135_s15 }
 0x4d0   :  { %3222 = vrot.lane.b32.xlu2 %v6771_v11, %s4139_s18  ;;  %3701 = vmatpush.msrb.mxu2 %v6950_v5  ;;  %v3191_v11 = vmul.f32 %v3166_v51, %v8664_v62  ;;  %v3164_v5 = vsel %vm397_vm4, %v7039_v53, %v7104_v6  ;;  %v3093_v51 = vsel %vm372_vm5, %v7060_v0, %v7174_v1  ;;  %v8667_v1 = vld [vmem:[#allocation5_spill] sm:$0xff] }
 0x4d1   :  { %v7268_v52 = vpop.permute.xlu0 %3376 }
 0x4d2   :  { %3702 = vmatpush.msrb.mxu2 %v6958_v50  ;;  %v7271_v23 = vpop.permute.xlu2 %3306  ;;  %v3094_v50 = vsel %vm372_vm5, %v7015_v56, %v7147_v22  ;;  %v8665_v22 = vld [vmem:[#allocation24_spill] sm:$0xff] }
 0x4d3   :  { %v3119_v6 = vmul.f32 %v3094_v50, %v8665_v22  ;;  %v3115_v57 = vmul.f32 %v3093_v51, %v8665_v22  ;;  %v3461_v51 = vsel %vm501_vm0, %v7090_v30, %v7248_v21  ;;  %v3020_v30 = vsel %vm347_vm6, %v7084_v3, %v7136_v60 }
 0x4d4   :  { %3703 = vmatpush.msrb.mxu2 %v6930_v55  ;;  %v3183_v55 = vmul.f32 %v3164_v5, %v8664_v62 }
 0x4d6   :  { %3704 = vmatpush.msrb.mxu2 %v3191_v11 }
 0x4d7   :  { %3004 = vrot.lane.b32.xlu1 %v7058_v45, %s4134_s10  ;;  %2936 = vrot.lane.b32.xlu0 %v7138_v4, %s4133_s9 }
 0x4d8   :  { %3220 = vrot.lane.b32.xlu2 %v6778_v16, %s4139_s18  ;;  %3705 = vmatpush.msrb.mxu2 %v3187_v10  ;;  %v3092_v10 = vsel %vm372_vm5, %v7027_v63, %v7114_v47 }
 0x4d9   :  { %v7299_v31 = vpop.permute.xlu1 %3450  ;;  %v7301_v11 = vpop.permute.xlu0 %3366  ;;  %v3111_v47 = vmul.f32 %v3092_v10, %v8665_v22 }
 0x4da   :  { %v3463_v62 = vsel %vm501_vm0, %v7129_v25, %v7299_v31  ;;  %v7308_v5 = vpop.permute.xlu2 %2924  ;;  %3706 = vmatpush.msrb.mxu2 %v3183_v55  ;;  %v3394_v16 = vsel %vm476_vm1, %v7301_v11, %v7160_v54  ;;  %v3462_v25 = vsel %vm501_vm0, %v7152_v2, %v7238_v43  ;;  %v3022_v55 = vsel %vm347_vm6, %v7025_v7, %v7176_v33 }
 0x4db   :  { %8666 = vst [vmem:[#allocation60_spill] sm:$0xff] %v7308_v5  ;;  %v3491_v50 = vmul.f32 %v3463_v62, %v8667_v1  ;;  %v3418_v39 = vmul.f32 %v3394_v16, %v8668_v44  ;;  %v3021_v2 = vsel %vm347_vm6, %v7056_v13, %v7166_v14 }
 0x4dc   :  { %3707 = vmatpush.msrb.mxu2 %v3119_v6  ;;  %v3487_v6 = vmul.f32 %v3462_v25, %v8667_v1  ;;  %v8671_v25 = vld [vmem:[#allocation7_spill] sm:$0xff] }
 0x4dd   :  { %3682 = vmatpush.msrb.mxu1 %v3418_v39  ;;  %3731 = vmatpush.msrb.mxu3 %v3491_v50  ;;  %v8669_v39 = vld [vmem:[#allocation27_spill] sm:$0xff] }
 0x4de   :  { %3708 = vmatpush.msrb.mxu2 %v3115_v57  ;;  %v3047_v22 = vmul.f32 %v3022_v55, %v8669_v39  ;;  %v3483_v57 = vmul.f32 %v3461_v51, %v8667_v1  ;;  %v3043_v16 = vmul.f32 %v3021_v2, %v8669_v39  ;;  %v3039_v55 = vmul.f32 %v3020_v30, %v8669_v39  ;;  %v8672_v2 = vld [vmem:[#allocation28_spill] sm:$0xff] }
 0x4df   :  { %3312 = vrot.lane.b32.xlu1 %v7164_v38, %s4138_s17  ;;  %3384 = vrot.lane.b32.xlu0 %v7164_v38, %s4137_s16  ;;  %v3390_v51 = vsel %vm476_vm1, %v7149_v24, %v7268_v52 }
 0x4e0   :  { %3380 = vrot.lane.b32.xlu2 %v7138_v4, %s4137_s16  ;;  %3709 = vmatpush.msrb.mxu2 %v3111_v47  ;;  %v2950_v47 = vsel %vm322_vm7, %v7074_v61, %v7182_v12  ;;  %v3415_v39 = vmul.f32 %v3390_v51, %v8671_v25  ;;  %v8673_v51 = vld [vmem:[#allocation9_spill] sm:$0xff] }
 0x4e1   :  { %3732 = vmatpush.msrb.mxu3 %v3487_v6  ;;  %v7351_v62 = vpop.permute.xlu1 %3378  ;;  %v2975_v6 = vmul.f32 %v2950_v47, %v8672_v2  ;;  %v3318_v47 = vsel %vm451_vm2, %v7210_v46, %v7254_v42 }
 0x4e2   :  { %v3391_v10 = vsel %vm476_vm1, %v7160_v54, %v7351_v62  ;;  %v7358_v50 = vpop.permute.xlu2 %3234  ;;  %3710 = vmatpush.msrb.mxu2 %v3047_v22  ;;  %v2949_v54 = vsel %vm322_vm7, %v7220_v37, %v7201_v41  ;;  %v3389_v22 = vsel %vm476_vm1, %v7120_v35, %v7218_v59 }
 0x4e3   :  { %8670 = vst [vmem:[#allocation13_spill] sm:$0xff] %v7358_v50  ;;  %v3419_v1 = vmul.f32 %v3391_v10, %v8671_v25  ;;  %3733 = vmatpush.msrb.mxu3 %v3483_v57  ;;  %v2971_v30 = vmul.f32 %v2949_v54, %v8672_v2  ;;  %v3319_v57 = vsel %vm451_vm2, %v7188_v36, %v7271_v23 }
 0x4e4   :  { %3711 = vmatpush.msrb.mxu2 %v3043_v16  ;;  %v3411_v16 = vmul.f32 %v3389_v22, %v8671_v25  ;;  %v3347_v54 = vmul.f32 %v3319_v57, %v8673_v51  ;;  %v3317_v22 = vsel %vm451_vm2, %v7236_v28, %v7228_v8 }
 0x4e5   :  { %3734 = vmatpush.msrb.mxu3 %v3419_v1 }
 0x4e6   :  { %3712 = vmatpush.msrb.mxu2 %v3039_v55 }
 0x4e7   :  { %2932 = vrot.lane.b32.xlu1 %v7058_v45, %s4133_s9  ;;  %3382 = vrot.lane.b32.xlu0 %v7162_v19, %s4137_s16 }
 0x4e8   :  { %2934 = vrot.lane.b32.xlu2 %v7070_v40, %s4133_s9  ;;  %3713 = vmatpush.msrb.mxu2 %v2975_v6  ;;  %v7409_v6 = vld [vmem:[%s8012_s5] sm:$0xff] }
 0x4e9   :  { %3735 = vmatpush.msrb.mxu3 %v3415_v39  ;;  %v7392_v10 = vpop.permute.xlu1 %2918  ;;  %v3343_v39 = vmul.f32 %v3318_v47, %v8673_v51 }
 0x4ea   :  { %v2948_v1 = vsel %vm322_vm7, %v7392_v10, %v7308_v5  ;;  %v7402_v55 = vpop.permute.xlu2 %3150  ;;  %3714 = vmatpush.msrb.mxu2 %v2971_v30  ;;  %v3339_v30 = vmul.f32 %v3317_v22, %v8673_v51  ;;  %v7438_v51 = vld [vmem:[%s8012_s5 + $0x10] sm:$0xff] }
 0x4eb   :  { %v2967_v25 = vmul.f32 %v2948_v1, %v8672_v2  ;;  %3736 = vmatpush.msrb.mxu3 %v3411_v16  ;;  %v7424_v2 = vpop.permute.xlu0 %3226 }
 0x4ed   :  { %3737 = vmatpush.msrb.mxu3 %v3347_v54  ;;  %3715 = vmatpush.msrb.mxu2 %v2967_v25  ;;  %v2268_v54 = vld [vmem:[%s8011_s7 + $0x8] sm:$0xff] }
 0x4ee   :  { %3716 = vmatmul.f32.vlgmr.msrb.gmra.mxu2 %v7409_v6 }
 0x4ef   :  { %3738 = vmatpush.msrb.mxu3 %v3343_v39  ;;  %3240 = vrot.lane.b32.xlu1 %v7164_v38, %s4139_s18 }
 0x4f0   :  { %3002 = vrot.lane.b32.xlu0 %v7042_v15, %s4134_s10  ;;  %3308 = vrot.lane.b32.xlu2 %v7138_v4, %s4138_s17 }
 0x4f1   :  { %3739 = vmatpush.msrb.mxu3 %v3339_v30  ;;  %v7426_v57 = vpop.permute.xlu1 %3228 }
 0x4f2   :  { %v3247_v16 = vsel %vm426_vm3, %v7426_v57, %v7358_v50  ;;  %v7432_v47 = vpop.permute.xlu2 %3152  ;;  %v7473_v50 = vld [vmem:[%s8012_s5 + $0x20] sm:$0xff] }
 0x4f3   :  { %v3275_v1 = vmul.f32 %v3247_v16, %v8663_v27 }
 0x4f5   :  { %3740 = vmatpush.msrb.mxu3 %v3275_v1 }
 0x4f6   :  { %3719 = vmatmul.f32.gmra.mxu2 %v7438_v51 }
 0x4f7   :  { %2280 = vperm.xlu1 %4108, %v2268_v54  }
 0x4f8   :  { %3310 = vrot.lane.b32.xlu0 %v7162_v19, %s4138_s17  ;;  %3238 = vrot.lane.b32.xlu2 %v7162_v19, %s4139_s18 }
 0x4f9   :  { %v7448_v25 = vpop.permute.xlu1 %3232  ;;  %v3237_v22 = vpop.permute.xlu0 %3236 }
 0x4fa   :  { %8674 = vst [vmem:[#allocation107_spill] sm:$0xff] %v7448_v25  ;;  %v3246_v39 = vsel %vm426_vm3, %v7424_v2, %v7448_v25  ;;  %v7454_v30 = vpop.permute.xlu2 %3364  ;;  %v7459_v16 = vsel %vm426_vm3, %v7246_v29, %v3237_v22  ;;  %v3251_v1 = vsel %vm426_vm3, %v3237_v22, %v6989_v9  ;;  %v7479_v9 = vld [vmem:[%s8012_s5 + $0x8] sm:$0xff] }
 0x4fb   :  { %v3271_v54 = vmul.f32 %v3246_v39, %v8663_v27  ;;  %v3393_v5 = vsel %vm476_vm1, %v7454_v30, %v7149_v24  ;;  %v3269_v25 = vmul.f32 %v3251_v1, %v8590_v49  ;;  %v3621_v27 = vld [vmem:[%s8011_s7 + $0x38] sm:$0xff]  ;;  %v2267_v24 = vld [vmem:[%s8011_s7] sm:$0xff] }
 0x4fc   :  { %v3414_v29 = vmul.f32 %v3393_v5, %v8668_v44 }
 0x4fd   :  { %3741 = vmatpush.msrb.mxu3 %v3271_v54  ;;  %3804 = vmatpush.msra.mxu2 %v3269_v25  ;;  %v7508_v54 = vld [vmem:[%s8012_s5 + $0x18] sm:$0xff] }
 0x4fe   :  { %3683 = vmatpush.msrb.mxu1 %v3414_v29  ;;  %3722 = vmatmul.f32.gmra.mxu2 %v7473_v50  ;;  %v3620_v29 = vld [vmem:[%s8011_s7 + $0x30] sm:$0xff] }
 0x4ff   :  { %4084 = vmatmul.msk.f32.vlgmr.msrb.gmra.mxu3 %vm3638_vm10, %v7479_v9  ;;  %3630 = vperm.xlu1 %4108, %v3621_v27  }
 0x500   :  { %2930 = vrot.lane.b32.xlu0 %v7042_v15, %s4133_s9  ;;  %2275 = vperm.xlu2 %4106, %v2267_v24  }
 0x501   :  { %3805 = vmatpush.msra.mxu2 %v7164_v38  ;;  %v7493_v5 = vpop.permute.xlu1 %3148  ;;  %v7495_v25 = vpop.permute.xlu0 %3080  ;;  %v2269_v38 = vld [vmem:[%s8011_s7 + $0x10] sm:$0xff] }
 0x502   :  { %v7497_v22 = vpop.permute.xlu2 %3362 }
 0x503   :  { %v3392_v39 = vsel %vm476_vm1, %v7497_v22, %v7120_v35  ;;  %3806 = vmatpush.msra.mxu2 %v7162_v19 }
 0x504   :  { %v3410_v1 = vmul.f32 %v3392_v39, %v8668_v44  ;;  %v8675_v39 = vld [vmem:[#allocation19_spill] sm:$0xff] }
 0x505   :  { %3807 = vmatpush.msra.mxu2 %v7138_v4 }
 0x506   :  { %3684 = vmatpush.msrb.mxu1 %v3410_v1 }
 0x507   :  { %4085 = vmatmul.msk.f32.gmra.mxu3 %vm3638_vm10, %v7508_v54 }
 0x508   :  { %2285 = vperm.xlu0 %4107, %v2269_v38   ;;  %3625 = vperm.xlu2 %4106, %v3620_v29  }
 0x509   :  { %v3157_v44 = vpop.permute.xlu1 %3156  ;;  %v3155_v35 = vpop.permute.xlu0 %3154 }
 0x50a   :  { %v3160_v4 = vsel %vm397_vm4, %v7402_v55, %v3157_v44  ;;  %v3169_v19 = vsel %vm397_vm4, %v3157_v44, %v7001_v32  ;;  %v7525_v27 = vpop.permute.xlu2 %3294  ;;  %v3168_v24 = vsel %vm397_vm4, %v3155_v35, %v7032_v18  ;;  %v3159_v49 = vsel %vm397_vm4, %v7493_v5, %v3155_v35  ;;  %v8676_v44 = vld [vmem:[#allocation10_spill] sm:$0xff] }
 0x50b   :  { %v3190_v1 = vmul.f32 %v3169_v19, %v8675_v39  ;;  %v3193_v38 = vmul.f32 %v3160_v4, %v8607_v48  ;;  %v3322_v29 = vsel %vm451_vm2, %v7525_v27, %v7188_v36  ;;  %v3167_v32 = vsel %vm397_vm4, %v7432_v47, %v7039_v53  ;;  %v7547_v4 = vld [vmem:[%s8012_s5 + $0x28] sm:$0xff]  ;;  %v3622_v36 = vld [vmem:[%s8011_s7 + $0x40] sm:$0xff] }
 0x50c   :  { %v3346_v18 = vmul.f32 %v3322_v29, %v8676_v44  ;;  %v3186_v19 = vmul.f32 %v3168_v24, %v8675_v39  ;;  %v3189_v35 = vmul.f32 %v3159_v49, %v8607_v48  ;;  %v3182_v53 = vmul.f32 %v3167_v32, %v8675_v39  ;;  %v3917_v49 = vld [vmem:[%s8011_s7 + $0x48] sm:$0xff] }
 0x50d   :  { %3652 = vmatpush.msrb.mxu0 %v3190_v1  ;;  %3808 = vmatpush.msra.mxu2 %v3193_v38 }
 0x50e   :  { %3685 = vmatpush.msrb.mxu1 %v3346_v18 }
 0x50f   :  { %4086 = vmatmul.msk.f32.gmra.mxu3 %vm3638_vm10, %v7547_v4  ;;  %3653 = vmatpush.msrb.mxu0 %v3186_v19 }
 0x510   :  { %3635 = vperm.xlu0 %4107, %v3622_v36   ;;  %3809 = vmatpush.msra.mxu2 %v3189_v35 }
 0x511   :  { %v7557_v29 = vpop.permute.xlu1 %3012  ;;  %3654 = vmatpush.msrb.mxu0 %v3182_v53  ;;  %v7559_v24 = vpop.permute.xlu0 %3082 }
 0x512   :  { %v7561_v1 = vpop.permute.xlu2 %3078  ;;  %v3096_v53 = vsel %vm372_vm5, %v7559_v24, %v7060_v0  ;;  %v3025_v0 = vsel %vm347_vm6, %v7557_v29, %v7025_v7 }
 0x518   :  { %3920 = vperm.xlu0 %4107, %v3917_v49  }
 0x519   :  { %v7566_v38 = vpop.permute.xlu1 %3146  ;;  %v7568_v39 = vpop.permute.xlu0 %3010 }
 0x51a   :  { %v3158_v32 = vsel %vm397_vm4, %v7566_v38, %v7432_v47  ;;  %v7575_v19 = vpop.permute.xlu2 %2938 }
 0x51b   :  { %v3185_v18 = vmul.f32 %v3158_v32, %v8607_v48  ;;  %v8677_v48 = vld [vmem:[#allocation21_spill] sm:$0xff] }
 0x51c   :  { %v3114_v42 = vmul.f32 %v3096_v53, %v8677_v48 }
 0x51d   :  { %3810 = vmatpush.msra.mxu2 %v3185_v18  ;;  %v3095_v18 = vsel %vm372_vm5, %v7495_v25, %v7027_v63 }
 0x521   :  { %v7577_v36 = vpop.permute.xlu1 %2940  ;;  %v3085_v35 = vpop.permute.xlu0 %3084 }
 0x522   :  { %v3088_v49 = vsel %vm372_vm5, %v7561_v1, %v3085_v35  ;;  %v3097_v47 = vsel %vm372_vm5, %v3085_v35, %v7015_v56  ;;  %v3110_v56 = vmul.f32 %v3095_v18, %v8677_v48  ;;  %v3024_v35 = vsel %vm347_vm6, %v7568_v39, %v7056_v13  ;;  %v3453_v63 = vpop.permute.xlu2 %3452 }
 0x523   :  { %v3118_v32 = vmul.f32 %v3097_v47, %v8677_v48  ;;  %v3121_v8 = vmul.f32 %v3088_v49, %v8510_v34  ;;  %v8678_v47 = vld [vmem:[#allocation22_spill] sm:$0xff]  ;;  %v2952_v48 = vsel %vm322_vm7, %v7575_v19, %v7220_v37 }
 0x524   :  { %v3046_v49 = vmul.f32 %v3025_v0, %v8678_v47 }
 0x525   :  { %3655 = vmatpush.msrb.mxu0 %v3118_v32  ;;  %3811 = vmatpush.msra.mxu2 %v3121_v8  ;;  %v3042_v8 = vmul.f32 %v3024_v35, %v8678_v47  ;;  %v8679_v32 = vld [vmem:[#allocation23_spill] sm:$0xff] }
 0x527   :  { %3656 = vmatpush.msrb.mxu0 %v3114_v42  ;;  %v2953_v42 = vsel %vm322_vm7, %v7577_v36, %v7074_v61 }
 0x528   :  { %v2974_v18 = vmul.f32 %v2953_v42, %v8679_v32 }
 0x529   :  { %v3455_v41 = vpop.permute.xlu1 %3454  ;;  %3657 = vmatpush.msrb.mxu0 %v3110_v56  ;;  %v7606_v53 = vpop.permute.xlu0 %3008 }
 0x52a   :  { %v3023_v7 = vsel %vm347_vm6, %v7606_v53, %v7084_v3  ;;  %v2970_v3 = vmul.f32 %v2952_v48, %v8679_v32  ;;  %v3468_v61 = vsel %vm501_vm0, %v3455_v41, %v7186_v20  ;;  %v7629_v35 = vpop.permute.xlu2 %3222 }
 0x52b   :  { %3658 = vmatpush.msrb.mxu0 %v3046_v49  ;;  %v3038_v13 = vmul.f32 %v3023_v7, %v8678_v47  ;;  %v8680_v49 = vld [vmem:[#allocation113_spill] sm:$0xff] }
 0x52c   :  { %v3467_v7 = vsel %vm501_vm0, %v3453_v63, %v8680_v49 }
 0x52d   :  { %3659 = vmatpush.msrb.mxu0 %v3042_v8  ;;  %v3489_v8 = vmul.f32 %v3468_v61, %v8579_v58  ;;  %v3485_v42 = vmul.f32 %v3467_v7, %v8579_v58 }
 0x52f   :  { %3660 = vmatpush.msrb.mxu0 %v3038_v13 }
 0x531   :  { %v7624_v0 = vpop.permute.xlu1 %3290  ;;  %3661 = vmatpush.msrb.mxu0 %v2974_v18  ;;  %v3457_v56 = vpop.permute.xlu0 %3456 }
 0x532   :  { %v3469_v47 = vsel %vm501_vm0, %v3457_v56, %v7102_v26  ;;  %v3320_v48 = vsel %vm451_vm2, %v7624_v0, %v7236_v28  ;;  %v7652_v18 = vpop.permute.xlu2 %3220  ;;  %v3460_v28 = vsel %vm501_vm0, %v7299_v31, %v3457_v56  ;;  %v3458_v56 = vsel %vm501_vm0, %v7248_v21, %v3453_v63  ;;  %v8683_v21 = vld [vmem:[#allocation34_spill] sm:$0xff] }
 0x533   :  { %v3493_v37 = vmul.f32 %v3469_v47, %v8579_v58  ;;  %3662 = vmatpush.msrb.mxu0 %v2970_v3  ;;  %v3250_v3 = vsel %vm426_vm3, %v7629_v35, %v7426_v57  ;;  %v3338_v61 = vmul.f32 %v3320_v48, %v8676_v44  ;;  %v8681_v47 = vld [vmem:[#allocation11_spill] sm:$0xff]  ;;  %v3459_v57 = vsel %vm501_vm0, %v7238_v43, %v3455_v41 }
 0x535   :  { %3835 = vmatpush.msra.mxu3 %v3493_v37  ;;  %v3274_v37 = vmul.f32 %v3250_v3, %v8681_v47 }
 0x537   :  { %3836 = vmatpush.msra.mxu3 %v3489_v8  ;;  %v8682_v8 = vld [vmem:[#allocation12_spill] sm:$0xff] }
 0x538   :  { %v3488_v43 = vmul.f32 %v3459_v57, %v8682_v8 }
 0x539   :  { %v7640_v20 = vpop.permute.xlu1 %3074  ;;  %3837 = vmatpush.msra.mxu3 %v3485_v42  ;;  %v7642_v13 = vpop.permute.xlu0 %3292  ;;  %v3492_v42 = vmul.f32 %v3460_v28, %v8682_v8 }
 0x53a   :  { %v3321_v26 = vsel %vm451_vm2, %v7642_v13, %v7210_v46  ;;  %v3249_v46 = vsel %vm426_vm3, %v7652_v18, %v7424_v2  ;;  %v3086_v31 = vsel %vm372_vm5, %v7640_v20, %v7495_v25  ;;  %v3484_v25 = vmul.f32 %v3458_v56, %v8682_v8  ;;  %v3381_v3 = vpop.permute.xlu2 %3380  ;;  %v8689_v56 = vld [vmem:[#allocation29_spill] sm:$0xff] }
 0x53b   :  { %v3342_v58 = vmul.f32 %v3321_v26, %v8676_v44  ;;  %v3270_v44 = vmul.f32 %v3249_v46, %v8681_v47  ;;  %v3113_v26 = vmul.f32 %v3086_v31, %v8510_v34  ;;  %v8684_v47 = vld [vmem:[#allocation25_spill] sm:$0xff] }
 0x53d   :  { %3686 = vmatpush.msrb.mxu1 %v3342_v58 }
 0x53f   :  { %3687 = vmatpush.msrb.mxu1 %v3338_v61 }
 0x541   :  { %v7668_v49 = vpop.permute.xlu1 %3006  ;;  %v7670_v7 = vpop.permute.xlu0 %3076  ;;  %3688 = vmatpush.msrb.mxu1 %v3274_v37  ;;  %v3268_v37 = vmul.f32 %v7459_v16, %v8684_v47  ;;  %v8685_v16 = vld [vmem:[#allocation81_spill] sm:$0xff] }
 0x542   :  { %v3087_v2 = vsel %vm372_vm5, %v7670_v7, %v7559_v24  ;;  %v3016_v24 = vsel %vm347_vm6, %v7668_v49, %v7557_v29  ;;  %v3163_v28 = vsel %vm397_vm4, %v8685_v16, %v7402_v55  ;;  %v8690_v55 = vld [vmem:[#allocation100_spill] sm:$0xff]  ;;  %v8695_v16 = vld [vmem:[#allocation17_spill] sm:$0xff] }
 0x543   :  { %v3117_v41 = vmul.f32 %v3087_v2, %v8510_v34  ;;  %3689 = vmatpush.msrb.mxu1 %v3270_v44  ;;  %v3049_v63 = vmul.f32 %v3016_v24, %v8683_v21  ;;  %v2935_v44 = vpop.permute.xlu2 %2934  ;;  %v8686_v2 = vld [vmem:[#allocation14_spill] sm:$0xff] }
 0x544   :  { %4081 = vmatmul.msk.f32.vlgmr.msrb.gmra.mxu1 %vm3638_vm10, %v7479_v9 }
 0x545   :  { %3783 = vmatpush.msra.mxu1 %v3492_v42  ;;  %3812 = vmatpush.msra.mxu2 %v3117_v41  ;;  %v8687_v42 = vld [vmem:[#allocation15_spill] sm:$0xff]  ;;  %v3161_v41 = vsel %vm397_vm4, %v8690_v55, %v7566_v38 }
 0x546   :  { %v3184_v24 = vmul.f32 %v3161_v41, %v8689_v56 }
 0x547   :  { %3784 = vmatpush.msra.mxu1 %v3488_v43  ;;  %3813 = vmatpush.msra.mxu2 %v3113_v26 }
 0x549   :  { %3785 = vmatpush.msra.mxu1 %v3484_v25  ;;  %v7699_v48 = vpop.permute.xlu1 %3004  ;;  %v7701_v58 = vpop.permute.xlu0 %2936  ;;  %3814 = vmatpush.msra.mxu2 %v3049_v63  ;;  %v3386_v25 = vsel %vm476_vm1, %v7218_v59, %v3381_v3  ;;  %v8692_v63 = vld [vmem:[#allocation117_spill] sm:$0xff] }
 0x54a   :  { %v3015_v34 = vsel %vm347_vm6, %v7699_v48, %v7568_v39  ;;  %v2951_v29 = vsel %vm322_vm7, %v7701_v58, %v7392_v10 }
 0x54b   :  { %v3045_v61 = vmul.f32 %v3015_v34, %v8683_v21  ;;  %v2966_v46 = vmul.f32 %v2951_v29, %v8679_v32  ;;  %v8693_v34 = vld [vmem:[#allocation31_spill] sm:$0xff] }
 0x54c   :  { %4082 = vmatmul.msk.f32.gmra.mxu1 %vm3638_vm10, %v7508_v54 }
 0x54d   :  { %3815 = vmatpush.msra.mxu2 %v3045_v61  ;;  %3663 = vmatpush.msrb.mxu0 %v2966_v46  ;;  %v3395_v61 = vsel %vm476_vm1, %v3381_v3, %v7497_v22  ;;  %v3309_v22 = vpop.permute.xlu2 %3308 }
 0x54e   :  { %3664 = vmatmul.f32.vlgmr.msrb.gmra.mxu0 %v7409_v6 }
 0x54f   :  { %3752 = vmatpush.msra.mxu0 %v3268_v37 }
 0x551   :  { %v3385_v39 = vpop.permute.xlu0 %3384  ;;  %3753 = vmatpush.msra.mxu0 %v7070_v40  ;;  %v3313_v57 = vpop.permute.xlu1 %3312  ;;  %v8688_v40 = vld [vmem:[#allocation94_spill] sm:$0xff] }
 0x552   :  { %v3388_v10 = vsel %vm476_vm1, %v7351_v62, %v3385_v39  ;;  %v3397_v32 = vsel %vm476_vm1, %v3385_v39, %v7301_v11  ;;  %v3162_v62 = vsel %vm397_vm4, %v8688_v40, %v7493_v5  ;;  %v3192_v11 = vmul.f32 %v3163_v28, %v8689_v56  ;;  %v8691_v5 = vld [vmem:[#allocation72_spill] sm:$0xff] }
 0x553   :  { %v3420_v8 = vmul.f32 %v3388_v10, %v8686_v2  ;;  %v3421_v31 = vmul.f32 %v3397_v32, %v8687_v42  ;;  %3754 = vmatpush.msra.mxu0 %v7058_v45  ;;  %v3188_v45 = vmul.f32 %v3162_v62, %v8689_v56  ;;  %v3412_v39 = vmul.f32 %v3386_v25, %v8686_v2  ;;  %v8698_v56 = vld [vmem:[#allocation36_spill] sm:$0xff] }
 0x554   :  { %4083 = vmatmul.msk.f32.gmra.mxu1 %vm3638_vm10, %v7547_v4  ;;  %v3325_v3 = vsel %vm451_vm2, %v3313_v57, %v7525_v27  ;;  %v3413_v32 = vmul.f32 %v3395_v61, %v8687_v42  ;;  %v3018_v27 = vsel %vm347_vm6, %v7166_v14, %v7699_v48  ;;  %v8702_v25 = vld [vmem:[#allocation128_spill] sm:$0xff]  ;;  %v8703_v61 = vld [vmem:[#allocation85_spill] sm:$0xff] }
 0x555   :  { %3755 = vmatpush.msra.mxu0 %v7042_v15  ;;  %3786 = vmatpush.msra.mxu1 %v3420_v8  ;;  %v3091_v15 = vsel %vm372_vm5, %v8691_v5, %v7561_v1  ;;  %v3090_v1 = vsel %vm372_vm5, %v8692_v63, %v7670_v7  ;;  %v3316_v7 = vsel %vm451_vm2, %v7271_v23, %v3313_v57  ;;  %v8696_v57 = vld [vmem:[#allocation18_spill] sm:$0xff]  ;;  %v8697_v8 = vld [vmem:[#allocation33_spill] sm:$0xff]  ;;  %v3239_v5 = vpop.permute.xlu2 %3238 }
 0x556   :  { %3838 = vmatpush.msra.mxu3 %v3421_v31  ;;  %3667 = vmatmul.f32.gmra.mxu0 %v7438_v51  ;;  %v3120_v29 = vmul.f32 %v3091_v15, %v8693_v34  ;;  %v3116_v10 = vmul.f32 %v3090_v1, %v8693_v34  ;;  %v3348_v28 = vmul.f32 %v3316_v7, %v8695_v16 }
 0x557   :  { %3756 = vmatpush.msra.mxu0 %v3192_v11  ;;  %v3044_v48 = vmul.f32 %v3018_v27, %v8697_v8  ;;  %v3314_v63 = vsel %vm451_vm2, %v8702_v25, %v3309_v22  ;;  %v3323_v1 = vsel %vm451_vm2, %v3309_v22, %v7624_v0  ;;  %v592_v0 = vld [vmem:[%s8009_s2 + $0xe8] sm:$0xff]  ;;  %v593_v22 = vld [vmem:[%s8009_s2 + $0xf0] sm:$0xff] }
 0x558   :  { %v8707_v27 = vld [vmem:[#allocation131_spill] sm:$0xff] }
 0x559   :  { %v3383_v43 = vpop.permute.xlu0 %3382  ;;  %3757 = vmatpush.msra.mxu0 %v3188_v45  ;;  %v2933_v37 = vpop.permute.xlu1 %2932  ;;  %v8700_v45 = vld [vmem:[#allocation35_spill] sm:$0xff] }
 0x55a   :  { %v3387_v38 = vsel %vm476_vm1, %v7268_v52, %v3383_v43  ;;  %v3396_v26 = vsel %vm476_vm1, %v3383_v43, %v7454_v30  ;;  %v8694_v30 = vld [vmem:[#allocation122_spill] sm:$0xff]  ;;  %v8716_v25 = vld [vmem:[#allocation59_spill] sm:$0xff] }
 0x55b   :  { %v3416_v52 = vmul.f32 %v3387_v38, %v8686_v2  ;;  %v3417_v46 = vmul.f32 %v3396_v26, %v8687_v42  ;;  %3758 = vmatpush.msra.mxu0 %v3184_v24  ;;  %v3089_v59 = vsel %vm372_vm5, %v8694_v30, %v7640_v20  ;;  %v3019_v20 = vsel %vm347_vm6, %v7176_v33, %v7668_v49  ;;  %v596_v43 = vld [vmem:[%s8009_s2 + $0x108] sm:$0xff]  ;;  %v8701_v24 = vld [vmem:[#allocation49_spill] sm:$0xff] }
 0x55c   :  { %v3112_v23 = vmul.f32 %v3089_v59, %v8693_v34  ;;  %v3349_v2 = vmul.f32 %v3325_v3, %v8696_v57  ;;  %v3048_v42 = vmul.f32 %v3019_v20, %v8697_v8  ;;  %v2944_v49 = vsel %vm322_vm7, %v2935_v44, %v7577_v36  ;;  %v587_v34 = vld [vmem:[%s8009_s2 + $0xc0] sm:$0xff]  ;;  %v8704_v59 = vld [vmem:[#allocation80_spill] sm:$0xff]  ;;  %v597_v3 = vld [vmem:[%s8009_s2 + $0x110] sm:$0xff] }
 0x55d   :  { %3759 = vmatpush.msra.mxu0 %v3120_v29  ;;  %3787 = vmatpush.msra.mxu1 %v3416_v52  ;;  %v2947_v36 = vsel %vm322_vm7, %v7182_v12, %v2935_v44  ;;  %v2977_v11 = vmul.f32 %v2944_v49, %v8698_v56  ;;  %v595_v44 = vld [vmem:[%s8009_s2 + $0x100] sm:$0xff]  ;;  %v713_v7 = vadd.f32 %v8704_v59, %v596_v43  ;;  %v8715_v43 = vld [vmem:[#allocation60_spill] sm:$0xff] }
 0x55e   :  { %3839 = vmatpush.msra.mxu3 %v3417_v46  ;;  %3670 = vmatmul.f32.gmra.mxu0 %v7473_v50  ;;  %v591_v29 = vld [vmem:[%s8009_s2 + $0xe0] sm:$0xff]  ;;  %v669_v52 = vadd.f32 %v8703_v61, %v595_v44  ;;  %v3340_v20 = vmul.f32 %v3314_v63, %v8695_v16  ;;  %v8718_v61 = vld [vmem:[#allocation68_spill] sm:$0xff] }
 0x55f   :  { %3760 = vmatpush.msra.mxu0 %v3116_v10  ;;  %3788 = vmatpush.msra.mxu1 %v3412_v39  ;;  %v836_v44 = vmax.f32 %v713_v7, 0.0  ;;  %v8721_v7 = vld [vmem:[#allocation55_spill] sm:$0xff] }
 0x560   :  { %3840 = vmatpush.msra.mxu3 %v3413_v32  ;;  %v598_v32 = vld [vmem:[%s8009_s2 + $0x118] sm:$0xff] }
 0x561   :  { %3761 = vmatpush.msra.mxu0 %v3112_v23  ;;  %3789 = vmatpush.msra.mxu1 %v3348_v28  ;;  %v3241_v41 = vpop.permute.xlu1 %3240  ;;  %v3341_v23 = vmul.f32 %v3323_v1, %v8696_v57  ;;  %v8706_v28 = vld [vmem:[#allocation107_spill] sm:$0xff]  ;;  %v8717_v1 = vld [vmem:[#allocation32_spill] sm:$0xff] }
 0x562   :  { %v3003_v33 = vpop.permute.xlu0 %3002  ;;  %3841 = vmatpush.msra.mxu3 %v3349_v2  ;;  %v3253_v10 = vsel %vm426_vm3, %v3241_v41, %v7629_v35  ;;  %v3243_v35 = vsel %vm426_vm3, %v8706_v28, %v3239_v5  ;;  %v7876_v2 = vadd.f32 %v8707_v27, %v587_v34  ;;  %v8726_v28 = vld [vmem:[#allocation93_spill] sm:$0xff] }
 0x563   :  { %v3014_v31 = vsel %vm347_vm6, %v3003_v33, %v7606_v53  ;;  %v3017_v14 = vsel %vm347_vm6, %v7136_v60, %v3003_v33  ;;  %3762 = vmatpush.msra.mxu0 %v3048_v42  ;;  %v2943_v53 = vsel %vm322_vm7, %v2933_v37, %v7575_v19  ;;  %v8699_v60 = vld [vmem:[#allocation65_spill] sm:$0xff]  ;;  %v8709_v33 = vld [vmem:[#allocation134_spill] sm:$0xff] }
 0x564   :  { %v3040_v40 = vmul.f32 %v3017_v14, %v8697_v8  ;;  %v3041_v62 = vmul.f32 %v3014_v31, %v8683_v21  ;;  %v2946_v55 = vsel %vm322_vm7, %v8699_v60, %v2933_v37  ;;  %v2976_v21 = vmul.f32 %v2947_v36, %v8700_v45  ;;  %v8705_v37 = vld [vmem:[#allocation13_spill] sm:$0xff]  ;;  %v8708_v8 = vld [vmem:[#allocation138_spill] sm:$0xff]  ;;  %v8713_v60 = vld [vmem:[#allocation67_spill] sm:$0xff] }
 0x565   :  { %3763 = vmatpush.msra.mxu0 %v3044_v48  ;;  %v2973_v12 = vmul.f32 %v2943_v53, %v8698_v56  ;;  %v2972_v19 = vmul.f32 %v2946_v55, %v8700_v45  ;;  %v3244_v39 = vsel %vm426_vm3, %v8705_v37, %v3241_v41  ;;  %v666_v42 = vadd.f32 %v8708_v8, %v591_v29  ;;  %v8714_v41 = vld [vmem:[#allocation56_spill] sm:$0xff]  ;;  %v8727_v8 = vld [vmem:[#allocation95_spill] sm:$0xff] }
 0x566   :  { %3816 = vmatpush.msra.mxu2 %v3041_v62  ;;  %v835_v31 = vmax.f32 %v669_v52, 0.0  ;;  %v3276_v48 = vmul.f32 %v3244_v39, %v8684_v47  ;;  %v757_v55 = vadd.f32 %v8713_v60, %v597_v3  ;;  %v827_v29 = vmax.f32 %v7876_v2, 0.0  ;;  %v8722_v39 = vld [vmem:[#allocation78_spill] sm:$0xff] }
 0x567   :  { %3764 = vmatpush.msra.mxu0 %v3040_v40  ;;  %v8711_v40 = vld [vmem:[#allocation26_spill] sm:$0xff]  ;;  %v831_v59 = vmax.f32 %v666_v42, 0.0 }
 0x568   :  { %3817 = vmatpush.msra.mxu2 %v2977_v11  ;;  %v3277_v62 = vmul.f32 %v3253_v10, %v8711_v40  ;;  %v8712_v11 = vld [vmem:[#allocation102_spill] sm:$0xff]  ;;  %v837_v27 = vmax.f32 %v757_v55, 0.0 }
 0x569   :  { %3765 = vmatpush.msra.mxu0 %v2976_v21  ;;  %v2281_v36 = vpop.permute.xlu1 %2280  ;;  %v7889_v53 = vadd.f32 %v8712_v11, %v593_v22  ;;  %v801_v21 = vadd.f32 %v8714_v41, %v598_v32  ;;  %v8723_v22 = vld [vmem:[#allocation116_spill] sm:$0xff]  ;;  %v8732_v60 = vld [vmem:[#allocation38_spill] sm:$0xff] }
 0x56a   :  { %v3311_v15 = vpop.permute.xlu0 %3310  ;;  %3818 = vmatpush.msra.mxu2 %v2973_v12  ;;  %v3272_v12 = vmul.f32 %v3243_v35, %v8684_v47  ;;  %v590_v47 = vld [vmem:[%s8009_s2 + $0xd8] sm:$0xff]  ;;  %v2343_v63 = vadd.f32 %v8716_v25, %v2281_v36  ;;  %v2623_v10 = vadd.f32 %v8722_v39, %v2281_v36  ;;  %v2763_v3 = vadd.f32 %v8723_v22, %v2281_v36  ;;  %v8733_v41 = vld [vmem:[#allocation50_spill] sm:$0xff]  ;;  %v8739_v25 = vld [vmem:[#allocation99_spill] sm:$0xff] }
 0x56b   :  { %v3315_v38 = vsel %vm451_vm2, %v8701_v24, %v3311_v15  ;;  %v3324_v26 = vsel %vm451_vm2, %v3311_v15, %v7642_v13  ;;  %3766 = vmatpush.msra.mxu0 %v2972_v19  ;;  %v588_v13 = vld [vmem:[%s8009_s2 + $0xc8] sm:$0xff]  ;;  %v8725_v32 = vld [vmem:[#allocation108_spill] sm:$0xff]  ;;  %v838_v2 = vmax.f32 %v801_v21, 0.0  ;;  %v833_v11 = vmax.f32 %v7889_v53, 0.0 }
 0x56c   :  { %v3344_v46 = vmul.f32 %v3315_v38, %v8695_v16  ;;  %v3345_v30 = vmul.f32 %v3324_v26, %v8696_v57  ;;  %v7880_v49 = vadd.f32 %v8709_v33, %v588_v13  ;;  %v3252_v16 = vsel %vm426_vm3, %v3239_v5, %v7652_v18  ;;  %v8710_v57 = vld [vmem:[#allocation97_spill] sm:$0xff]  ;;  %v2276_v18 = vpop.permute.xlu2 %2275  ;;  %v589_v38 = vld [vmem:[%s8009_s2 + $0xd0] sm:$0xff]  ;;  %v594_v26 = vld [vmem:[%s8009_s2 + $0xf8] sm:$0xff] }
 0x56d   :  { %v710_v14 = vadd.f32 %v8710_v57, %v592_v0  ;;  %v3273_v19 = vmul.f32 %v3252_v16, %v8711_v40  ;;  %v2340_v52 = vadd.f32 %v8718_v61, %v2276_v18  ;;  %v8719_v13 = vld [vmem:[#allocation84_spill] sm:$0xff]  ;;  %v2760_v37 = vadd.f32 %v8721_v7, %v2276_v18  ;;  %v8729_v57 = vld [vmem:[#allocation69_spill] sm:$0xff]  ;;  %v8730_v40 = vld [vmem:[#allocation70_spill] sm:$0xff] }
 0x56e   :  { %3790 = vmatpush.msra.mxu1 %v3344_v46  ;;  %3842 = vmatpush.msra.mxu3 %v3345_v30  ;;  %v2480_v46 = vadd.f32 %v8719_v13, %v2276_v18  ;;  %v8720_v30 = vld [vmem:[#allocation71_spill] sm:$0xff]  ;;  %v798_v35 = vadd.f32 %v8726_v28, %v594_v26  ;;  %v2378_v42 = vadd.f32 %v8727_v8, %v2343_v63  ;;  %v8728_v33 = vld [vmem:[#allocation96_spill] sm:$0xff]  ;;  %v8743_v13 = vld [vmem:[#allocation66_spill] sm:$0xff] }
 0x56f   :  { %v2620_v0 = vadd.f32 %v8720_v30, %v2276_v18  ;;  %v2795_v55 = vadd.f32 %v8732_v60, %v2760_v37  ;;  %v2658_v21 = vadd.f32 %v8733_v41, %v2623_v10  ;;  %v8742_v61 = vld [vmem:[#allocation83_spill] sm:$0xff]  ;;  %v8746_v7 = vld [vmem:[#allocation112_spill] sm:$0xff]  ;;  %v8747_v39 = vld [vmem:[#allocation58_spill] sm:$0xff] }
 0x570   :  { %3791 = vmatpush.msra.mxu1 %v3340_v20  ;;  %3843 = vmatpush.msra.mxu3 %v3341_v23  ;;  %v795_v20 = vadd.f32 %v8725_v32, %v590_v47  ;;  %v832_v23 = vmax.f32 %v710_v14, 0.0  ;;  %v2515_v14 = vadd.f32 %v8730_v40, %v2480_v46  ;;  %v8738_v47 = vld [vmem:[#allocation118_spill] sm:$0xff]  ;;  %v2413_v63 = vadd.f32 %v8739_v25, %v2378_v42  ;;  %v8744_v30 = vld [vmem:[#allocation123_spill] sm:$0xff]  ;;  %v8748_v22 = vld [vmem:[#allocation64_spill] sm:$0xff] }
 0x571   :  { %v8750_v32 = vld [vmem:[#allocation77_spill] sm:$0xff]  ;;  %v8754_v42 = vld [vmem:[#allocation52_spill] sm:$0xff]  ;;  %v8757_v40 = vld [vmem:[#allocation63_spill] sm:$0xff] }
 0x572   :  { %v2931_v5 = vpop.permute.xlu0 %2930  ;;  %3792 = vmatpush.msra.mxu1 %v3276_v48  ;;  %3844 = vmatpush.msra.mxu3 %v3277_v62  ;;  %v2375_v48 = vadd.f32 %v8729_v57, %v2340_v52  ;;  %v8731_v62 = vld [vmem:[#allocation101_spill] sm:$0xff]  ;;  %v8756_v57 = vld [vmem:[#allocation47_spill] sm:$0xff]  ;;  %v8758_v60 = vld [vmem:[#allocation88_spill] sm:$0xff] }
 0x573   :  { %v2942_v15 = vsel %vm322_vm7, %v2931_v5, %v7701_v58  ;;  %v2945_v24 = vsel %vm322_vm7, %v8715_v43, %v2931_v5  ;;  %v2483_v58 = vadd.f32 %v8717_v1, %v2281_v36  ;;  %v2655_v36 = vadd.f32 %v8731_v62, %v2620_v0  ;;  %v7936_v5 = vpop.f32.mrf.mxu2  ;;  %v8737_v43 = vld [vmem:[#allocation106_spill] sm:$0xff]  ;;  %v8740_v1 = vld [vmem:[#allocation111_spill] sm:$0xff] }
 0x574   :  { %v2968_v34 = vmul.f32 %v2945_v24, %v8700_v45  ;;  %v2969_v17 = vmul.f32 %v2942_v15, %v8698_v56  ;;  %3793 = vmatpush.msra.mxu1 %v3272_v12  ;;  %3845 = vmatpush.msra.mxu3 %v3273_v19  ;;  %v8724_v56 = vld [vmem:[#allocation137_spill] sm:$0xff]  ;;  %v8734_v12 = vld [vmem:[#allocation46_spill] sm:$0xff]  ;;  %v2410_v10 = vadd.f32 %v8747_v39, %v2375_v48 }
 0x575   :  { %v751_v45 = vadd.f32 %v8724_v56, %v589_v38  ;;  %v2518_v16 = vadd.f32 %v8728_v33, %v2483_v58  ;;  %v2798_v18 = vadd.f32 %v8734_v12, %v2763_v3  ;;  %4087 = vmatmul.msk.f32.vlgmr.msra.gmra.mxu1 %vm3638_vm10, %v7479_v9  ;;  %4090 = vmatmul.msk.f32.vlgmr.msra.gmra.mxu3 %vm3638_vm10, %v7479_v9  ;;  %v8736_v19 = vld [vmem:[#allocation105_spill] sm:$0xff]  ;;  %v8749_v56 = vld [vmem:[#allocation82_spill] sm:$0xff] }
 0x576   :  { %3933 = vmatpush.msrb.mxu1 %v835_v31  ;;  %3953 = vmatpush.msrb.mxu3 %v836_v44  ;;  %v828_v31 = vmax.f32 %v7880_v49, 0.0  ;;  %v834_v49 = vmax.f32 %v798_v35, 0.0  ;;  %v8735_v44 = vld [vmem:[#allocation89_spill] sm:$0xff]  ;;  %v8752_v35 = vld [vmem:[#allocation87_spill] sm:$0xff] }
 0x577   :  { %3767 = vmatpush.msra.mxu0 %v2968_v34  ;;  %3819 = vmatpush.msra.mxu2 %v2969_v17  ;;  %v829_v38 = vmax.f32 %v751_v45, 0.0  ;;  %v2553_v58 = vadd.f32 %v8740_v1, %v2518_v16  ;;  %v830_v34 = vmax.f32 %v795_v20, 0.0  ;;  %v8741_v17 = vld [vmem:[#allocation73_spill] sm:$0xff]  ;;  %v2833_v37 = vadd.f32 %v8746_v7, %v2798_v18  ;;  %v8755_v16 = vld [vmem:[#allocation43_spill] sm:$0xff]  ;;  %v3626_v7 = vpop.permute.xlu2 %3625 }
 0x578   :  { %3768 = vmatmul.f32.vlgmr.msra.gmra.mxu0 %v7409_v6  ;;  %3820 = vmatmul.f32.vlgmr.msra.gmra.mxu2 %v7409_v6  ;;  %v3718_v39 = vadd.f32 %v7936_v5, %v3626_v7 }
 0x579   :  { %3934 = vmatpush.msrb.mxu1 %v831_v59  ;;  %3954 = vmatpush.msrb.mxu3 %v832_v23  ;;  %v8745_v59 = vld [vmem:[#allocation91_spill] sm:$0xff]  ;;  %v8751_v23 = vld [vmem:[#allocation132_spill] sm:$0xff]  ;;  %v2588_v62 = vadd.f32 %v8757_v40, %v2553_v58 }
 0x57a   :  { %3973 = vmatpush.msrb.mxu0 %v837_v27  ;;  %3993 = vmatpush.msrb.mxu2 %v838_v2  ;;  %v2286_v6 = vpop.permute.xlu0 %2285  ;;  %v2448_v27 = vadd.f32 %v8752_v35, %v2413_v63  ;;  %v8753_v2 = vld [vmem:[#allocation79_spill] sm:$0xff]  ;;  %v8765_v63 = vld [vmem:[#allocation62_spill] sm:$0xff] }
 0x57b   :  { %v2346_v53 = vadd.f32 %v8735_v44, %v2286_v6  ;;  %v2486_v15 = vadd.f32 %v8736_v19, %v2286_v6  ;;  %v2626_v24 = vadd.f32 %v8737_v43, %v2286_v6  ;;  %3935 = vmatpush.msrb.mxu1 %v827_v29  ;;  %3955 = vmatpush.msrb.mxu3 %v828_v31  ;;  %v8762_v19 = vld [vmem:[#allocation75_spill] sm:$0xff]  ;;  %v3720_v43 = vpop.f32.mrf.mxu2 }
 0x57c   :  { %v2766_v26 = vadd.f32 %v8738_v47, %v2286_v6  ;;  %3974 = vmatpush.msrb.mxu0 %v833_v11  ;;  %3994 = vmatpush.msrb.mxu2 %v834_v49  ;;  %v2693_v29 = vadd.f32 %v8745_v59, %v2658_v21  ;;  %v2550_v8 = vadd.f32 %v8753_v2, %v2515_v14  ;;  %v8759_v21 = vld [vmem:[#allocation42_spill] sm:$0xff] }
 0x57d   :  { %v2381_v9 = vadd.f32 %v8741_v17, %v2346_v53  ;;  %v2521_v52 = vadd.f32 %v8742_v61, %v2486_v15  ;;  %v2661_v46 = vadd.f32 %v8743_v13, %v2626_v24  ;;  %v8761_v6 = vld [vmem:[#allocation126_spill] sm:$0xff]  ;;  %4088 = vmatmul.msk.f32.gmra.mxu1 %vm3638_vm10, %v7508_v54  ;;  %4091 = vmatmul.msk.f32.gmra.mxu3 %vm3638_vm10, %v7508_v54  ;;  %v8766_v54 = vld [vmem:[#allocation92_spill] sm:$0xff] }
 0x57e   :  { %v2801_v0 = vadd.f32 %v8744_v30, %v2766_v26  ;;  %3975 = vmatpush.msrb.mxu0 %v829_v38  ;;  %3995 = vmatpush.msrb.mxu2 %v830_v34  ;;  %v2728_v12 = vadd.f32 %v8759_v21, %v2693_v29  ;;  %v2830_v49 = vadd.f32 %v8761_v6, %v2795_v55  ;;  %v8763_v38 = vld [vmem:[#allocation103_spill] sm:$0xff]  ;;  %v2887_v55 = vmax.f32 %v2588_v62, 0.0 }
 0x57f   :  { %v2416_v3 = vadd.f32 %v8748_v22, %v2381_v9  ;;  %v2556_v45 = vadd.f32 %v8749_v56, %v2521_v52  ;;  %v2696_v20 = vadd.f32 %v8750_v32, %v2661_v46  ;;  %v2868_v15 = vadd.f32 %v8762_v19, %v2833_v37  ;;  %v8764_v26 = vld [vmem:[#allocation51_spill] sm:$0xff] }
 0x580   :  { %3771 = vmatmul.f32.gmra.mxu0 %v7438_v51  ;;  %3823 = vmatmul.f32.gmra.mxu2 %v7438_v51  ;;  %v2836_v28 = vadd.f32 %v8751_v23, %v2801_v0  ;;  %v8760_v51 = vld [vmem:[#allocation61_spill] sm:$0xff]  ;;  %v2445_v47 = vadd.f32 %v8763_v38, %v2410_v10  ;;  %v2585_v25 = vadd.f32 %v8764_v26, %v2550_v8  ;;  %v2888_v34 = vmax.f32 %v2728_v12, 0.0 }
 0x581   :  { %v2451_v33 = vadd.f32 %v8754_v42, %v2416_v3  ;;  %v2591_v31 = vadd.f32 %v8755_v16, %v2556_v45  ;;  %v2731_v48 = vadd.f32 %v8756_v57, %v2696_v20  ;;  %v2690_v18 = vadd.f32 %v8760_v51, %v2655_v36 }
 0x582   :  { %v3743_v11 = vpop.f32.mrf.mxu3  ;;  %v2871_v41 = vadd.f32 %v8758_v60, %v2836_v28  ;;  %v2886_v36 = vmax.f32 %v2448_v27, 0.0  ;;  %v2865_v58 = vadd.f32 %v8766_v54, %v2830_v49  ;;  %v2889_v17 = vmax.f32 %v2868_v15, 0.0  ;;  %v3636_v0 = vpop.permute.xlu0 %3635 }
 0x583   :  { %v2890_v14 = vmax.f32 %v2451_v33, 0.0  ;;  %v2891_v44 = vmax.f32 %v2591_v31, 0.0  ;;  %v2892_v53 = vmax.f32 %v2731_v48, 0.0  ;;  %v2725_v1 = vadd.f32 %v8765_v63, %v2690_v18  ;;  %v3723_v30 = vpop.f32.mrf.mxu2 }
 0x584   :  { %v2893_v24 = vmax.f32 %v2871_v41, 0.0  ;;  %v2882_v9 = vmax.f32 %v2445_v47, 0.0  ;;  %v2883_v61 = vmax.f32 %v2585_v25, 0.0  ;;  %v2885_v13 = vmax.f32 %v2865_v58, 0.0 }
 0x585   :  { %3936 = vmatpush.msrb.mxu1 %v2890_v14  ;;  %3956 = vmatpush.msrb.mxu3 %v2891_v44  ;;  %v2884_v52 = vmax.f32 %v2725_v1, 0.0  ;;  %v3724_v29 = vadd.f32 %v3723_v30, %v3636_v0  ;;  %v3744_v3 = vadd.f32 %v3743_v11, %v3718_v39 }
 0x586   :  { %3976 = vmatpush.msrb.mxu0 %v2892_v53  ;;  %3996 = vmatpush.msrb.mxu2 %v2893_v24 }
 0x587   :  { %3937 = vmatpush.msrb.mxu1 %v2886_v36  ;;  %3957 = vmatpush.msrb.mxu3 %v2887_v55  ;;  %v3857_v32 = vmax.f32 %v3744_v3, 0.0 }
 0x588   :  { %3774 = vmatmul.f32.gmra.mxu0 %v7473_v50  ;;  %3826 = vmatmul.f32.gmra.mxu2 %v7473_v50  ;;  %v3631_v50 = vpop.permute.xlu1 %3630 }
 0x589   :  { %3977 = vmatpush.msrb.mxu0 %v2888_v34  ;;  %3997 = vmatpush.msrb.mxu2 %v2889_v17  ;;  %v3721_v59 = vadd.f32 %v3720_v43, %v3631_v50 }
 0x58a   :  { %3938 = vmatpush.msrb.mxu1 %v2882_v9  ;;  %3958 = vmatpush.msrb.mxu3 %v2883_v61  ;;  %v3746_v46 = vpop.f32.mrf.mxu3  ;;  %v3921_v61 = vpop.permute.xlu0 %3920 }
 0x58b   :  { %4089 = vmatmul.msk.f32.gmra.mxu1 %vm3638_vm10, %v7547_v4  ;;  %4092 = vmatmul.msk.f32.gmra.mxu3 %vm3638_vm10, %v7547_v4  ;;  %v3747_v10 = vadd.f32 %v3746_v46, %v3721_v59  ;;  %v3880_v4 = vld [vmem:[%s8013_s6] sm:$0xff] }
 0x58c   :  { %3978 = vmatpush.msrb.mxu0 %v2884_v52  ;;  %3998 = vmatpush.msrb.mxu2 %v2885_v13 }
 0x58d   :  { %v3861_v45 = vmax.f32 %v3747_v10, 0.0 }
 0x592   :  { %v3749_v37 = vpop.f32.mrf.mxu3 }
 0x593   :  { %v3750_v22 = vadd.f32 %v3749_v37, %v3724_v29 }
 0x595   :  { %v3865_v56 = vmax.f32 %v3750_v22, 0.0 }
 0x597   :  { %3959 = vmatpush.msrb.mxu3 %v3865_v56 }
 0x599   :  { %3960 = vmatpush.msrb.mxu3 %v3861_v45 }
 0x59b   :  { %3961 = vmatpush.msrb.mxu3 %v3857_v32 }
 0x59c   :  { %4094 = vmatmul.msk.f32.vlgmr.msrb.gmra.mxu3 %vm599_vm8, %v3880_v4 }
 0x5c1   :  { %v3691_v20 = vpop.f32.mrf.mxu1 }
 0x5c9   :  { %v3694_v28 = vpop.f32.mrf.mxu1 }
 0x5cb   :  { %v3665_v23 = vpop.f32.mrf.mxu0 }
 0x5cc   :  { %v3666_v8 = vadd.f32 %v3665_v23, %v3626_v7 }
 0x5ce   :  { %v3692_v31 = vadd.f32 %v3691_v20, %v3666_v8 }
 0x5d0   :  { %v3856_v40 = vmax.f32 %v3692_v31, 0.0 }
 0x5d1   :  { %v3697_v2 = vpop.f32.mrf.mxu1 }
 0x5d3   :  { %v3668_v35 = vpop.f32.mrf.mxu0 }
 0x5d4   :  { %v3669_v5 = vadd.f32 %v3668_v35, %v3631_v50 }
 0x5d6   :  { %v3695_v33 = vadd.f32 %v3694_v28, %v3669_v5 }
 0x5d8   :  { %v3860_v48 = vmax.f32 %v3695_v33, 0.0 }
 0x5db   :  { %v3671_v27 = vpop.f32.mrf.mxu0 }
 0x5dc   :  { %v3672_v42 = vadd.f32 %v3671_v27, %v3636_v0 }
 0x5de   :  { %v3698_v16 = vadd.f32 %v3697_v2, %v3672_v42 }
 0x5e0   :  { %v3864_v57 = vmax.f32 %v3698_v16, 0.0 }
 0x5e2   :  { %3939 = vmatpush.msrb.mxu1 %v3864_v57 }
 0x5e4   :  { %3940 = vmatpush.msrb.mxu1 %v3860_v48 }
 0x5e6   :  { %3941 = vmatpush.msrb.mxu1 %v3856_v40 }
 0x5e7   :  { %4093 = vmatmul.msk.f32.vlgmr.msrb.gmra.mxu1 %vm599_vm8, %v3880_v4 }
 0x5f2   :  { %v3795_v11 = vpop.f32.mrf.mxu1 }
 0x5f5   :  { %v3769_v62 = vpop.f32.mrf.mxu0 }
 0x5f6   :  { %v3770_v44 = vadd.f32 %v3769_v62, %v3626_v7 }
 0x5f8   :  { %v3847_v21 = vpop.f32.mrf.mxu3  ;;  %v3796_v43 = vadd.f32 %v3795_v11, %v3770_v44 }
 0x5fa   :  { %v3798_v12 = vpop.f32.mrf.mxu1  ;;  %v3858_v63 = vmax.f32 %v3796_v43, 0.0 }
 0x5fb   :  { %v3821_v60 = vpop.f32.mrf.mxu2 }
 0x5fc   :  { %v3822_v25 = vadd.f32 %v3821_v60, %v3626_v7 }
 0x5fd   :  { %v3772_v41 = vpop.f32.mrf.mxu0 }
 0x5fe   :  { %v3773_v18 = vadd.f32 %v3772_v41, %v3631_v50  ;;  %v3848_v58 = vadd.f32 %v3847_v21, %v3822_v25 }
 0x600   :  { %v3850_v14 = vpop.f32.mrf.mxu3  ;;  %v3799_v19 = vadd.f32 %v3798_v12, %v3773_v18  ;;  %v3859_v9 = vmax.f32 %v3848_v58, 0.0 }
 0x602   :  { %v3862_v36 = vmax.f32 %v3799_v19, 0.0 }
 0x603   :  { %v3824_v51 = vpop.f32.mrf.mxu2 }
 0x604   :  { %v3825_v24 = vadd.f32 %v3824_v51, %v3631_v50 }
 0x605   :  { %v3775_v6 = vpop.f32.mrf.mxu0 }
 0x606   :  { %v3776_v49 = vadd.f32 %v3775_v6, %v3636_v0  ;;  %v3851_v1 = vadd.f32 %v3850_v14, %v3825_v24 }
 0x608   :  { %v3801_v53 = vpop.f32.mrf.mxu1  ;;  %v3863_v17 = vmax.f32 %v3851_v1, 0.0 }
 0x609   :  { %v3802_v15 = vadd.f32 %v3801_v53, %v3776_v49 }
 0x60b   :  { %v3866_v38 = vmax.f32 %v3802_v15, 0.0  ;;  %v3827_v47 = vpop.f32.mrf.mxu2 }
 0x60c   :  { %v3828_v26 = vadd.f32 %v3827_v47, %v3636_v0 }
 0x60d   :  { %3979 = vmatpush.msrb.mxu0 %v3866_v38 }
 0x60e   :  { %v3853_v55 = vpop.f32.mrf.mxu3 }
 0x60f   :  { %v3854_v54 = vadd.f32 %v3853_v55, %v3828_v26  ;;  %3980 = vmatpush.msrb.mxu0 %v3862_v36 }
 0x611   :  { %v3867_v34 = vmax.f32 %v3854_v54, 0.0  ;;  %3981 = vmatpush.msrb.mxu0 %v3858_v63 }
 0x612   :  { %4095 = vmatmul.msk.f32.vlgmr.msrb.gmra.mxu0 %vm599_vm8, %v3880_v4 }
 0x613   :  { %3999 = vmatpush.msrb.mxu2 %v3867_v34 }
 0x615   :  { %4000 = vmatpush.msrb.mxu2 %v3863_v17 }
 0x617   :  { %4001 = vmatpush.msrb.mxu2 %v3859_v9 }
 0x618   :  { %4096 = vmatmul.msk.f32.vlgmr.msrb.gmra.mxu2 %vm599_vm8, %v3880_v4 }
 0x61f   :  { %v3963_v52 = vpop.f32.mrf.mxu3 }
 0x620   :  { %v3964_v13 = vadd.f32 %v3963_v52, %v3921_v61 }
 0x622   :  { %4007 = vst [vmem:[%s8014_s8 + $0x8] sm:$0xff] %v3964_v13 }
 0x664   :  { %v3943_v46 = vpop.f32.mrf.mxu1 }
 0x665   :  { %v3944_v30 = vadd.f32 %v3943_v46, %v3921_v61 }
 0x667   :  { %4006 = vst [vmem:[%s8014_s8] sm:$0xff] %v3944_v30 }
 0x68f   :  { %v3983_v0 = vpop.f32.mrf.mxu0 }
 0x690   :  { %v3984_v50 = vadd.f32 %v3983_v0, %v3921_v61 }
 0x692   :  { %4008 = vst [vmem:[%s8014_s8 + $0x10] sm:$0xff] %v3984_v50 }
 0x69b   :  { %v4003_v59 = vpop.f32.mrf.mxu2 }
 0x69c   :  { %v4004_v29 = vadd.f32 %v4003_v59, %v3921_v61 }
 0x69e   :  { %4009 = vst [vmem:[%s8014_s8 + $0x18] sm:$0xff] %v4004_v29 }

</bundles_post_ra>
